<compile_context>
chip_gen: v6e
topology: v6e:2x2x1
jax: 0.10.0
libtpu: 0.0.40
codegen_flags: <defaults>
</compile_context>

<pallas_src>
import math
from functools import partial

import jax
import jax.numpy as jnp
from jax import lax
from jax.experimental import pallas as pl
from jax.experimental.pallas import tpu as pltpu

F32 = jnp.float32
BF16 = jnp.bfloat16
NEG_INF = -1000000000.0
P = 128  # lane-padded channel width used by every kernel operand


def _pad_last(x, target=P):
    pad = target - x.shape[-1]
    if pad == 0:
        return x
    return jnp.pad(x, [(0, 0)] * (x.ndim - 1) + [(0, pad)])


def _batch_tile(B, target=8):
    """Largest divisor of B that is <= target, preferring >= 2 grid steps."""
    cands = [t for t in range(1, min(B, target) + 1) if B % t == 0]
    multi = [t for t in cands if B // t >= 2]
    return max(multi) if multi else max(cands)


# ----------------------------------------------------------------------------
# Fused per-block kernel (batch-tiled):
#   encoder (enc_layers x [mask -> conv1d 'same' k=3 -> relu])
#   -> concat([x, enc])  (realized as an add: enc weights are pre-shifted)
#   -> alignment ('linear', temperature folded into the a-projection)
#   -> fusion ('full', all branches in one K=4P matmul)
# Layout: the a and b sequences ride a leading pair axis of size 2 (weight
# sharing doubles matmul rows), the grid tiles the batch axis.
# ----------------------------------------------------------------------------
def _re2_block_kernel(x_ref, mrow_ref, mcol_ref,
                      wenc_ref, benc_ref, wal_ref, bal_ref,
                      wfuse_ref, bfb_ref, wo_ref, bo_ref, out_ref):
    TWO, TB, L, PP = x_ref.shape            # (2, TB, L, 128)
    N = TWO * TB
    R = N * L

    x = x_ref[...].reshape(N, L, PP)        # rows: a-batch tile then b-batch tile
    mrow = mrow_ref[...]                    # (2, TB, L, 1)  (1.0 where ids == 0)
    m3 = mrow.reshape(N, L, 1)

    wenc = wenc_ref[...]                    # (n_enc, 3P, P) bf16
    benc = benc_ref[...]                    # (n_enc, 1, P) f32

    # boundary-zero masks for the 'same' conv shifts (zero padding at t=0 / t=L-1)
    tpos = lax.broadcasted_iota(jnp.int32, (1, L, PP), 1)
    not_first = (tpos != 0).astype(F32)
    not_last = (tpos != (L - 1)).astype(F32)

    # ---- encoder: enc_layers x (mask -> conv1d 'same' -> relu) --------------
    h = x
    for layer in range(wenc.shape[0]):
        hm = m3 * h                                           # (N, L, P) f32
        hm_prev = pltpu.roll(hm, shift=1, axis=1) * not_first     # reads h[t-1]
        hm_next = pltpu.roll(hm, shift=L - 1, axis=1) * not_last  # reads h[t+1]
        taps = jnp.concatenate([hm_prev, hm, hm_next], axis=-1)   # (N, L, 3P)
        z = jnp.dot(taps.reshape(R, 3 * PP).astype(BF16), wenc[layer],
                    preferred_element_type=F32)
        h = jnp.maximum(z + benc[layer], 0.0).reshape(N, L, PP)
    # last layer's output columns are pre-shifted to lanes [e_in, e_in+H)

    # concat([x, enc]) along channels == plain add in the padded lane space
    x_cat = x + h                                             # (N, L, P)

    # ---- alignment ('linear'); temperature folded into the a-projection -----
    # NOTE: folding temperature into w1/b1 relies on relu positive-homogeneity
    # (temperature = sqrt(1/H) > 0).
    wal = wal_ref[...]                      # (2, P, P) bf16
    bal = bal_ref[...]                      # (2, 1, P) f32
    a_cat = x_cat[:TB]                      # (TB, L, P)
    b_cat = x_cat[TB:]
    a_cat_bf = a_cat.astype(BF16)
    b_cat_bf = b_cat.astype(BF16)
    ap = jnp.maximum(jnp.dot(a_cat_bf.reshape(TB * L, PP), wal[0],
                             preferred_element_type=F32) + bal[0], 0.0)
    bp = jnp.maximum(jnp.dot(b_cat_bf.reshape(TB * L, PP), wal[1],
                             preferred_element_type=F32) + bal[1], 0.0)
    ap = ap.reshape(TB, L, PP).astype(BF16)
    bp = bp.reshape(TB, L, PP).astype(BF16)

    # attention masks rebuilt in-kernel from the tiny per-token masks
    mcol = mcol_ref[...]                    # (2, TB, 1, L)
    m_ab = mrow[0] * mcol[1]                # (TB, L, L): a_mask_i * b_mask_j
    m_ba = mrow[1] * mcol[0]                # (TB, L, L): b_mask_j * a_mask_i

    # attention logits both ways (recompute avoids an in-kernel LxL transpose).
    # TODO(synk): on v5e (weak MXU, 3 XLUs) a vxpose of `s` would be cheaper.
    s = jnp.einsum('bid,bjd->bij', ap, bp, preferred_element_type=F32)
    st = jnp.einsum('bjd,bid->bji', bp, ap, preferred_element_type=F32)
    s = m_ab * s + (1.0 - m_ab) * NEG_INF
    st = m_ba * st + (1.0 - m_ba) * NEG_INF

    # softmax over dim=2 of s  -> b_attention
    e = jnp.exp(s - jnp.max(s, axis=-1, keepdims=True))
    b_attn = e * pl.reciprocal(jnp.sum(e, axis=-1, keepdims=True), approx=True)
    # softmax over dim=1 of s (via the transposed logits) -> a_attention^T
    et = jnp.exp(st - jnp.max(st, axis=-1, keepdims=True))
    a_attn_t = et * pl.reciprocal(jnp.sum(et, axis=-1, keepdims=True), approx=True)

    a_feat = jnp.einsum('bji,bid->bjd', a_attn_t.astype(BF16), a_cat_bf,
                        preferred_element_type=F32)           # (TB, L, P)
    b_feat = jnp.einsum('bij,bjd->bid', b_attn.astype(BF16), b_cat_bf,
                        preferred_element_type=F32)           # (TB, L, P)
    al = jnp.concatenate([a_feat, b_feat], axis=0)            # (N, L, P) f32

    # ---- fusion ('full') as one K=4P bf16 matmul -----------------------------
    xf = x_cat.reshape(R, PP)
    alf = al.reshape(R, PP)
    ops = jnp.concatenate([xf, alf, xf - alf, xf * alf], axis=-1).astype(BF16)
    hmid = jnp.maximum(jnp.dot(ops, wfuse_ref[...],
                               preferred_element_type=F32) + bfb_ref[...], 0.0)
    out = jnp.maximum(jnp.dot(hmid.astype(BF16), wo_ref[...],
                              preferred_element_type=F32) + bo_ref[...], 0.0)
    out_ref[...] = out.reshape(TWO, TB, L, PP)


# ----------------------------------------------------------------------------
# Prediction kernel (batch-tiled): masked sum pooling + Prediction('full') head.
# Kept in f32: masked/padded lanes pool to ~-1e10 and are cancelled only by the
# exact-zero rows of the packed w1.
# ----------------------------------------------------------------------------
def _prediction_kernel(x_ref, mrow_ref, w1_ref, b1_ref, w2_ref, b2_ref, o_ref):
    x = x_ref[...]                          # (2, TB, L, P)
    m = mrow_ref[...]                       # (2, TB, L, 1)
    pooled = jnp.sum(m * x + (1.0 - m) * NEG_INF, axis=2)     # (2, TB, P)
    af = pooled[0]
    bf = pooled[1]
    feats = jnp.concatenate([af, bf, af * bf, af - bf], axis=-1)   # (TB, 4P)
    h = jnp.maximum(jnp.dot(feats, w1_ref[...],
                            preferred_element_type=F32) + b1_ref[...], 0.0)
    logits = jnp.dot(h, w2_ref[...], preferred_element_type=F32) + b2_ref[...]
    o_ref[:, 0, :] = logits


# ----------------------------------------------------------------------------
# Host glue
# ----------------------------------------------------------------------------
def augmented_residual(inputs, res_inputs, index):
    if index == 1:
        return jnp.concatenate([res_inputs, inputs], axis=-1)
    if index > 1:
        h = inputs.shape[-1]
        merged = (res_inputs[:, :, -h:] + inputs) * math.sqrt(0.5)
        return jnp.concatenate([res_inputs[:, :, :-h], merged], axis=-1)
    return inputs


def re2_forward(emb, packed, a_ids, b_ids, *, hidden, classes):
    B, L = a_ids.shape
    a_mask = (a_ids == 0).astype(F32)[:, :, None]                  # (B, L, 1)
    b_mask = (b_ids == 0).astype(F32)[:, :, None]
    mrow = jnp.stack([a_mask, b_mask], axis=0)                     # (2, B, L, 1)
    mcol = jnp.stack([a_mask[..., 0], b_mask[..., 0]], axis=0)[:, :, None, :]  # (2, B, 1, L)

    TB = _batch_tile(B)
    grid = (B // TB,)
    bmap4 = lambda i: (0, i, 0, 0)

    def full_spec(arr):
        nd = arr.ndim
        return pl.BlockSpec(arr.shape, lambda i: (0,) * nd)

    cparams = pltpu.CompilerParams(
        dimension_semantics=("parallel",),
        vmem_limit_bytes=32 * 1024 * 1024)

    # TODO(synk): embedding gather + augmented-residual glue stay in plain JAX
    # (pure gathers/concats, no conv/matmul hot path).
    a_out = emb[a_ids]
    b_out = emb[b_ids]
    a_res, b_res = a_out, b_out

    fused = None
    for idx, bp in enumerate(packed["blocks"]):
        if idx > 0:
            a_out = augmented_residual(fused[0, :, :, :hidden], a_res, idx)
            b_out = augmented_residual(fused[1, :, :, :hidden], b_res, idx)
            a_res, b_res = a_out, b_out
        x = jnp.stack([_pad_last(a_out), _pad_last(b_out)], axis=0)  # (2, B, L, P)
        weights = (bp["wenc"], bp["benc"], bp["wal"], bp["bal"],
                   bp["wfuse"], bp["bfb"], bp["wo"], bp["bo"])
        n_enc = bp["wenc"].shape[0]
        rows = 2 * B * L
        flops = int(2 * rows * P * P * (3 * n_enc + 1 + 4 + 1) + 8 * B * L * L * P)
        wbytes = sum(int(w.size) * w.dtype.itemsize for w in weights)
        cost = pl.CostEstimate(
            flops=flops,
            transcendentals=int(2 * B * L * L),
            bytes_accessed=int(2 * x.size * 4 + mrow.size * 4 + mcol.size * 4 + wbytes))
        fused = pl.pallas_call(
            _re2_block_kernel,
            out_shape=jax.ShapeDtypeStruct((2, B, L, P), F32),
            grid=grid,
            in_specs=[pl.BlockSpec((2, TB, L, P), bmap4),
                      pl.BlockSpec((2, TB, L, 1), bmap4),
                      pl.BlockSpec((2, TB, 1, L), bmap4)]
                     + [full_spec(w) for w in weights],
            out_specs=pl.BlockSpec((2, TB, L, P), bmap4),
            compiler_params=cparams,
            cost_estimate=cost,
        )(x, mrow, mcol, *weights)

    pp = packed["pred"]
    pweights = (pp["w1"], pp["b1"], pp["w2"], pp["b2"])
    pcost = pl.CostEstimate(
        flops=int(2 * B * (4 * P * P + P * P)),
        transcendentals=0,
        bytes_accessed=int(fused.size * 4 + mrow.size * 4
                           + sum(int(w.size) * 4 for w in pweights)))
    logits = pl.pallas_call(
        _prediction_kernel,
        out_shape=jax.ShapeDtypeStruct((B, 1, P), F32),
        grid=grid,
        in_specs=[pl.BlockSpec((2, TB, L, P), bmap4),
                  pl.BlockSpec((2, TB, L, 1), bmap4)]
                 + [full_spec(w) for w in pweights],
        out_specs=pl.BlockSpec((TB, 1, P), lambda i: (i, 0, 0)),
        compiler_params=cparams,
        cost_estimate=pcost,
    )(fused, mrow, *pweights)
    return logits[:, 0, :classes]


# ----------------------------------------------------------------------------
# Host-side weight packing: pad channels to 128, pre-shift the last encoder
# layer's output columns (so concat == add), fold temperature into the
# a-projection (valid: temperature > 0, relu is positive-homogeneous), stack
# conv taps into one (3P, P) weight, stack fusion branches into one (4P, P)
# weight, cast MXU weights to bf16.
# ----------------------------------------------------------------------------
def pack_params(params):
    H = params["blocks"][0]["enc"][0][0].shape[-1]
    temp = params["temperature"]
    packed = {"blocks": []}
    for blk in params["blocks"]:
        d_align = blk["align"]["w1"].shape[0]
        e_in = d_align - H
        n_enc = len(blk["enc"])
        wenc, benc = [], []
        for li, (w, b) in enumerate(blk["enc"]):
            cin, cout = w.shape[1], w.shape[2]
            off = e_in if li == n_enc - 1 else 0
            wl = jnp.zeros((3 * P, P), F32)
            for k in range(3):   # tap k reads x[t + k - 1]
                wl = wl.at[k * P:k * P + cin, off:off + cout].set(w[k])
            wenc.append(wl)
            benc.append(jnp.zeros((1, P), F32).at[:, off:off + cout].set(b))
        wenc = jnp.stack(wenc).astype(BF16)                    # (n_enc, 3P, P)
        benc = jnp.stack(benc)                                 # (n_enc, 1, P)
        # alignment (temperature folded into the a-projection)
        w1 = blk["align"]["w1"] * temp
        b1 = blk["align"]["b1"] * temp
        w2, b2 = blk["align"]["w2"], blk["align"]["b2"]
        wal = jnp.stack([
            jnp.zeros((P, P), F32).at[:d_align, :H].set(w1),
            jnp.zeros((P, P), F32).at[:d_align, :H].set(w2),
        ]).astype(BF16)
        bal = jnp.stack([_pad_last(b1), _pad_last(b2)])        # (2, 1, P)
        # fusion: one stacked (4P, P) weight over [x | al | x-al | x*al]
        f = blk["fuse"]
        wfuse = jnp.zeros((4 * P, P), F32)
        for i in range(3):
            wfuse = wfuse.at[:d_align, i * H:(i + 1) * H].set(f["wx"][i])
        wfuse = wfuse.at[P:P + d_align, 0:H].set(f["wa"][0])          # al branch
        wfuse = wfuse.at[2 * P:2 * P + d_align, H:2 * H].set(f["wa"][1])   # x-al
        wfuse = wfuse.at[3 * P:3 * P + d_align, 2 * H:3 * H].set(f["wa"][2])  # x*al
        bfb = jnp.zeros((1, P), F32)
        for i in range(3):
            bfb = bfb.at[:, i * H:(i + 1) * H].set(f["bh"][i])
        wo = jnp.zeros((P, P), F32)
        for i in range(3):
            wo = wo.at[i * H:(i + 1) * H, :H].set(f["wo"][i])
        bo = _pad_last(f["bo"])
        packed["blocks"].append(dict(
            wenc=wenc, benc=benc, wal=wal, bal=bal,
            wfuse=wfuse.astype(BF16), bfb=bfb, wo=wo.astype(BF16), bo=bo))
    # prediction head (kept f32: pooled magnitudes in masked lanes are huge)
    pr = params["pred"]
    C = pr["w2"].shape[-1]
    w1 = jnp.zeros((4 * P, P), F32)
    for i in range(4):
        w1 = w1.at[i * P:i * P + H, :H].set(pr["w1"][i])
    packed["pred"] = dict(
        w1=w1, b1=_pad_last(pr["b1"]),
        w2=jnp.zeros((P, P), F32).at[:H, :C].set(pr["w2"]),
        b2=_pad_last(pr["b2"]))
    return packed


# ----------------------------------------------------------------------------
# Deterministic parameter init (synthetic, PyTorch-fan-in-style uniform)
# ----------------------------------------------------------------------------
def init_params(key, vocab, E, H, C, block_layer_num=2, enc_layers=2):
    keys = iter(jax.random.split(key, 64))

    def dense(din, dout):
        bound = 1.0 / math.sqrt(din)
        w = jax.random.uniform(next(keys), (din, dout), F32, -bound, bound)
        b = jax.random.uniform(next(keys), (1, dout), F32, -bound, bound)
        return w, b

    def conv(cin, cout, k=3):
        bound = 1.0 / math.sqrt(cin * k)
        w = jax.random.uniform(next(keys), (k, cin, cout), F32, -bound, bound)
        b = jax.random.uniform(next(keys), (1, cout), F32, -bound, bound)
        return w, b

    params = {
        "emb": jax.random.normal(next(keys), (vocab, E), F32) * 0.1,
        "temperature": math.sqrt(1.0 / H),
        "blocks": [],
    }
    for idx in range(block_layer_num):
        e_in = E if idx == 0 else E + H
        d_align = e_in + H
        enc = [conv(e_in if l == 0 else H, H) for l in range(enc_layers)]
        w1, b1 = dense(d_align, H)
        w2, b2 = dense(d_align, H)
        fwx, fwa, fbh = [], [], []
        for _ in range(3):
            w, bb = dense(2 * d_align, H)
            fwx.append(w[:d_align])
            fwa.append(w[d_align:])
            fbh.append(bb)
        wo, bo = dense(3 * H, H)
        params["blocks"].append(dict(
            enc=enc,
            align=dict(w1=w1, b1=b1, w2=w2, b2=b2),
            fuse=dict(wx=jnp.stack(fwx), wa=jnp.stack(fwa), bh=jnp.stack(fbh),
                      wo=jnp.stack([wo[i * H:(i + 1) * H] for i in range(3)]), bo=bo),
        ))
    pw1, pb1 = dense(4 * H, H)
    pw2, pb2 = dense(H, C)
    params["pred"] = dict(w1=jnp.stack([pw1[i * H:(i + 1) * H] for i in range(4)]),
                          b1=pb1, w2=pw2, b2=pb2)
    return params


# ----------------------------------------------------------------------------
# Pure-JAX reference (same math as the PyTorch module, f32 HIGHEST precision)
# ----------------------------------------------------------------------------
def re2_reference(params, a_ids, b_ids):
    mm = lambda x, y: jnp.matmul(x, y, precision=lax.Precision.HIGHEST)
    relu = lambda v: jnp.maximum(v, 0.0)
    a_mask = (a_ids == 0).astype(F32)[:, :, None]
    b_mask = (b_ids == 0).astype(F32)[:, :, None]
    a_out = params["emb"][a_ids]
    b_out = params["emb"][b_ids]
    a_res, b_res = a_out, b_out
    temp = params["temperature"]

    def enc(x, mask, layers):
        h = x
        for (w, bb) in layers:
            hp = jnp.pad(mask * h, ((0, 0), (1, 1), (0, 0)))
            o = bb
            for k in range(3):
                o = o + mm(hp[:, k:k + x.shape[1], :], w[k])
            h = relu(o)
        return h

    def align(a, am, b, bm, p):
        ap = relu(mm(a, p["w1"]) + p["b1"])
        bp = relu(mm(b, p["w2"]) + p["b2"])
        attn = mm(ap, jnp.swapaxes(bp, 1, 2)) * temp
        m = mm(am, jnp.swapaxes(bm, 1, 2))
        attn = m * attn + (1.0 - m) * NEG_INF
        a_attn = jax.nn.softmax(attn, axis=1)
        b_attn = jax.nn.softmax(attn, axis=2)
        return mm(jnp.swapaxes(a_attn, 1, 2), a), mm(b_attn, b)

    def fuse(x, al, p):
        acc = 0.0
        branches = (al, x - al, x * al)
        for i in range(3):
            h = relu(mm(x, p["wx"][i]) + mm(branches[i], p["wa"][i]) + p["bh"][i])
            acc = acc + mm(h, p["wo"][i])
        return relu(acc + p["bo"])

    for idx, blk in enumerate(params["blocks"]):
        if idx > 0:
            a_out = augmented_residual(a_out, a_res, idx)
            b_out = augmented_residual(b_out, b_res, idx)
            a_res, b_res = a_out, b_out
        a_enc = enc(a_out, a_mask, blk["enc"])
        b_enc = enc(b_out, b_mask, blk["enc"])
        a_out = jnp.concatenate([a_out, a_enc], -1)
        b_out = jnp.concatenate([b_out, b_enc], -1)
        a_al, b_al = align(a_out, a_mask, b_out, b_mask, blk["align"])
        a_out = fuse(a_out, a_al, blk["fuse"])
        b_out = fuse(b_out, b_al, blk["fuse"])

    p = params["pred"]
    af = jnp.sum(a_mask * a_out + (1.0 - a_mask) * NEG_INF, axis=1)
    bf = jnp.sum(b_mask * b_out + (1.0 - b_mask) * NEG_INF, axis=1)
    feats = (af, bf, af * bf, af - bf)
    h = p["b1"]
    for i in range(4):
        h = h + mm(feats[i], p["w1"][i])
    h = relu(h)
    return mm(h, p["w2"]) + p["b2"]


# ----------------------------------------------------------------------------
if __name__ == "__main__":
    key = jax.random.PRNGKey(0)
    B, L, V, E, H, C = 2, 8, 50, 32, 32, 2   # batch, seq, vocab, emb, hidden, classes
    pkey, akey, bkey = jax.random.split(key, 3)
    params = init_params(pkey, V, E, H, C)
    packed = pack_params(params)

    a_ids = jax.random.randint(akey, (B, L), 1, V)
    b_ids = jax.random.randint(bkey, (B, L), 1, V)
    # a few id==0 positions so the (ids == 0) masks are non-trivial
    a_ids = a_ids.at[:, -2:].set(0)
    b_ids = b_ids.at[:, -3:].set(0)

    forward = jax.jit(partial(re2_forward, hidden=H, classes=C))
    out = forward(params["emb"], packed, a_ids, b_ids)
    out = jax.block_until_ready(out)

    ref = re2_reference(params, a_ids, b_ids)
    err = float(jnp.max(jnp.abs(out - ref)))
    scale = float(jnp.max(jnp.abs(ref))) + 1e-6
    assert bool(jnp.all(jnp.isfinite(out))), "non-finite output"
    assert err / scale < 2e-2, f"mismatch vs reference: err={err}, scale={scale}"
    print("KERNEL_OK")
</pallas_src>

<mosaic_0001>
module attributes {stable_mosaic.version = 11 : i64} {
  func.func @_re2_block_kernel(%arg0: i32, %arg1: memref<2x1x8x128xf32, #tpu.memory_space<vmem>>, %arg2: memref<2x1x8x1xf32, #tpu.memory_space<vmem>>, %arg3: memref<2x1x1x8xf32, #tpu.memory_space<vmem>>, %arg4: memref<2x384x128xbf16, #tpu.memory_space<vmem>>, %arg5: memref<2x1x128xf32, #tpu.memory_space<vmem>>, %arg6: memref<2x128x128xbf16, #tpu.memory_space<vmem>>, %arg7: memref<2x1x128xf32, #tpu.memory_space<vmem>>, %arg8: memref<512x128xbf16, #tpu.memory_space<vmem>>, %arg9: memref<1x128xf32, #tpu.memory_space<vmem>>, %arg10: memref<128x128xbf16, #tpu.memory_space<vmem>>, %arg11: memref<1x128xf32, #tpu.memory_space<vmem>>, %arg12: memref<2x1x8x128xf32, #tpu.memory_space<vmem>>) attributes {dimension_semantics = [#tpu.dimension_semantics<parallel>], iteration_bounds = array<i64: 2>, scalar_prefetch = 0 : i64, scratch_operands = 0 : i64, tpu.core_type = #tpu.core_type<tc>, window_params = [{transform_indices = @transform_0, window_bounds = array<i64: 2, 1, 8, 128>}, {transform_indices = @transform_1, window_bounds = array<i64: 2, 1, 8, 1>}, {transform_indices = @transform_2, window_bounds = array<i64: 2, 1, 1, 8>}, {pipeline_mode = #tpu.pipeline_mode<synchronous>, transform_indices = @transform_3, window_bounds = array<i64: 2, 384, 128>}, {pipeline_mode = #tpu.pipeline_mode<synchronous>, transform_indices = @transform_4, window_bounds = array<i64: 2, 1, 128>}, {pipeline_mode = #tpu.pipeline_mode<synchronous>, transform_indices = @transform_5, window_bounds = array<i64: 2, 128, 128>}, {pipeline_mode = #tpu.pipeline_mode<synchronous>, transform_indices = @transform_6, window_bounds = array<i64: 2, 1, 128>}, {pipeline_mode = #tpu.pipeline_mode<synchronous>, transform_indices = @transform_7, window_bounds = array<i64: 512, 128>}, {pipeline_mode = #tpu.pipeline_mode<synchronous>, transform_indices = @transform_8, window_bounds = array<i64: 1, 128>}, {pipeline_mode = #tpu.pipeline_mode<synchronous>, transform_indices = @transform_9, window_bounds = array<i64: 128, 128>}, {pipeline_mode = #tpu.pipeline_mode<synchronous>, transform_indices = @transform_10, window_bounds = array<i64: 1, 128>}, {transform_indices = @transform_11, window_bounds = array<i64: 2, 1, 8, 128>}]} {
    %c0 = arith.constant 0 : index
    %c0_0 = arith.constant 0 : index
    %c0_1 = arith.constant 0 : index
    %c0_2 = arith.constant 0 : index
    %0 = vector.load %arg1[%c0, %c0_0, %c0_1, %c0_2] : memref<2x1x8x128xf32, #tpu.memory_space<vmem>>, vector<2x1x8x128xf32>
    %1 = vector.shape_cast %0 : vector<2x1x8x128xf32> to vector<2x8x128xf32>
    %c0_3 = arith.constant 0 : index
    %c0_4 = arith.constant 0 : index
    %c0_5 = arith.constant 0 : index
    %c0_6 = arith.constant 0 : index
    %2 = vector.load %arg2[%c0_3, %c0_4, %c0_5, %c0_6] : memref<2x1x8x1xf32, #tpu.memory_space<vmem>>, vector<2x1x8x1xf32>
    %3 = vector.shape_cast %2 : vector<2x1x8x1xf32> to vector<2x8x1xf32>
    %c0_7 = arith.constant 0 : index
    %c0_8 = arith.constant 0 : index
    %c0_9 = arith.constant 0 : index
    %4 = vector.load %arg4[%c0_7, %c0_8, %c0_9] : memref<2x384x128xbf16, #tpu.memory_space<vmem>>, vector<2x384x128xbf16>
    %c0_10 = arith.constant 0 : index
    %c0_11 = arith.constant 0 : index
    %c0_12 = arith.constant 0 : index
    %5 = vector.load %arg5[%c0_10, %c0_11, %c0_12] : memref<2x1x128xf32, #tpu.memory_space<vmem>>, vector<2x1x128xf32>
    %6 = tpu.iota {dimensions = array<i32: 1>} : vector<1x8x128xi32>
    %c0_i32 = arith.constant 0 : i32
    %7 = vector.broadcast %c0_i32 : i32 to vector<1x8x128xi32>
    %8 = arith.cmpi ne, %6, %7 : vector<1x8x128xi32>
    %9 = arith.extui %8 : vector<1x8x128xi1> to vector<1x8x128xi32>
    %10 = arith.sitofp %9 : vector<1x8x128xi32> to vector<1x8x128xf32>
    %c7_i32 = arith.constant 7 : i32
    %11 = vector.broadcast %c7_i32 : i32 to vector<1x8x128xi32>
    %12 = arith.cmpi ne, %6, %11 : vector<1x8x128xi32>
    %13 = arith.extui %12 : vector<1x8x128xi1> to vector<1x8x128xi32>
    %14 = arith.sitofp %13 : vector<1x8x128xi32> to vector<1x8x128xf32>
    %15 = vector.broadcast %3 : vector<2x8x1xf32> to vector<2x8x128xf32>
    %16 = arith.mulf %15, %1 : vector<2x8x128xf32>
    %c1_i32 = arith.constant 1 : i32
    %17 = tpu.dynamic_rotate %16 by %c1_i32 dim 1 : vector<2x8x128xf32>, i32 -> vector<2x8x128xf32>
    %18 = vector.broadcast %10 : vector<1x8x128xf32> to vector<2x8x128xf32>
    %19 = arith.mulf %17, %18 : vector<2x8x128xf32>
    %c7_i32_13 = arith.constant 7 : i32
    %20 = tpu.dynamic_rotate %16 by %c7_i32_13 dim 1 : vector<2x8x128xf32>, i32 -> vector<2x8x128xf32>
    %21 = vector.broadcast %14 : vector<1x8x128xf32> to vector<2x8x128xf32>
    %22 = arith.mulf %20, %21 : vector<2x8x128xf32>
    %23 = tpu.concatenate %19, %16, %22 in 2 : vector<2x8x128xf32>, vector<2x8x128xf32>, vector<2x8x128xf32> -> vector<2x8x384xf32>
    %24 = vector.shape_cast %23 : vector<2x8x384xf32> to vector<16x384xf32>
    %25 = arith.truncf %24 : vector<16x384xf32> to vector<16x384xbf16>
    %26 = vector.extract_strided_slice %4 {offsets = [0, 0, 0], sizes = [1, 384, 128], strides = [1, 1, 1]} : vector<2x384x128xbf16> to vector<1x384x128xbf16>
    %27 = vector.shape_cast %26 : vector<1x384x128xbf16> to vector<384x128xbf16>
    %cst = arith.constant dense<0.000000e+00> : vector<16x128xf32>
    %28 = tpu.matmul %25, %27, %cst {dimension_numbers = #tpu.dot_dimension_numbers<[1], [0], [0], [1], [0, 0, 1, 1], [], []>} : vector<16x384xbf16>, vector<384x128xbf16>, vector<16x128xf32> -> vector<16x128xf32>
    %29 = vector.extract_strided_slice %5 {offsets = [0, 0, 0], sizes = [1, 1, 128], strides = [1, 1, 1]} : vector<2x1x128xf32> to vector<1x1x128xf32>
    %30 = vector.shape_cast %29 : vector<1x1x128xf32> to vector<1x128xf32>
    %31 = vector.broadcast %30 : vector<1x128xf32> to vector<16x128xf32>
    %32 = arith.addf %28, %31 : vector<16x128xf32>
    %cst_14 = arith.constant 0.000000e+00 : f32
    %33 = vector.broadcast %cst_14 : f32 to vector<16x128xf32>
    %34 = arith.maximumf %32, %33 : vector<16x128xf32>
    %35 = vector.shape_cast %34 : vector<16x128xf32> to vector<2x8x128xf32>
    %36 = vector.broadcast %3 : vector<2x8x1xf32> to vector<2x8x128xf32>
    %37 = arith.mulf %36, %35 : vector<2x8x128xf32>
    %c1_i32_15 = arith.constant 1 : i32
    %38 = tpu.dynamic_rotate %37 by %c1_i32_15 dim 1 : vector<2x8x128xf32>, i32 -> vector<2x8x128xf32>
    %39 = vector.broadcast %10 : vector<1x8x128xf32> to vector<2x8x128xf32>
    %40 = arith.mulf %38, %39 : vector<2x8x128xf32>
    %c7_i32_16 = arith.constant 7 : i32
    %41 = tpu.dynamic_rotate %37 by %c7_i32_16 dim 1 : vector<2x8x128xf32>, i32 -> vector<2x8x128xf32>
    %42 = vector.broadcast %14 : vector<1x8x128xf32> to vector<2x8x128xf32>
    %43 = arith.mulf %41, %42 : vector<2x8x128xf32>
    %44 = tpu.concatenate %40, %37, %43 in 2 : vector<2x8x128xf32>, vector<2x8x128xf32>, vector<2x8x128xf32> -> vector<2x8x384xf32>
    %45 = vector.shape_cast %44 : vector<2x8x384xf32> to vector<16x384xf32>
    %46 = arith.truncf %45 : vector<16x384xf32> to vector<16x384xbf16>
    %47 = vector.extract_strided_slice %4 {offsets = [1, 0, 0], sizes = [1, 384, 128], strides = [1, 1, 1]} : vector<2x384x128xbf16> to vector<1x384x128xbf16>
    %48 = vector.shape_cast %47 : vector<1x384x128xbf16> to vector<384x128xbf16>
    %cst_17 = arith.constant dense<0.000000e+00> : vector<16x128xf32>
    %49 = tpu.matmul %46, %48, %cst_17 {dimension_numbers = #tpu.dot_dimension_numbers<[1], [0], [0], [1], [0, 0, 1, 1], [], []>} : vector<16x384xbf16>, vector<384x128xbf16>, vector<16x128xf32> -> vector<16x128xf32>
    %50 = vector.extract_strided_slice %5 {offsets = [1, 0, 0], sizes = [1, 1, 128], strides = [1, 1, 1]} : vector<2x1x128xf32> to vector<1x1x128xf32>
    %51 = vector.shape_cast %50 : vector<1x1x128xf32> to vector<1x128xf32>
    %52 = vector.broadcast %51 : vector<1x128xf32> to vector<16x128xf32>
    %53 = arith.addf %49, %52 : vector<16x128xf32>
    %cst_18 = arith.constant 0.000000e+00 : f32
    %54 = vector.broadcast %cst_18 : f32 to vector<16x128xf32>
    %55 = arith.maximumf %53, %54 : vector<16x128xf32>
    %56 = vector.shape_cast %55 : vector<16x128xf32> to vector<2x8x128xf32>
    %57 = arith.addf %1, %56 : vector<2x8x128xf32>
    %c0_19 = arith.constant 0 : index
    %c0_20 = arith.constant 0 : index
    %c0_21 = arith.constant 0 : index
    %58 = vector.load %arg6[%c0_19, %c0_20, %c0_21] : memref<2x128x128xbf16, #tpu.memory_space<vmem>>, vector<2x128x128xbf16>
    %c0_22 = arith.constant 0 : index
    %c0_23 = arith.constant 0 : index
    %c0_24 = arith.constant 0 : index
    %59 = vector.load %arg7[%c0_22, %c0_23, %c0_24] : memref<2x1x128xf32, #tpu.memory_space<vmem>>, vector<2x1x128xf32>
    %60 = vector.extract_strided_slice %57 {offsets = [0, 0, 0], sizes = [1, 8, 128], strides = [1, 1, 1]} : vector<2x8x128xf32> to vector<1x8x128xf32>
    %61 = vector.extract_strided_slice %57 {offsets = [1, 0, 0], sizes = [1, 8, 128], strides = [1, 1, 1]} : vector<2x8x128xf32> to vector<1x8x128xf32>
    %62 = arith.truncf %60 : vector<1x8x128xf32> to vector<1x8x128xbf16>
    %63 = arith.truncf %61 : vector<1x8x128xf32> to vector<1x8x128xbf16>
    %64 = vector.shape_cast %62 : vector<1x8x128xbf16> to vector<8x128xbf16>
    %65 = vector.extract_strided_slice %58 {offsets = [0, 0, 0], sizes = [1, 128, 128], strides = [1, 1, 1]} : vector<2x128x128xbf16> to vector<1x128x128xbf16>
    %66 = vector.shape_cast %65 : vector<1x128x128xbf16> to vector<128x128xbf16>
    %cst_25 = arith.constant dense<0.000000e+00> : vector<8x128xf32>
    %67 = tpu.matmul %64, %66, %cst_25 {dimension_numbers = #tpu.dot_dimension_numbers<[1], [0], [0], [1], [0, 0, 1, 1], [], []>} : vector<8x128xbf16>, vector<128x128xbf16>, vector<8x128xf32> -> vector<8x128xf32>
    %68 = vector.extract_strided_slice %59 {offsets = [0, 0, 0], sizes = [1, 1, 128], strides = [1, 1, 1]} : vector<2x1x128xf32> to vector<1x1x128xf32>
    %69 = vector.shape_cast %68 : vector<1x1x128xf32> to vector<1x128xf32>
    %70 = vector.broadcast %69 : vector<1x128xf32> to vector<8x128xf32>
    %71 = arith.addf %67, %70 : vector<8x128xf32>
    %cst_26 = arith.constant 0.000000e+00 : f32
    %72 = vector.broadcast %cst_26 : f32 to vector<8x128xf32>
    %73 = arith.maximumf %71, %72 : vector<8x128xf32>
    %74 = vector.shape_cast %63 : vector<1x8x128xbf16> to vector<8x128xbf16>
    %75 = vector.extract_strided_slice %58 {offsets = [1, 0, 0], sizes = [1, 128, 128], strides = [1, 1, 1]} : vector<2x128x128xbf16> to vector<1x128x128xbf16>
    %76 = vector.shape_cast %75 : vector<1x128x128xbf16> to vector<128x128xbf16>
    %cst_27 = arith.constant dense<0.000000e+00> : vector<8x128xf32>
    %77 = tpu.matmul %74, %76, %cst_27 {dimension_numbers = #tpu.dot_dimension_numbers<[1], [0], [0], [1], [0, 0, 1, 1], [], []>} : vector<8x128xbf16>, vector<128x128xbf16>, vector<8x128xf32> -> vector<8x128xf32>
    %78 = vector.extract_strided_slice %59 {offsets = [1, 0, 0], sizes = [1, 1, 128], strides = [1, 1, 1]} : vector<2x1x128xf32> to vector<1x1x128xf32>
    %79 = vector.shape_cast %78 : vector<1x1x128xf32> to vector<1x128xf32>
    %80 = vector.broadcast %79 : vector<1x128xf32> to vector<8x128xf32>
    %81 = arith.addf %77, %80 : vector<8x128xf32>
    %cst_28 = arith.constant 0.000000e+00 : f32
    %82 = vector.broadcast %cst_28 : f32 to vector<8x128xf32>
    %83 = arith.maximumf %81, %82 : vector<8x128xf32>
    %84 = vector.shape_cast %73 : vector<8x128xf32> to vector<1x8x128xf32>
    %85 = arith.truncf %84 : vector<1x8x128xf32> to vector<1x8x128xbf16>
    %86 = vector.shape_cast %83 : vector<8x128xf32> to vector<1x8x128xf32>
    %87 = arith.truncf %86 : vector<1x8x128xf32> to vector<1x8x128xbf16>
    %c0_29 = arith.constant 0 : index
    %c0_30 = arith.constant 0 : index
    %c0_31 = arith.constant 0 : index
    %c0_32 = arith.constant 0 : index
    %88 = vector.load %arg3[%c0_29, %c0_30, %c0_31, %c0_32] : memref<2x1x1x8xf32, #tpu.memory_space<vmem>>, vector<2x1x1x8xf32>
    %89 = vector.extract_strided_slice %2 {offsets = [0, 0, 0, 0], sizes = [1, 1, 8, 1], strides = [1, 1, 1, 1]} : vector<2x1x8x1xf32> to vector<1x1x8x1xf32>
    %90 = vector.shape_cast %89 : vector<1x1x8x1xf32> to vector<1x8x1xf32>
    %91 = vector.extract_strided_slice %88 {offsets = [1, 0, 0, 0], sizes = [1, 1, 1, 8], strides = [1, 1, 1, 1]} : vector<2x1x1x8xf32> to vector<1x1x1x8xf32>
    %92 = vector.shape_cast %91 : vector<1x1x1x8xf32> to vector<1x1x8xf32>
    %93 = vector.broadcast %90 : vector<1x8x1xf32> to vector<1x8x8xf32>
    %94 = vector.broadcast %92 : vector<1x1x8xf32> to vector<1x8x8xf32>
    %95 = arith.mulf %93, %94 : vector<1x8x8xf32>
    %96 = vector.extract_strided_slice %2 {offsets = [1, 0, 0, 0], sizes = [1, 1, 8, 1], strides = [1, 1, 1, 1]} : vector<2x1x8x1xf32> to vector<1x1x8x1xf32>
    %97 = vector.shape_cast %96 : vector<1x1x8x1xf32> to vector<1x8x1xf32>
    %98 = vector.extract_strided_slice %88 {offsets = [0, 0, 0, 0], sizes = [1, 1, 1, 8], strides = [1, 1, 1, 1]} : vector<2x1x1x8xf32> to vector<1x1x1x8xf32>
    %99 = vector.shape_cast %98 : vector<1x1x1x8xf32> to vector<1x1x8xf32>
    %100 = vector.broadcast %97 : vector<1x8x1xf32> to vector<1x8x8xf32>
    %101 = vector.broadcast %99 : vector<1x1x8xf32> to vector<1x8x8xf32>
    %102 = arith.mulf %100, %101 : vector<1x8x8xf32>
    "tpu.trace_start"() <{level = 10 : i32, message = "bid,bjd->bij"}> : () -> ()
    %cst_33 = arith.constant dense<0.000000e+00> : vector<1x8x8xf32>
    %103 = tpu.matmul %85, %87, %cst_33 {dimension_numbers = #tpu.dot_dimension_numbers<[2], [2], [1], [1], [0, 0, 0, 1, 1, 1], [0], [0]>} : vector<1x8x128xbf16>, vector<1x8x128xbf16>, vector<1x8x8xf32> -> vector<1x8x8xf32>
    "tpu.trace_stop"() : () -> ()
    "tpu.trace_start"() <{level = 10 : i32, message = "bjd,bid->bji"}> : () -> ()
    %cst_34 = arith.constant dense<0.000000e+00> : vector<1x8x8xf32>
    %104 = tpu.matmul %87, %85, %cst_34 {dimension_numbers = #tpu.dot_dimension_numbers<[2], [2], [1], [1], [0, 0, 0, 1, 1, 1], [0], [0]>} : vector<1x8x128xbf16>, vector<1x8x128xbf16>, vector<1x8x8xf32> -> vector<1x8x8xf32>
    "tpu.trace_stop"() : () -> ()
    %105 = arith.mulf %95, %103 : vector<1x8x8xf32>
    %cst_35 = arith.constant 1.000000e+00 : f32
    %106 = vector.broadcast %cst_35 : f32 to vector<1x8x8xf32>
    %107 = arith.subf %106, %95 : vector<1x8x8xf32>
    %cst_36 = arith.constant -1.000000e+09 : f32
    %108 = vector.broadcast %cst_36 : f32 to vector<1x8x8xf32>
    %109 = arith.mulf %107, %108 : vector<1x8x8xf32>
    %110 = arith.addf %105, %109 : vector<1x8x8xf32>
    %111 = arith.mulf %102, %104 : vector<1x8x8xf32>
    %cst_37 = arith.constant 1.000000e+00 : f32
    %112 = vector.broadcast %cst_37 : f32 to vector<1x8x8xf32>
    %113 = arith.subf %112, %102 : vector<1x8x8xf32>
    %cst_38 = arith.constant -1.000000e+09 : f32
    %114 = vector.broadcast %cst_38 : f32 to vector<1x8x8xf32>
    %115 = arith.mulf %113, %114 : vector<1x8x8xf32>
    %116 = arith.addf %111, %115 : vector<1x8x8xf32>
    %cst_39 = arith.constant dense<0xFF800000> : vector<1x8xf32>
    %117 = vector.multi_reduction <maximumf>, %110, %cst_39 [2] : vector<1x8x8xf32> to vector<1x8xf32>
    %118 = vector.shape_cast %117 : vector<1x8xf32> to vector<1x8x1xf32>
    %119 = vector.broadcast %118 : vector<1x8x1xf32> to vector<1x8x8xf32>
    %120 = arith.subf %110, %119 : vector<1x8x8xf32>
    %121 = math.exp %120 : vector<1x8x8xf32>
    %cst_40 = arith.constant dense<0.000000e+00> : vector<1x8xf32>
    %122 = vector.multi_reduction <add>, %121, %cst_40 [2] : vector<1x8x8xf32> to vector<1x8xf32>
    %123 = vector.shape_cast %122 : vector<1x8xf32> to vector<1x8x1xf32>
    %124 = tpu.reciprocal %123 {approx = true} : vector<1x8x1xf32> -> vector<1x8x1xf32>
    %125 = vector.broadcast %124 : vector<1x8x1xf32> to vector<1x8x8xf32>
    %126 = arith.mulf %121, %125 : vector<1x8x8xf32>
    %cst_41 = arith.constant dense<0xFF800000> : vector<1x8xf32>
    %127 = vector.multi_reduction <maximumf>, %116, %cst_41 [2] : vector<1x8x8xf32> to vector<1x8xf32>
    %128 = vector.shape_cast %127 : vector<1x8xf32> to vector<1x8x1xf32>
    %129 = vector.broadcast %128 : vector<1x8x1xf32> to vector<1x8x8xf32>
    %130 = arith.subf %116, %129 : vector<1x8x8xf32>
    %131 = math.exp %130 : vector<1x8x8xf32>
    %cst_42 = arith.constant dense<0.000000e+00> : vector<1x8xf32>
    %132 = vector.multi_reduction <add>, %131, %cst_42 [2] : vector<1x8x8xf32> to vector<1x8xf32>
    %133 = vector.shape_cast %132 : vector<1x8xf32> to vector<1x8x1xf32>
    %134 = tpu.reciprocal %133 {approx = true} : vector<1x8x1xf32> -> vector<1x8x1xf32>
    %135 = vector.broadcast %134 : vector<1x8x1xf32> to vector<1x8x8xf32>
    %136 = arith.mulf %131, %135 : vector<1x8x8xf32>
    %137 = arith.truncf %136 : vector<1x8x8xf32> to vector<1x8x8xbf16>
    "tpu.trace_start"() <{level = 10 : i32, message = "bji,bid->bjd"}> : () -> ()
    %cst_43 = arith.constant dense<0.000000e+00> : vector<1x8x128xf32>
    %138 = tpu.matmul %137, %62, %cst_43 {dimension_numbers = #tpu.dot_dimension_numbers<[2], [1], [1], [2], [0, 0, 0, 1, 1, 2], [0], [0]>} : vector<1x8x8xbf16>, vector<1x8x128xbf16>, vector<1x8x128xf32> -> vector<1x8x128xf32>
    "tpu.trace_stop"() : () -> ()
    %139 = arith.truncf %126 : vector<1x8x8xf32> to vector<1x8x8xbf16>
    "tpu.trace_start"() <{level = 10 : i32, message = "bij,bjd->bid"}> : () -> ()
    %cst_44 = arith.constant dense<0.000000e+00> : vector<1x8x128xf32>
    %140 = tpu.matmul %139, %63, %cst_44 {dimension_numbers = #tpu.dot_dimension_numbers<[2], [1], [1], [2], [0, 0, 0, 1, 1, 2], [0], [0]>} : vector<1x8x8xbf16>, vector<1x8x128xbf16>, vector<1x8x128xf32> -> vector<1x8x128xf32>
    "tpu.trace_stop"() : () -> ()
    %141 = tpu.concatenate %138, %140 in 0 : vector<1x8x128xf32>, vector<1x8x128xf32> -> vector<2x8x128xf32>
    %142 = vector.shape_cast %57 : vector<2x8x128xf32> to vector<16x128xf32>
    %143 = vector.shape_cast %141 : vector<2x8x128xf32> to vector<16x128xf32>
    %144 = arith.subf %142, %143 : vector<16x128xf32>
    %145 = arith.mulf %142, %143 : vector<16x128xf32>
    %146 = tpu.concatenate %142, %143, %144, %145 in 1 : vector<16x128xf32>, vector<16x128xf32>, vector<16x128xf32>, vector<16x128xf32> -> vector<16x512xf32>
    %147 = arith.truncf %146 : vector<16x512xf32> to vector<16x512xbf16>
    %c0_45 = arith.constant 0 : index
    %c0_46 = arith.constant 0 : index
    %148 = vector.load %arg8[%c0_45, %c0_46] : memref<512x128xbf16, #tpu.memory_space<vmem>>, vector<512x128xbf16>
    %cst_47 = arith.constant dense<0.000000e+00> : vector<16x128xf32>
    %149 = tpu.matmul %147, %148, %cst_47 {dimension_numbers = #tpu.dot_dimension_numbers<[1], [0], [0], [1], [0, 0, 1, 1], [], []>} : vector<16x512xbf16>, vector<512x128xbf16>, vector<16x128xf32> -> vector<16x128xf32>
    %c0_48 = arith.constant 0 : index
    %c0_49 = arith.constant 0 : index
    %150 = vector.load %arg9[%c0_48, %c0_49] : memref<1x128xf32, #tpu.memory_space<vmem>>, vector<1x128xf32>
    %151 = vector.broadcast %150 : vector<1x128xf32> to vector<16x128xf32>
    %152 = arith.addf %149, %151 : vector<16x128xf32>
    %cst_50 = arith.constant 0.000000e+00 : f32
    %153 = vector.broadcast %cst_50 : f32 to vector<16x128xf32>
    %154 = arith.maximumf %152, %153 : vector<16x128xf32>
    %155 = arith.truncf %154 : vector<16x128xf32> to vector<16x128xbf16>
    %c0_51 = arith.constant 0 : index
    %c0_52 = arith.constant 0 : index
    %156 = vector.load %arg10[%c0_51, %c0_52] : memref<128x128xbf16, #tpu.memory_space<vmem>>, vector<128x128xbf16>
    %cst_53 = arith.constant dense<0.000000e+00> : vector<16x128xf32>
    %157 = tpu.matmul %155, %156, %cst_53 {dimension_numbers = #tpu.dot_dimension_numbers<[1], [0], [0], [1], [0, 0, 1, 1], [], []>} : vector<16x128xbf16>, vector<128x128xbf16>, vector<16x128xf32> -> vector<16x128xf32>
    %c0_54 = arith.constant 0 : index
    %c0_55 = arith.constant 0 : index
    %158 = vector.load %arg11[%c0_54, %c0_55] : memref<1x128xf32, #tpu.memory_space<vmem>>, vector<1x128xf32>
    %159 = vector.broadcast %158 : vector<1x128xf32> to vector<16x128xf32>
    %160 = arith.addf %157, %159 : vector<16x128xf32>
    %cst_56 = arith.constant 0.000000e+00 : f32
    %161 = vector.broadcast %cst_56 : f32 to vector<16x128xf32>
    %162 = arith.maximumf %160, %161 : vector<16x128xf32>
    %163 = vector.shape_cast %162 : vector<16x128xf32> to vector<2x1x8x128xf32>
    %c0_57 = arith.constant 0 : index
    %c0_58 = arith.constant 0 : index
    %c0_59 = arith.constant 0 : index
    %c0_60 = arith.constant 0 : index
    %164 = vector.load %arg12[%c0_57, %c0_58, %c0_59, %c0_60] : memref<2x1x8x128xf32, #tpu.memory_space<vmem>>, vector<2x1x8x128xf32>
    tpu.vector_store %arg12[%c0_57, %c0_58, %c0_59, %c0_60], %163 {strides = array<i32>} : memref<2x1x8x128xf32, #tpu.memory_space<vmem>>, vector<2x1x8x128xf32>,
    return
  }
  func.func @transform_0(%arg0: i32) -> (i32, i32, i32, i32) {
    %c0_i32 = arith.constant 0 : i32
    %c0_i32_0 = arith.constant 0 : i32
    %c0_i32_1 = arith.constant 0 : i32
    %c0_i32_2 = arith.constant 0 : i32
    return %c0_i32, %arg0, %c0_i32_0, %c0_i32_1 : i32, i32, i32, i32
  }
  func.func @transform_1(%arg0: i32) -> (i32, i32, i32, i32) {
    %c0_i32 = arith.constant 0 : i32
    %c0_i32_0 = arith.constant 0 : i32
    %c0_i32_1 = arith.constant 0 : i32
    %c0_i32_2 = arith.constant 0 : i32
    return %c0_i32, %arg0, %c0_i32_0, %c0_i32_1 : i32, i32, i32, i32
  }
  func.func @transform_2(%arg0: i32) -> (i32, i32, i32, i32) {
    %c0_i32 = arith.constant 0 : i32
    %c0_i32_0 = arith.constant 0 : i32
    %c0_i32_1 = arith.constant 0 : i32
    %c0_i32_2 = arith.constant 0 : i32
    return %c0_i32, %arg0, %c0_i32_0, %c0_i32_1 : i32, i32, i32, i32
  }
  func.func @transform_3(%arg0: i32) -> (i32, i32, i32) {
    %c0_i32 = arith.constant 0 : i32
    %c0_i32_0 = arith.constant 0 : i32
    %c0_i32_1 = arith.constant 0 : i32
    %c0_i32_2 = arith.constant 0 : i32
    return %c0_i32, %c0_i32_0, %c0_i32_1 : i32, i32, i32
  }
  func.func @transform_4(%arg0: i32) -> (i32, i32, i32) {
    %c0_i32 = arith.constant 0 : i32
    %c0_i32_0 = arith.constant 0 : i32
    %c0_i32_1 = arith.constant 0 : i32
    %c0_i32_2 = arith.constant 0 : i32
    return %c0_i32, %c0_i32_0, %c0_i32_1 : i32, i32, i32
  }
  func.func @transform_5(%arg0: i32) -> (i32, i32, i32) {
    %c0_i32 = arith.constant 0 : i32
    %c0_i32_0 = arith.constant 0 : i32
    %c0_i32_1 = arith.constant 0 : i32
    %c0_i32_2 = arith.constant 0 : i32
    return %c0_i32, %c0_i32_0, %c0_i32_1 : i32, i32, i32
  }
  func.func @transform_6(%arg0: i32) -> (i32, i32, i32) {
    %c0_i32 = arith.constant 0 : i32
    %c0_i32_0 = arith.constant 0 : i32
    %c0_i32_1 = arith.constant 0 : i32
    %c0_i32_2 = arith.constant 0 : i32
    return %c0_i32, %c0_i32_0, %c0_i32_1 : i32, i32, i32
  }
  func.func @transform_7(%arg0: i32) -> (i32, i32) {
    %c0_i32 = arith.constant 0 : i32
    %c0_i32_0 = arith.constant 0 : i32
    %c0_i32_1 = arith.constant 0 : i32
    return %c0_i32, %c0_i32_0 : i32, i32
  }
  func.func @transform_8(%arg0: i32) -> (i32, i32) {
    %c0_i32 = arith.constant 0 : i32
    %c0_i32_0 = arith.constant 0 : i32
    %c0_i32_1 = arith.constant 0 : i32
    return %c0_i32, %c0_i32_0 : i32, i32
  }
  func.func @transform_9(%arg0: i32) -> (i32, i32) {
    %c0_i32 = arith.constant 0 : i32
    %c0_i32_0 = arith.constant 0 : i32
    %c0_i32_1 = arith.constant 0 : i32
    return %c0_i32, %c0_i32_0 : i32, i32
  }
  func.func @transform_10(%arg0: i32) -> (i32, i32) {
    %c0_i32 = arith.constant 0 : i32
    %c0_i32_0 = arith.constant 0 : i32
    %c0_i32_1 = arith.constant 0 : i32
    return %c0_i32, %c0_i32_0 : i32, i32
  }
  func.func @transform_11(%arg0: i32) -> (i32, i32, i32, i32) {
    %c0_i32 = arith.constant 0 : i32
    %c0_i32_0 = arith.constant 0 : i32
    %c0_i32_1 = arith.constant 0 : i32
    %c0_i32_2 = arith.constant 0 : i32
    return %c0_i32, %arg0, %c0_i32_0, %c0_i32_1 : i32, i32, i32, i32
  }
}

module attributes {stable_mosaic.version = 11 : i64} {
  func.func @_prediction_kernel(%arg0: i32, %arg1: memref<2x1x8x128xf32, #tpu.memory_space<vmem>>, %arg2: memref<2x1x8x1xf32, #tpu.memory_space<vmem>>, %arg3: memref<512x128xf32, #tpu.memory_space<vmem>>, %arg4: memref<1x128xf32, #tpu.memory_space<vmem>>, %arg5: memref<128x128xf32, #tpu.memory_space<vmem>>, %arg6: memref<1x128xf32, #tpu.memory_space<vmem>>, %arg7: memref<1x1x128xf32, #tpu.memory_space<vmem>>) attributes {dimension_semantics = [#tpu.dimension_semantics<parallel>], iteration_bounds = array<i64: 2>, scalar_prefetch = 0 : i64, scratch_operands = 0 : i64, tpu.core_type = #tpu.core_type<tc>, window_params = [{transform_indices = @transform_0, window_bounds = array<i64: 2, 1, 8, 128>}, {transform_indices = @transform_1, window_bounds = array<i64: 2, 1, 8, 1>}, {pipeline_mode = #tpu.pipeline_mode<synchronous>, transform_indices = @transform_2, window_bounds = array<i64: 512, 128>}, {pipeline_mode = #tpu.pipeline_mode<synchronous>, transform_indices = @transform_3, window_bounds = array<i64: 1, 128>}, {pipeline_mode = #tpu.pipeline_mode<synchronous>, transform_indices = @transform_4, window_bounds = array<i64: 128, 128>}, {pipeline_mode = #tpu.pipeline_mode<synchronous>, transform_indices = @transform_5, window_bounds = array<i64: 1, 128>}, {transform_indices = @transform_6, window_bounds = array<i64: 1, 1, 128>}]} {
    %c0 = arith.constant 0 : index
    %c0_0 = arith.constant 0 : index
    %c0_1 = arith.constant 0 : index
    %c0_2 = arith.constant 0 : index
    %0 = vector.load %arg1[%c0, %c0_0, %c0_1, %c0_2] : memref<2x1x8x128xf32, #tpu.memory_space<vmem>>, vector<2x1x8x128xf32>
    %c0_3 = arith.constant 0 : index
    %c0_4 = arith.constant 0 : index
    %c0_5 = arith.constant 0 : index
    %c0_6 = arith.constant 0 : index
    %1 = vector.load %arg2[%c0_3, %c0_4, %c0_5, %c0_6] : memref<2x1x8x1xf32, #tpu.memory_space<vmem>>, vector<2x1x8x1xf32>
    %2 = vector.broadcast %1 : vector<2x1x8x1xf32> to vector<2x1x8x128xf32>
    %3 = arith.mulf %2, %0 : vector<2x1x8x128xf32>
    %cst = arith.constant 1.000000e+00 : f32
    %4 = vector.broadcast %cst : f32 to vector<2x1x8x1xf32>
    %5 = arith.subf %4, %1 : vector<2x1x8x1xf32>
    %cst_7 = arith.constant -1.000000e+09 : f32
    %6 = vector.broadcast %cst_7 : f32 to vector<2x1x8x1xf32>
    %7 = arith.mulf %5, %6 : vector<2x1x8x1xf32>
    %8 = vector.broadcast %7 : vector<2x1x8x1xf32> to vector<2x1x8x128xf32>
    %9 = arith.addf %3, %8 : vector<2x1x8x128xf32>
    %cst_8 = arith.constant dense<0.000000e+00> : vector<2x1x128xf32>
    %10 = vector.multi_reduction <add>, %9, %cst_8 [2] : vector<2x1x8x128xf32> to vector<2x1x128xf32>
    %11 = vector.extract_strided_slice %10 {offsets = [0, 0, 0], sizes = [1, 1, 128], strides = [1, 1, 1]} : vector<2x1x128xf32> to vector<1x1x128xf32>
    %12 = vector.shape_cast %11 : vector<1x1x128xf32> to vector<1x128xf32>
    %13 = vector.extract_strided_slice %10 {offsets = [1, 0, 0], sizes = [1, 1, 128], strides = [1, 1, 1]} : vector<2x1x128xf32> to vector<1x1x128xf32>
    %14 = vector.shape_cast %13 : vector<1x1x128xf32> to vector<1x128xf32>
    %15 = arith.mulf %12, %14 : vector<1x128xf32>
    %16 = arith.subf %12, %14 : vector<1x128xf32>
    %17 = tpu.concatenate %12, %14, %15, %16 in 1 : vector<1x128xf32>, vector<1x128xf32>, vector<1x128xf32>, vector<1x128xf32> -> vector<1x512xf32>
    %c0_9 = arith.constant 0 : index
    %c0_10 = arith.constant 0 : index
    %18 = vector.load %arg3[%c0_9, %c0_10] : memref<512x128xf32, #tpu.memory_space<vmem>>, vector<512x128xf32>
    %cst_11 = arith.constant dense<0.000000e+00> : vector<1x128xf32>
    %19 = tpu.matmul %17, %18, %cst_11 {dimension_numbers = #tpu.dot_dimension_numbers<[1], [0], [0], [1], [0, 0, 1, 1], [], []>} : vector<1x512xf32>, vector<512x128xf32>, vector<1x128xf32> -> vector<1x128xf32>
    %c0_12 = arith.constant 0 : index
    %c0_13 = arith.constant 0 : index
    %20 = vector.load %arg4[%c0_12, %c0_13] : memref<1x128xf32, #tpu.memory_space<vmem>>, vector<1x128xf32>
    %21 = arith.addf %19, %20 : vector<1x128xf32>
    %cst_14 = arith.constant 0.000000e+00 : f32
    %22 = vector.broadcast %cst_14 : f32 to vector<1x128xf32>
    %23 = arith.maximumf %21, %22 : vector<1x128xf32>
    %c0_15 = arith.constant 0 : index
    %c0_16 = arith.constant 0 : index
    %24 = vector.load %arg5[%c0_15, %c0_16] : memref<128x128xf32, #tpu.memory_space<vmem>>, vector<128x128xf32>
    %cst_17 = arith.constant dense<0.000000e+00> : vector<1x128xf32>
    %25 = tpu.matmul %23, %24, %cst_17 {dimension_numbers = #tpu.dot_dimension_numbers<[1], [0], [0], [1], [0, 0, 1, 1], [], []>} : vector<1x128xf32>, vector<128x128xf32>, vector<1x128xf32> -> vector<1x128xf32>
    %c0_18 = arith.constant 0 : index
    %c0_19 = arith.constant 0 : index
    %26 = vector.load %arg6[%c0_18, %c0_19] : memref<1x128xf32, #tpu.memory_space<vmem>>, vector<1x128xf32>
    %27 = arith.addf %25, %26 : vector<1x128xf32>
    %c0_20 = arith.constant 0 : index
    %c0_21 = arith.constant 0 : index
    %c0_22 = arith.constant 0 : index
    %28 = vector.load %arg7[%c0_20, %c0_21, %c0_22] : memref<1x1x128xf32, #tpu.memory_space<vmem>>, vector<1x1x128xf32>
    %29 = vector.shape_cast %28 : vector<1x1x128xf32> to vector<1x128xf32>
    %30 = vector.shape_cast %27 : vector<1x128xf32> to vector<1x1x128xf32>
    tpu.vector_store %arg7[%c0_20, %c0_21, %c0_22], %30 {strides = array<i32>} : memref<1x1x128xf32, #tpu.memory_space<vmem>>, vector<1x1x128xf32>,
    return
  }
  func.func @transform_0(%arg0: i32) -> (i32, i32, i32, i32) {
    %c0_i32 = arith.constant 0 : i32
    %c0_i32_0 = arith.constant 0 : i32
    %c0_i32_1 = arith.constant 0 : i32
    %c0_i32_2 = arith.constant 0 : i32
    return %c0_i32, %arg0, %c0_i32_0, %c0_i32_1 : i32, i32, i32, i32
  }
  func.func @transform_1(%arg0: i32) -> (i32, i32, i32, i32) {
    %c0_i32 = arith.constant 0 : i32
    %c0_i32_0 = arith.constant 0 : i32
    %c0_i32_1 = arith.constant 0 : i32
    %c0_i32_2 = arith.constant 0 : i32
    return %c0_i32, %arg0, %c0_i32_0, %c0_i32_1 : i32, i32, i32, i32
  }
  func.func @transform_2(%arg0: i32) -> (i32, i32) {
    %c0_i32 = arith.constant 0 : i32
    %c0_i32_0 = arith.constant 0 : i32
    %c0_i32_1 = arith.constant 0 : i32
    return %c0_i32, %c0_i32_0 : i32, i32
  }
  func.func @transform_3(%arg0: i32) -> (i32, i32) {
    %c0_i32 = arith.constant 0 : i32
    %c0_i32_0 = arith.constant 0 : i32
    %c0_i32_1 = arith.constant 0 : i32
    return %c0_i32, %c0_i32_0 : i32, i32
  }
  func.func @transform_4(%arg0: i32) -> (i32, i32) {
    %c0_i32 = arith.constant 0 : i32
    %c0_i32_0 = arith.constant 0 : i32
    %c0_i32_1 = arith.constant 0 : i32
    return %c0_i32, %c0_i32_0 : i32, i32
  }
  func.func @transform_5(%arg0: i32) -> (i32, i32) {
    %c0_i32 = arith.constant 0 : i32
    %c0_i32_0 = arith.constant 0 : i32
    %c0_i32_1 = arith.constant 0 : i32
    return %c0_i32, %c0_i32_0 : i32, i32
  }
  func.func @transform_6(%arg0: i32) -> (i32, i32, i32) {
    %c0_i32 = arith.constant 0 : i32
    %c0_i32_0 = arith.constant 0 : i32
    %c0_i32_1 = arith.constant 0 : i32
    return %arg0, %c0_i32, %c0_i32_0 : i32, i32, i32
  }
}

module attributes {stable_mosaic.version = 11 : i64} {
  func.func @_re2_block_kernel(%arg0: i32, %arg1: memref<2x1x8x128xf32, #tpu.memory_space<vmem>>, %arg2: memref<2x1x8x1xf32, #tpu.memory_space<vmem>>, %arg3: memref<2x1x1x8xf32, #tpu.memory_space<vmem>>, %arg4: memref<2x384x128xbf16, #tpu.memory_space<vmem>>, %arg5: memref<2x1x128xf32, #tpu.memory_space<vmem>>, %arg6: memref<2x128x128xbf16, #tpu.memory_space<vmem>>, %arg7: memref<2x1x128xf32, #tpu.memory_space<vmem>>, %arg8: memref<512x128xbf16, #tpu.memory_space<vmem>>, %arg9: memref<1x128xf32, #tpu.memory_space<vmem>>, %arg10: memref<128x128xbf16, #tpu.memory_space<vmem>>, %arg11: memref<1x128xf32, #tpu.memory_space<vmem>>, %arg12: memref<2x1x8x128xf32, #tpu.memory_space<vmem>>) attributes {dimension_semantics = [#tpu.dimension_semantics<parallel>], iteration_bounds = array<i64: 2>, scalar_prefetch = 0 : i64, scratch_operands = 0 : i64, tpu.core_type = #tpu.core_type<tc>, window_params = [{transform_indices = @transform_0, window_bounds = array<i64: 2, 1, 8, 128>}, {transform_indices = @transform_1, window_bounds = array<i64: 2, 1, 8, 1>}, {transform_indices = @transform_2, window_bounds = array<i64: 2, 1, 1, 8>}, {pipeline_mode = #tpu.pipeline_mode<synchronous>, transform_indices = @transform_3, window_bounds = array<i64: 2, 384, 128>}, {pipeline_mode = #tpu.pipeline_mode<synchronous>, transform_indices = @transform_4, window_bounds = array<i64: 2, 1, 128>}, {pipeline_mode = #tpu.pipeline_mode<synchronous>, transform_indices = @transform_5, window_bounds = array<i64: 2, 128, 128>}, {pipeline_mode = #tpu.pipeline_mode<synchronous>, transform_indices = @transform_6, window_bounds = array<i64: 2, 1, 128>}, {pipeline_mode = #tpu.pipeline_mode<synchronous>, transform_indices = @transform_7, window_bounds = array<i64: 512, 128>}, {pipeline_mode = #tpu.pipeline_mode<synchronous>, transform_indices = @transform_8, window_bounds = array<i64: 1, 128>}, {pipeline_mode = #tpu.pipeline_mode<synchronous>, transform_indices = @transform_9, window_bounds = array<i64: 128, 128>}, {pipeline_mode = #tpu.pipeline_mode<synchronous>, transform_indices = @transform_10, window_bounds = array<i64: 1, 128>}, {transform_indices = @transform_11, window_bounds = array<i64: 2, 1, 8, 128>}]} {
    %c0 = arith.constant 0 : index
    %c0_0 = arith.constant 0 : index
    %c0_1 = arith.constant 0 : index
    %c0_2 = arith.constant 0 : index
    %0 = vector.load %arg1[%c0, %c0_0, %c0_1, %c0_2] : memref<2x1x8x128xf32, #tpu.memory_space<vmem>>, vector<2x1x8x128xf32>
    %1 = vector.shape_cast %0 : vector<2x1x8x128xf32> to vector<2x8x128xf32>
    %c0_3 = arith.constant 0 : index
    %c0_4 = arith.constant 0 : index
    %c0_5 = arith.constant 0 : index
    %c0_6 = arith.constant 0 : index
    %2 = vector.load %arg2[%c0_3, %c0_4, %c0_5, %c0_6] : memref<2x1x8x1xf32, #tpu.memory_space<vmem>>, vector<2x1x8x1xf32>
    %3 = vector.shape_cast %2 : vector<2x1x8x1xf32> to vector<2x8x1xf32>
    %c0_7 = arith.constant 0 : index
    %c0_8 = arith.constant 0 : index
    %c0_9 = arith.constant 0 : index
    %4 = vector.load %arg4[%c0_7, %c0_8, %c0_9] : memref<2x384x128xbf16, #tpu.memory_space<vmem>>, vector<2x384x128xbf16>
    %c0_10 = arith.constant 0 : index
    %c0_11 = arith.constant 0 : index
    %c0_12 = arith.constant 0 : index
    %5 = vector.load %arg5[%c0_10, %c0_11, %c0_12] : memref<2x1x128xf32, #tpu.memory_space<vmem>>, vector<2x1x128xf32>
    %6 = tpu.iota {dimensions = array<i32: 1>} : vector<1x8x128xi32>
    %c0_i32 = arith.constant 0 : i32
    %7 = vector.broadcast %c0_i32 : i32 to vector<1x8x128xi32>
    %8 = arith.cmpi ne, %6, %7 : vector<1x8x128xi32>
    %9 = arith.extui %8 : vector<1x8x128xi1> to vector<1x8x128xi32>
    %10 = arith.sitofp %9 : vector<1x8x128xi32> to vector<1x8x128xf32>
    %c7_i32 = arith.constant 7 : i32
    %11 = vector.broadcast %c7_i32 : i32 to vector<1x8x128xi32>
    %12 = arith.cmpi ne, %6, %11 : vector<1x8x128xi32>
    %13 = arith.extui %12 : vector<1x8x128xi1> to vector<1x8x128xi32>
    %14 = arith.sitofp %13 : vector<1x8x128xi32> to vector<1x8x128xf32>
    %15 = vector.broadcast %3 : vector<2x8x1xf32> to vector<2x8x128xf32>
    %16 = arith.mulf %15, %1 : vector<2x8x128xf32>
    %c1_i32 = arith.constant 1 : i32
    %17 = tpu.dynamic_rotate %16 by %c1_i32 dim 1 : vector<2x8x128xf32>, i32 -> vector<2x8x128xf32>
    %18 = vector.broadcast %10 : vector<1x8x128xf32> to vector<2x8x128xf32>
    %19 = arith.mulf %17, %18 : vector<2x8x128xf32>
    %c7_i32_13 = arith.constant 7 : i32
    %20 = tpu.dynamic_rotate %16 by %c7_i32_13 dim 1 : vector<2x8x128xf32>, i32 -> vector<2x8x128xf32>
    %21 = vector.broadcast %14 : vector<1x8x128xf32> to vector<2x8x128xf32>
    %22 = arith.mulf %20, %21 : vector<2x8x128xf32>
    %23 = tpu.concatenate %19, %16, %22 in 2 : vector<2x8x128xf32>, vector<2x8x128xf32>, vector<2x8x128xf32> -> vector<2x8x384xf32>
    %24 = vector.shape_cast %23 : vector<2x8x384xf32> to vector<16x384xf32>
    %25 = arith.truncf %24 : vector<16x384xf32> to vector<16x384xbf16>
    %26 = vector.extract_strided_slice %4 {offsets = [0, 0, 0], sizes = [1, 384, 128], strides = [1, 1, 1]} : vector<2x384x128xbf16> to vector<1x384x128xbf16>
    %27 = vector.shape_cast %26 : vector<1x384x128xbf16> to vector<384x128xbf16>
    %cst = arith.constant dense<0.000000e+00> : vector<16x128xf32>
    %28 = tpu.matmul %25, %27, %cst {dimension_numbers = #tpu.dot_dimension_numbers<[1], [0], [0], [1], [0, 0, 1, 1], [], []>} : vector<16x384xbf16>, vector<384x128xbf16>, vector<16x128xf32> -> vector<16x128xf32>
    %29 = vector.extract_strided_slice %5 {offsets = [0, 0, 0], sizes = [1, 1, 128], strides = [1, 1, 1]} : vector<2x1x128xf32> to vector<1x1x128xf32>
    %30 = vector.shape_cast %29 : vector<1x1x128xf32> to vector<1x128xf32>
    %31 = vector.broadcast %30 : vector<1x128xf32> to vector<16x128xf32>
    %32 = arith.addf %28, %31 : vector<16x128xf32>
    %cst_14 = arith.constant 0.000000e+00 : f32
    %33 = vector.broadcast %cst_14 : f32 to vector<16x128xf32>
    %34 = arith.maximumf %32, %33 : vector<16x128xf32>
    %35 = vector.shape_cast %34 : vector<16x128xf32> to vector<2x8x128xf32>
    %36 = vector.broadcast %3 : vector<2x8x1xf32> to vector<2x8x128xf32>
    %37 = arith.mulf %36, %35 : vector<2x8x128xf32>
    %c1_i32_15 = arith.constant 1 : i32
    %38 = tpu.dynamic_rotate %37 by %c1_i32_15 dim 1 : vector<2x8x128xf32>, i32 -> vector<2x8x128xf32>
    %39 = vector.broadcast %10 : vector<1x8x128xf32> to vector<2x8x128xf32>
    %40 = arith.mulf %38, %39 : vector<2x8x128xf32>
    %c7_i32_16 = arith.constant 7 : i32
    %41 = tpu.dynamic_rotate %37 by %c7_i32_16 dim 1 : vector<2x8x128xf32>, i32 -> vector<2x8x128xf32>
    %42 = vector.broadcast %14 : vector<1x8x128xf32> to vector<2x8x128xf32>
    %43 = arith.mulf %41, %42 : vector<2x8x128xf32>
    %44 = tpu.concatenate %40, %37, %43 in 2 : vector<2x8x128xf32>, vector<2x8x128xf32>, vector<2x8x128xf32> -> vector<2x8x384xf32>
    %45 = vector.shape_cast %44 : vector<2x8x384xf32> to vector<16x384xf32>
    %46 = arith.truncf %45 : vector<16x384xf32> to vector<16x384xbf16>
    %47 = vector.extract_strided_slice %4 {offsets = [1, 0, 0], sizes = [1, 384, 128], strides = [1, 1, 1]} : vector<2x384x128xbf16> to vector<1x384x128xbf16>
    %48 = vector.shape_cast %47 : vector<1x384x128xbf16> to vector<384x128xbf16>
    %cst_17 = arith.constant dense<0.000000e+00> : vector<16x128xf32>
    %49 = tpu.matmul %46, %48, %cst_17 {dimension_numbers = #tpu.dot_dimension_numbers<[1], [0], [0], [1], [0, 0, 1, 1], [], []>} : vector<16x384xbf16>, vector<384x128xbf16>, vector<16x128xf32> -> vector<16x128xf32>
    %50 = vector.extract_strided_slice %5 {offsets = [1, 0, 0], sizes = [1, 1, 128], strides = [1, 1, 1]} : vector<2x1x128xf32> to vector<1x1x128xf32>
    %51 = vector.shape_cast %50 : vector<1x1x128xf32> to vector<1x128xf32>
    %52 = vector.broadcast %51 : vector<1x128xf32> to vector<16x128xf32>
    %53 = arith.addf %49, %52 : vector<16x128xf32>
    %cst_18 = arith.constant 0.000000e+00 : f32
    %54 = vector.broadcast %cst_18 : f32 to vector<16x128xf32>
    %55 = arith.maximumf %53, %54 : vector<16x128xf32>
    %56 = vector.shape_cast %55 : vector<16x128xf32> to vector<2x8x128xf32>
    %57 = arith.addf %1, %56 : vector<2x8x128xf32>
    %c0_19 = arith.constant 0 : index
    %c0_20 = arith.constant 0 : index
    %c0_21 = arith.constant 0 : index
    %58 = vector.load %arg6[%c0_19, %c0_20, %c0_21] : memref<2x128x128xbf16, #tpu.memory_space<vmem>>, vector<2x128x128xbf16>
    %c0_22 = arith.constant 0 : index
    %c0_23 = arith.constant 0 : index
    %c0_24 = arith.constant 0 : index
    %59 = vector.load %arg7[%c0_22, %c0_23, %c0_24] : memref<2x1x128xf32, #tpu.memory_space<vmem>>, vector<2x1x128xf32>
    %60 = vector.extract_strided_slice %57 {offsets = [0, 0, 0], sizes = [1, 8, 128], strides = [1, 1, 1]} : vector<2x8x128xf32> to vector<1x8x128xf32>
    %61 = vector.extract_strided_slice %57 {offsets = [1, 0, 0], sizes = [1, 8, 128], strides = [1, 1, 1]} : vector<2x8x128xf32> to vector<1x8x128xf32>
    %62 = arith.truncf %60 : vector<1x8x128xf32> to vector<1x8x128xbf16>
    %63 = arith.truncf %61 : vector<1x8x128xf32> to vector<1x8x128xbf16>
    %64 = vector.shape_cast %62 : vector<1x8x128xbf16> to vector<8x128xbf16>
    %65 = vector.extract_strided_slice %58 {offsets = [0, 0, 0], sizes = [1, 128, 128], strides = [1, 1, 1]} : vector<2x128x128xbf16> to vector<1x128x128xbf16>
    %66 = vector.shape_cast %65 : vector<1x128x128xbf16> to vector<128x128xbf16>
    %cst_25 = arith.constant dense<0.000000e+00> : vector<8x128xf32>
    %67 = tpu.matmul %64, %66, %cst_25 {dimension_numbers = #tpu.dot_dimension_numbers<[1], [0], [0], [1], [0, 0, 1, 1], [], []>} : vector<8x128xbf16>, vector<128x128xbf16>, vector<8x128xf32> -> vector<8x128xf32>
    %68 = vector.extract_strided_slice %59 {offsets = [0, 0, 0], sizes = [1, 1, 128], strides = [1, 1, 1]} : vector<2x1x128xf32> to vector<1x1x128xf32>
    %69 = vector.shape_cast %68 : vector<1x1x128xf32> to vector<1x128xf32>
    %70 = vector.broadcast %69 : vector<1x128xf32> to vector<8x128xf32>
    %71 = arith.addf %67, %70 : vector<8x128xf32>
    %cst_26 = arith.constant 0.000000e+00 : f32
    %72 = vector.broadcast %cst_26 : f32 to vector<8x128xf32>
    %73 = arith.maximumf %71, %72 : vector<8x128xf32>
    %74 = vector.shape_cast %63 : vector<1x8x128xbf16> to vector<8x128xbf16>
    %75 = vector.extract_strided_slice %58 {offsets = [1, 0, 0], sizes = [1, 128, 128], strides = [1, 1, 1]} : vector<2x128x128xbf16> to vector<1x128x128xbf16>
    %76 = vector.shape_cast %75 : vector<1x128x128xbf16> to vector<128x128xbf16>
    %cst_27 = arith.constant dense<0.000000e+00> : vector<8x128xf32>
    %77 = tpu.matmul %74, %76, %cst_27 {dimension_numbers = #tpu.dot_dimension_numbers<[1], [0], [0], [1], [0, 0, 1, 1], [], []>} : vector<8x128xbf16>, vector<128x128xbf16>, vector<8x128xf32> -> vector<8x128xf32>
    %78 = vector.extract_strided_slice %59 {offsets = [1, 0, 0], sizes = [1, 1, 128], strides = [1, 1, 1]} : vector<2x1x128xf32> to vector<1x1x128xf32>
    %79 = vector.shape_cast %78 : vector<1x1x128xf32> to vector<1x128xf32>
    %80 = vector.broadcast %79 : vector<1x128xf32> to vector<8x128xf32>
    %81 = arith.addf %77, %80 : vector<8x128xf32>
    %cst_28 = arith.constant 0.000000e+00 : f32
    %82 = vector.broadcast %cst_28 : f32 to vector<8x128xf32>
    %83 = arith.maximumf %81, %82 : vector<8x128xf32>
    %84 = vector.shape_cast %73 : vector<8x128xf32> to vector<1x8x128xf32>
    %85 = arith.truncf %84 : vector<1x8x128xf32> to vector<1x8x128xbf16>
    %86 = vector.shape_cast %83 : vector<8x128xf32> to vector<1x8x128xf32>
    %87 = arith.truncf %86 : vector<1x8x128xf32> to vector<1x8x128xbf16>
    %c0_29 = arith.constant 0 : index
    %c0_30 = arith.constant 0 : index
    %c0_31 = arith.constant 0 : index
    %c0_32 = arith.constant 0 : index
    %88 = vector.load %arg3[%c0_29, %c0_30, %c0_31, %c0_32] : memref<2x1x1x8xf32, #tpu.memory_space<vmem>>, vector<2x1x1x8xf32>
    %89 = vector.extract_strided_slice %2 {offsets = [0, 0, 0, 0], sizes = [1, 1, 8, 1], strides = [1, 1, 1, 1]} : vector<2x1x8x1xf32> to vector<1x1x8x1xf32>
    %90 = vector.shape_cast %89 : vector<1x1x8x1xf32> to vector<1x8x1xf32>
    %91 = vector.extract_strided_slice %88 {offsets = [1, 0, 0, 0], sizes = [1, 1, 1, 8], strides = [1, 1, 1, 1]} : vector<2x1x1x8xf32> to vector<1x1x1x8xf32>
    %92 = vector.shape_cast %91 : vector<1x1x1x8xf32> to vector<1x1x8xf32>
    %93 = vector.broadcast %90 : vector<1x8x1xf32> to vector<1x8x8xf32>
    %94 = vector.broadcast %92 : vector<1x1x8xf32> to vector<1x8x8xf32>
    %95 = arith.mulf %93, %94 : vector<1x8x8xf32>
    %96 = vector.extract_strided_slice %2 {offsets = [1, 0, 0, 0], sizes = [1, 1, 8, 1], strides = [1, 1, 1, 1]} : vector<2x1x8x1xf32> to vector<1x1x8x1xf32>
    %97 = vector.shape_cast %96 : vector<1x1x8x1xf32> to vector<1x8x1xf32>
    %98 = vector.extract_strided_slice %88 {offsets = [0, 0, 0, 0], sizes = [1, 1, 1, 8], strides = [1, 1, 1, 1]} : vector<2x1x1x8xf32> to vector<1x1x1x8xf32>
    %99 = vector.shape_cast %98 : vector<1x1x1x8xf32> to vector<1x1x8xf32>
    %100 = vector.broadcast %97 : vector<1x8x1xf32> to vector<1x8x8xf32>
    %101 = vector.broadcast %99 : vector<1x1x8xf32> to vector<1x8x8xf32>
    %102 = arith.mulf %100, %101 : vector<1x8x8xf32>
    "tpu.trace_start"() <{level = 10 : i32, message = "bid,bjd->bij"}> : () -> ()
    %cst_33 = arith.constant dense<0.000000e+00> : vector<1x8x8xf32>
    %103 = tpu.matmul %85, %87, %cst_33 {dimension_numbers = #tpu.dot_dimension_numbers<[2], [2], [1], [1], [0, 0, 0, 1, 1, 1], [0], [0]>} : vector<1x8x128xbf16>, vector<1x8x128xbf16>, vector<1x8x8xf32> -> vector<1x8x8xf32>
    "tpu.trace_stop"() : () -> ()
    "tpu.trace_start"() <{level = 10 : i32, message = "bjd,bid->bji"}> : () -> ()
    %cst_34 = arith.constant dense<0.000000e+00> : vector<1x8x8xf32>
    %104 = tpu.matmul %87, %85, %cst_34 {dimension_numbers = #tpu.dot_dimension_numbers<[2], [2], [1], [1], [0, 0, 0, 1, 1, 1], [0], [0]>} : vector<1x8x128xbf16>, vector<1x8x128xbf16>, vector<1x8x8xf32> -> vector<1x8x8xf32>
    "tpu.trace_stop"() : () -> ()
    %105 = arith.mulf %95, %103 : vector<1x8x8xf32>
    %cst_35 = arith.constant 1.000000e+00 : f32
    %106 = vector.broadcast %cst_35 : f32 to vector<1x8x8xf32>
    %107 = arith.subf %106, %95 : vector<1x8x8xf32>
    %cst_36 = arith.constant -1.000000e+09 : f32
    %108 = vector.broadcast %cst_36 : f32 to vector<1x8x8xf32>
    %109 = arith.mulf %107, %108 : vector<1x8x8xf32>
    %110 = arith.addf %105, %109 : vector<1x8x8xf32>
    %111 = arith.mulf %102, %104 : vector<1x8x8xf32>
    %cst_37 = arith.constant 1.000000e+00 : f32
    %112 = vector.broadcast %cst_37 : f32 to vector<1x8x8xf32>
    %113 = arith.subf %112, %102 : vector<1x8x8xf32>
    %cst_38 = arith.constant -1.000000e+09 : f32
    %114 = vector.broadcast %cst_38 : f32 to vector<1x8x8xf32>
    %115 = arith.mulf %113, %114 : vector<1x8x8xf32>
    %116 = arith.addf %111, %115 : vector<1x8x8xf32>
    %cst_39 = arith.constant dense<0xFF800000> : vector<1x8xf32>
    %117 = vector.multi_reduction <maximumf>, %110, %cst_39 [2] : vector<1x8x8xf32> to vector<1x8xf32>
    %118 = vector.shape_cast %117 : vector<1x8xf32> to vector<1x8x1xf32>
    %119 = vector.broadcast %118 : vector<1x8x1xf32> to vector<1x8x8xf32>
    %120 = arith.subf %110, %119 : vector<1x8x8xf32>
    %121 = math.exp %120 : vector<1x8x8xf32>
    %cst_40 = arith.constant dense<0.000000e+00> : vector<1x8xf32>
    %122 = vector.multi_reduction <add>, %121, %cst_40 [2] : vector<1x8x8xf32> to vector<1x8xf32>
    %123 = vector.shape_cast %122 : vector<1x8xf32> to vector<1x8x1xf32>
    %124 = tpu.reciprocal %123 {approx = true} : vector<1x8x1xf32> -> vector<1x8x1xf32>
    %125 = vector.broadcast %124 : vector<1x8x1xf32> to vector<1x8x8xf32>
    %126 = arith.mulf %121, %125 : vector<1x8x8xf32>
    %cst_41 = arith.constant dense<0xFF800000> : vector<1x8xf32>
    %127 = vector.multi_reduction <maximumf>, %116, %cst_41 [2] : vector<1x8x8xf32> to vector<1x8xf32>
    %128 = vector.shape_cast %127 : vector<1x8xf32> to vector<1x8x1xf32>
    %129 = vector.broadcast %128 : vector<1x8x1xf32> to vector<1x8x8xf32>
    %130 = arith.subf %116, %129 : vector<1x8x8xf32>
    %131 = math.exp %130 : vector<1x8x8xf32>
    %cst_42 = arith.constant dense<0.000000e+00> : vector<1x8xf32>
    %132 = vector.multi_reduction <add>, %131, %cst_42 [2] : vector<1x8x8xf32> to vector<1x8xf32>
    %133 = vector.shape_cast %132 : vector<1x8xf32> to vector<1x8x1xf32>
    %134 = tpu.reciprocal %133 {approx = true} : vector<1x8x1xf32> -> vector<1x8x1xf32>
    %135 = vector.broadcast %134 : vector<1x8x1xf32> to vector<1x8x8xf32>
    %136 = arith.mulf %131, %135 : vector<1x8x8xf32>
    %137 = arith.truncf %136 : vector<1x8x8xf32> to vector<1x8x8xbf16>
    "tpu.trace_start"() <{level = 10 : i32, message = "bji,bid->bjd"}> : () -> ()
    %cst_43 = arith.constant dense<0.000000e+00> : vector<1x8x128xf32>
    %138 = tpu.matmul %137, %62, %cst_43 {dimension_numbers = #tpu.dot_dimension_numbers<[2], [1], [1], [2], [0, 0, 0, 1, 1, 2], [0], [0]>} : vector<1x8x8xbf16>, vector<1x8x128xbf16>, vector<1x8x128xf32> -> vector<1x8x128xf32>
    "tpu.trace_stop"() : () -> ()
    %139 = arith.truncf %126 : vector<1x8x8xf32> to vector<1x8x8xbf16>
    "tpu.trace_start"() <{level = 10 : i32, message = "bij,bjd->bid"}> : () -> ()
    %cst_44 = arith.constant dense<0.000000e+00> : vector<1x8x128xf32>
    %140 = tpu.matmul %139, %63, %cst_44 {dimension_numbers = #tpu.dot_dimension_numbers<[2], [1], [1], [2], [0, 0, 0, 1, 1, 2], [0], [0]>} : vector<1x8x8xbf16>, vector<1x8x128xbf16>, vector<1x8x128xf32> -> vector<1x8x128xf32>
    "tpu.trace_stop"() : () -> ()
    %141 = tpu.concatenate %138, %140 in 0 : vector<1x8x128xf32>, vector<1x8x128xf32> -> vector<2x8x128xf32>
    %142 = vector.shape_cast %57 : vector<2x8x128xf32> to vector<16x128xf32>
    %143 = vector.shape_cast %141 : vector<2x8x128xf32> to vector<16x128xf32>
    %144 = arith.subf %142, %143 : vector<16x128xf32>
    %145 = arith.mulf %142, %143 : vector<16x128xf32>
    %146 = tpu.concatenate %142, %143, %144, %145 in 1 : vector<16x128xf32>, vector<16x128xf32>, vector<16x128xf32>, vector<16x128xf32> -> vector<16x512xf32>
    %147 = arith.truncf %146 : vector<16x512xf32> to vector<16x512xbf16>
    %c0_45 = arith.constant 0 : index
    %c0_46 = arith.constant 0 : index
    %148 = vector.load %arg8[%c0_45, %c0_46] : memref<512x128xbf16, #tpu.memory_space<vmem>>, vector<512x128xbf16>
    %cst_47 = arith.constant dense<0.000000e+00> : vector<16x128xf32>
    %149 = tpu.matmul %147, %148, %cst_47 {dimension_numbers = #tpu.dot_dimension_numbers<[1], [0], [0], [1], [0, 0, 1, 1], [], []>} : vector<16x512xbf16>, vector<512x128xbf16>, vector<16x128xf32> -> vector<16x128xf32>
    %c0_48 = arith.constant 0 : index
    %c0_49 = arith.constant 0 : index
    %150 = vector.load %arg9[%c0_48, %c0_49] : memref<1x128xf32, #tpu.memory_space<vmem>>, vector<1x128xf32>
    %151 = vector.broadcast %150 : vector<1x128xf32> to vector<16x128xf32>
    %152 = arith.addf %149, %151 : vector<16x128xf32>
    %cst_50 = arith.constant 0.000000e+00 : f32
    %153 = vector.broadcast %cst_50 : f32 to vector<16x128xf32>
    %154 = arith.maximumf %152, %153 : vector<16x128xf32>
    %155 = arith.truncf %154 : vector<16x128xf32> to vector<16x128xbf16>
    %c0_51 = arith.constant 0 : index
    %c0_52 = arith.constant 0 : index
    %156 = vector.load %arg10[%c0_51, %c0_52] : memref<128x128xbf16, #tpu.memory_space<vmem>>, vector<128x128xbf16>
    %cst_53 = arith.constant dense<0.000000e+00> : vector<16x128xf32>
    %157 = tpu.matmul %155, %156, %cst_53 {dimension_numbers = #tpu.dot_dimension_numbers<[1], [0], [0], [1], [0, 0, 1, 1], [], []>} : vector<16x128xbf16>, vector<128x128xbf16>, vector<16x128xf32> -> vector<16x128xf32>
    %c0_54 = arith.constant 0 : index
    %c0_55 = arith.constant 0 : index
    %158 = vector.load %arg11[%c0_54, %c0_55] : memref<1x128xf32, #tpu.memory_space<vmem>>, vector<1x128xf32>
    %159 = vector.broadcast %158 : vector<1x128xf32> to vector<16x128xf32>
    %160 = arith.addf %157, %159 : vector<16x128xf32>
    %cst_56 = arith.constant 0.000000e+00 : f32
    %161 = vector.broadcast %cst_56 : f32 to vector<16x128xf32>
    %162 = arith.maximumf %160, %161 : vector<16x128xf32>
    %163 = vector.shape_cast %162 : vector<16x128xf32> to vector<2x1x8x128xf32>
    %c0_57 = arith.constant 0 : index
    %c0_58 = arith.constant 0 : index
    %c0_59 = arith.constant 0 : index
    %c0_60 = arith.constant 0 : index
    %164 = vector.load %arg12[%c0_57, %c0_58, %c0_59, %c0_60] : memref<2x1x8x128xf32, #tpu.memory_space<vmem>>, vector<2x1x8x128xf32>
    tpu.vector_store %arg12[%c0_57, %c0_58, %c0_59, %c0_60], %163 {strides = array<i32>} : memref<2x1x8x128xf32, #tpu.memory_space<vmem>>, vector<2x1x8x128xf32>,
    return
  }
  func.func @transform_0(%arg0: i32) -> (i32, i32, i32, i32) {
    %c0_i32 = arith.constant 0 : i32
    %c0_i32_0 = arith.constant 0 : i32
    %c0_i32_1 = arith.constant 0 : i32
    %c0_i32_2 = arith.constant 0 : i32
    return %c0_i32, %arg0, %c0_i32_0, %c0_i32_1 : i32, i32, i32, i32
  }
  func.func @transform_1(%arg0: i32) -> (i32, i32, i32, i32) {
    %c0_i32 = arith.constant 0 : i32
    %c0_i32_0 = arith.constant 0 : i32
    %c0_i32_1 = arith.constant 0 : i32
    %c0_i32_2 = arith.constant 0 : i32
    return %c0_i32, %arg0, %c0_i32_0, %c0_i32_1 : i32, i32, i32, i32
  }
  func.func @transform_2(%arg0: i32) -> (i32, i32, i32, i32) {
    %c0_i32 = arith.constant 0 : i32
    %c0_i32_0 = arith.constant 0 : i32
    %c0_i32_1 = arith.constant 0 : i32
    %c0_i32_2 = arith.constant 0 : i32
    return %c0_i32, %arg0, %c0_i32_0, %c0_i32_1 : i32, i32, i32, i32
  }
  func.func @transform_3(%arg0: i32) -> (i32, i32, i32) {
    %c0_i32 = arith.constant 0 : i32
    %c0_i32_0 = arith.constant 0 : i32
    %c0_i32_1 = arith.constant 0 : i32
    %c0_i32_2 = arith.constant 0 : i32
    return %c0_i32, %c0_i32_0, %c0_i32_1 : i32, i32, i32
  }
  func.func @transform_4(%arg0: i32) -> (i32, i32, i32) {
    %c0_i32 = arith.constant 0 : i32
    %c0_i32_0 = arith.constant 0 : i32
    %c0_i32_1 = arith.constant 0 : i32
    %c0_i32_2 = arith.constant 0 : i32
    return %c0_i32, %c0_i32_0, %c0_i32_1 : i32, i32, i32
  }
  func.func @transform_5(%arg0: i32) -> (i32, i32, i32) {
    %c0_i32 = arith.constant 0 : i32
    %c0_i32_0 = arith.constant 0 : i32
    %c0_i32_1 = arith.constant 0 : i32
    %c0_i32_2 = arith.constant 0 : i32
    return %c0_i32, %c0_i32_0, %c0_i32_1 : i32, i32, i32
  }
  func.func @transform_6(%arg0: i32) -> (i32, i32, i32) {
    %c0_i32 = arith.constant 0 : i32
    %c0_i32_0 = arith.constant 0 : i32
    %c0_i32_1 = arith.constant 0 : i32
    %c0_i32_2 = arith.constant 0 : i32
    return %c0_i32, %c0_i32_0, %c0_i32_1 : i32, i32, i32
  }
  func.func @transform_7(%arg0: i32) -> (i32, i32) {
    %c0_i32 = arith.constant 0 : i32
    %c0_i32_0 = arith.constant 0 : i32
    %c0_i32_1 = arith.constant 0 : i32
    return %c0_i32, %c0_i32_0 : i32, i32
  }
  func.func @transform_8(%arg0: i32) -> (i32, i32) {
    %c0_i32 = arith.constant 0 : i32
    %c0_i32_0 = arith.constant 0 : i32
    %c0_i32_1 = arith.constant 0 : i32
    return %c0_i32, %c0_i32_0 : i32, i32
  }
  func.func @transform_9(%arg0: i32) -> (i32, i32) {
    %c0_i32 = arith.constant 0 : i32
    %c0_i32_0 = arith.constant 0 : i32
    %c0_i32_1 = arith.constant 0 : i32
    return %c0_i32, %c0_i32_0 : i32, i32
  }
  func.func @transform_10(%arg0: i32) -> (i32, i32) {
    %c0_i32 = arith.constant 0 : i32
    %c0_i32_0 = arith.constant 0 : i32
    %c0_i32_1 = arith.constant 0 : i32
    return %c0_i32, %c0_i32_0 : i32, i32
  }
  func.func @transform_11(%arg0: i32) -> (i32, i32, i32, i32) {
    %c0_i32 = arith.constant 0 : i32
    %c0_i32_0 = arith.constant 0 : i32
    %c0_i32_1 = arith.constant 0 : i32
    %c0_i32_2 = arith.constant 0 : i32
    return %c0_i32, %arg0, %c0_i32_0, %c0_i32_1 : i32, i32, i32, i32
  }
}

</mosaic_0001>

<bundles_post_ra>
// kernel: re2_forward.5
= control target key start
LH: loop header
LB: loop body
LE: loop exit
PB: predicated region body
PF: predicated region fallthrough
CT: control target
= control target key end

     0   :  { %11 = vsyncpa [#allocation5], 0  ;;  %s1442_s0 = inlined_call_operand.vmem [shape: f32[2,2,8,128], index: 0, kind: input, shape index: {}]   ;;  %s1443_s1 = inlined_call_operand.vmem [shape: f32[2,2,8,1], index: 1, kind: input, shape index: {}]   ;;  %s1444_s2 = inlined_call_operand.vmem [shape: f32[512,128], index: 2, kind: input, shape index: {}]   ;;  %s1445_s3 = inlined_call_operand.vmem [shape: f32[1,128], index: 3, kind: input, shape index: {}]   ;;  %s1446_s4 = inlined_call_operand.vmem [shape: f32[128,128], index: 4, kind: input, shape index: {}]   ;;  %s1447_s5 = inlined_call_operand.vmem [shape: f32[1,128], index: 5, kind: input, shape index: {}]   ;;  %s1448_s6 = inlined_call_operand.hbm [shape: f32[2,1,128], index: 6, kind: output, shape index: {}]  }
   0x1   :  { %13 = vsyncpa [#allocation5 + $0x1], 0  ;;  %s1059_s21 = smov 0   ;;  %s1061_s22 = smov 0  }
   0x2   :  { %s1063_s23 = smov 0   ;;  %s1065_s24 = smov 0  }
   0x3 LB: > { %s778_s25 = sadd.s32 4294967295, %s1018_s24   ;;  %s779_s26 = sadd.s32 4294967294, %s1018_s24   ;;  %s1018_s24 = sphi %s1065_s24, %s1455_s24   ;;  %s1014_s23 = sphi %s1063_s23, %s1454_s23   ;;  %s1010_s22 = sphi %s1061_s22, %s1453_s22   ;;  %s1006_s21 = sphi %s1059_s21, %s1452_s21  }
   0x4   : > { %s1082_s27 = sadd.s32 1, %s1018_s24   ;;  %s26_s28 = sadd.s32 1, %s1014_s23 }
   0x5   : > { %s23_s29 = ssub.s32 %s1018_s24, %s1082_s27  ;;  %p33_p0 = scmp.ne.s32.totalorder %s1014_s23, %s1010_s22 }
   0x6   : > { %p24_p1 = scmp.eq.s32.totalorder %s23_s29, 0  ;;  %p34_p2 = scmp.eq.s32.totalorder %s1018_s24, 0 }
   0x7   : > { %p173_p3 = scmp.eq.s32.totalorder %s778_s25, 1  ;;  %p178_p4 = scmp.ne.s32.totalorder %s1010_s22, %s1006_s21 }
   0x8   : > { %s1095_s30 = scalar_select %p24_p1, %s1014_s23, %s26_s28  }
   0x9   : > { %p1097_p5 = por %p34_p2, %p33_p0  ;;  %p1101_p6 = por %p173_p3, %p33_p0 }
   0xa   : > { %p179_p7 = scmp.eq.s32.totalorder %s779_s26, 1  ;;  %p781_p9 = scmp.ge.s32.totalorder %s1018_s24, 2 }
   0xc   : > { %p1105_p8 = por %p179_p7, %p178_p4  ;;  %207 = sbr.rel (%p781_p9) target bundleno = 27 (0x1b), region = 32 }
  0x11   : > { %210 = sbr.rel (!%p1097_p5) target bundleno = 22 (0x16), region = 36  ;;  %s212_s10 = sand.u32 (%p1097_p5), 1, %s1014_s23  }
  0x12   : > { %s783_s11 = sshll.u32 (%p1097_p5), %s1018_s24, 3  ;;  %s782_s12 = sshll.u32 (%p1097_p5), %s212_s10, 4 }
  0x13   : > { %s216_s15 = scalar_lea.vmem (%p1097_p5), %s1442_s0, %s783_s11  ;;  %s214_s16 = scalar_lea.vmem (%p1097_p5), [#allocation2], %s782_s12 }
  0x14   : > { %v247_v0 = vld [vmem:[%s216_s15] sm:$0xff] (%p1097_p5)  ;;  %v249_v1 = vld [vmem:[%s216_s15 + $0x10] sm:$0xff] (%p1097_p5) }
  0x15   : > { %248 = vst [vmem:[%s214_s16] sm:$0xff] (%p1097_p5), %v247_v0  ;;  %250 = vst [vmem:[%s214_s16 + $0x8] sm:$0xff] (%p1097_p5), %v249_v1 }
  0x16 PF: > { %256 = sbr.rel (!%p1097_p5) target bundleno = 27 (0x1b), region = 74  ;;  %s258_s17 = sand.u32 (%p1097_p5), 1, %s1014_s23  }
  0x17   : > { %s785_s18 = sshll.u32 (%p1097_p5), %s1018_s24, 3  ;;  %s784_s19 = sshll.u32 (%p1097_p5), %s258_s17, 4 }
  0x18   : > { %s262_s28 = scalar_lea.vmem (%p1097_p5), %s1443_s1, %s785_s18  ;;  %s260_s29 = scalar_lea.vmem (%p1097_p5), [#allocation3], %s784_s19 }
  0x19   : > { %v293_v2 = vld [vmem:[%s262_s28] sm:$0xff] (%p1097_p5)  ;;  %v295_v3 = vld [vmem:[%s262_s28 + $0x10] sm:$0xff] (%p1097_p5) }
  0x1a   : > { %294 = vst [vmem:[%s260_s29] sm:$0xff] (%p1097_p5), %v293_v2  ;;  %296 = vst [vmem:[%s260_s29 + $0x8] sm:$0xff] (%p1097_p5), %v295_v3 }
  0x1b PF: > { %p786_p10 = scmp.ge.s32.totalorder %s1018_s24, 1  ;;  %p301_p11 = scmp.lt.s32.totalorder %s1018_s24, 3 }
  0x1d   : > { %p302_p12 = pnand %p786_p10, %p301_p11 }
  0x1e   : > { %s1129_s7 = sand.u32 (!%p302_p12), 1, %s1010_s22   ;;  %s789_s18 = sshll.u32 (!%p302_p12), %s778_s25, 4 }
  0x1f   : > { %305 = sbr.rel (%p302_p12) target bundleno = 599 (0x257), region = 112  ;;  %s787_s14 = sshll.u32 (!%p302_p12), %s1129_s7, 4 }
  0x20   : > { %s317_s13 = scalar_lea.vmem (!%p302_p12), [#allocation3], %s787_s14  ;;  %s310_s29 = scalar_lea.vmem (!%p302_p12), [#allocation2], %s787_s14 }
  0x21   : > { %s346_s19 = scalar_lea.vmem (!%p302_p12), [#allocation4], %s1129_s7  ;;  %s688_s14 = scalar_lea.sflag (!%p302_p12), [#allocation5], %s1129_s7 }
  0x22   : > { %s700_s20 = sshll.u32 (!%p302_p12), %s346_s19, 4  ;;  %s1023_s11 = smov (!%p302_p12), [#allocation4]   ;;  %s701_s20 = int_to_ptr.vmem [resolvable:$true] %s700_s20 }
  0x23   : > { %s958_s10 = scalar_lea.vmem (!%p302_p12), %s701_s20, 16  ;;  %s962_s25 = sshll.u32 (!%p302_p12), %s1023_s11, 4  ;;  %s963_s25 = int_to_ptr.vmem [resolvable:$false] %s962_s25 }
  0x24   : > { %v424_v4 = vld [vmem:[%s1444_s2 + $0xf8] sm:$0xff]  ;;  %v1020_v6 = vmov 0   ;;  %v423_v7 = vld [vmem:[%s1444_s2 + $0xf0] sm:$0xff]  ;;  %v422_v11 = vld [vmem:[%s1444_s2 + $0xe8] sm:$0xff]  ;;  %vm1022_vm0 = vmmov 0   ;;  %p959_p13 = scmp.ne.s32.totalorder %s701_s20, %s958_s10  ;;  %s964_s12 = scalar_lea.vmem %s963_s25, 32 }
  0x25   : > { %v408_v5 = vld [vmem:[%s1444_s2 + $0x78] sm:$0xff]  ;;  %956 = vset.pattern.permute.xlu0 %v1020_v6  ;;  %957 = vset.pattern.permute.xlu1 %v1020_v6  ;;  %v407_v10 = vld [vmem:[%s1444_s2 + $0x70] sm:$0xff]  ;;  %v406_v18 = vld [vmem:[%s1444_s2 + $0x68] sm:$0xff]  ;;  %p965_p2 = scmp.lt.s32.totalorder %s701_s20, %s963_s25  ;;  %p966_p3 = scmp.lt.s32.totalorder %s964_s12, %s958_s10 }
  0x26   : > { %v456_v8 = vld [vmem:[%s1444_s2 + $0x1f8] sm:$0xff]  ;;  %792 = vmatprep.subr.mxu0 %v424_v4  ;;  %v455_v12 = vld [vmem:[%s1444_s2 + $0x1f0] sm:$0xff]  ;;  %v454_v19 = vld [vmem:[%s1444_s2 + $0x1e8] sm:$0xff]  ;;  %p960_p0 = pnand %p959_p13, %p1101_p6 }
  0x27   : > { %v440_v9 = vld [vmem:[%s1444_s2 + $0x178] sm:$0xff]  ;;  %827 = vmatprep.subr.mxu1 %v456_v8  ;;  %v349_v13 = vld [vmem:[%s317_s13] sm:$0xff]  ;;  %793 = vmatpush3.msra.mxu0 %v408_v5  ;;  %v438_v22 = vld [vmem:[%s1444_s2 + $0x168] sm:$0xff]  ;;  %p967_p4 = por %p966_p3, %p965_p2 }
  0x28   : > { %v350_v14 = vld [vmem:[%s317_s13 + $0x8] sm:$0xff]  ;;  %828 = vmatpush3.msra.mxu1 %v440_v9  ;;  %v439_v15 = vld [vmem:[%s1444_s2 + $0x170] sm:$0xff]  ;;  %353 = vperm.xlu0 %956, %v349_v13   ;;  %v363_v16 = vsub.f32 1.0, %v349_v13  ;;  %v421_v21 = vld [vmem:[%s1444_s2 + $0xe0] sm:$0xff]  ;;  %p961_p1 = pneg %p960_p0 }
  0x29   : > { %v364_v17 = vsub.f32 1.0, %v350_v14  ;;  %794 = vmatprep.subr.mxu0 %v423_v7  ;;  %829 = vmatprep.subr.mxu1 %v455_v12  ;;  %v405_v23 = vld [vmem:[%s1444_s2 + $0x60] sm:$0xff]  ;;  %v420_v26 = vld [vmem:[%s1444_s2 + $0xd8] sm:$0xff]  ;;  %v419_v29 = vld [vmem:[%s1444_s2 + $0xd0] sm:$0xff] }
  0x2a   : > { %795 = vmatpush3.msra.mxu0 %v407_v10  ;;  %v365_v20 = vmul.f32 -1e+09, %v363_v16  ;;  %830 = vmatpush3.msra.mxu1 %v439_v15  ;;  %v453_v24 = vld [vmem:[%s1444_s2 + $0x1e0] sm:$0xff]  ;;  %v404_v28 = vld [vmem:[%s1444_s2 + $0x58] sm:$0xff]  ;;  %v403_v31 = vld [vmem:[%s1444_s2 + $0x50] sm:$0xff]  ;;  %p968_p5 = pnand %p967_p4, %p961_p1 }
  0x2b   : > { %796 = vmatprep.subr.mxu0 %v422_v11  ;;  %831 = vmatprep.subr.mxu1 %v454_v19  ;;  %v366_v25 = vmul.f32 -1e+09, %v364_v17  ;;  %v437_v27 = vld [vmem:[%s1444_s2 + $0x160] sm:$0xff]  ;;  %v452_v30 = vld [vmem:[%s1444_s2 + $0x1d8] sm:$0xff]  ;;  %v418_v33 = vld [vmem:[%s1444_s2 + $0xc8] sm:$0xff]  ;;  %v1021_v11 = vmov 0.0  }
  0x2c   : > { %797 = vmatpush3.msra.mxu0 %v406_v18  ;;  %358 = vperm.xlu0 %956, %v350_v14   ;;  %v436_v32 = vld [vmem:[%s1444_s2 + $0x158] sm:$0xff]  ;;  %v451_v34 = vld [vmem:[%s1444_s2 + $0x1d0] sm:$0xff]  ;;  %v402_v35 = vld [vmem:[%s1444_s2 + $0x48] sm:$0xff] }
  0x2d   : > { %369 = vperm.xlu1 %957, %v365_v20   ;;  %798 = vmatprep.subr.mxu0 %v421_v21  ;;  %v435_v36 = vld [vmem:[%s1444_s2 + $0x150] sm:$0xff]  ;;  %v417_v37 = vld [vmem:[%s1444_s2 + $0xc0] sm:$0xff]  ;;  %v450_v38 = vld [vmem:[%s1444_s2 + $0x1c8] sm:$0xff] }
  0x2e   : > { %832 = vmatpush3.msra.mxu1 %v438_v22  ;;  %799 = vmatpush3.msra.mxu0 %v405_v23  ;;  %v401_v39 = vld [vmem:[%s1444_s2 + $0x40] sm:$0xff]  ;;  %v434_v40 = vld [vmem:[%s1444_s2 + $0x148] sm:$0xff]  ;;  %v416_v41 = vld [vmem:[%s1444_s2 + $0xb8] sm:$0xff] }
  0x2f   : > { %833 = vmatprep.subr.mxu1 %v453_v24  ;;  %800 = vmatprep.subr.mxu0 %v420_v26  ;;  %v449_v42 = vld [vmem:[%s1444_s2 + $0x1c0] sm:$0xff]  ;;  %v400_v43 = vld [vmem:[%s1444_s2 + $0x38] sm:$0xff]  ;;  %v415_v45 = vld [vmem:[%s1444_s2 + $0xb0] sm:$0xff] }
  0x30   : > { %834 = vmatpush3.msra.mxu1 %v437_v27  ;;  %801 = vmatpush3.msra.mxu0 %v404_v28  ;;  %v433_v44 = vld [vmem:[%s1444_s2 + $0x140] sm:$0xff]  ;;  %v448_v46 = vld [vmem:[%s1444_s2 + $0x1b8] sm:$0xff]  ;;  %v399_v47 = vld [vmem:[%s1444_s2 + $0x30] sm:$0xff] }
  0x31   : > { %374 = vperm.xlu1 %957, %v366_v25   ;;  %802 = vmatprep.subr.mxu0 %v419_v29  ;;  %v432_v48 = vld [vmem:[%s1444_s2 + $0x138] sm:$0xff]  ;;  %v414_v49 = vld [vmem:[%s1444_s2 + $0xa8] sm:$0xff]  ;;  %v447_v50 = vld [vmem:[%s1444_s2 + $0x1b0] sm:$0xff] }
  0x32   : > { %835 = vmatprep.subr.mxu1 %v452_v30  ;;  %803 = vmatpush3.msra.mxu0 %v403_v31  ;;  %v398_v51 = vld [vmem:[%s1444_s2 + $0x28] sm:$0xff]  ;;  %v431_v52 = vld [vmem:[%s1444_s2 + $0x130] sm:$0xff]  ;;  %v413_v53 = vld [vmem:[%s1444_s2 + $0xa0] sm:$0xff] }
  0x33   : > { %836 = vmatpush3.msra.mxu1 %v436_v32  ;;  %804 = vmatprep.subr.mxu0 %v418_v33  ;;  %v446_v54 = vld [vmem:[%s1444_s2 + $0x1a8] sm:$0xff]  ;;  %v397_v55 = vld [vmem:[%s1444_s2 + $0x20] sm:$0xff]  ;;  %v412_v57 = vld [vmem:[%s1444_s2 + $0x98] sm:$0xff] }
  0x34   : > { %837 = vmatprep.subr.mxu1 %v451_v34  ;;  %805 = vmatpush3.msra.mxu0 %v402_v35  ;;  %v430_v56 = vld [vmem:[%s1444_s2 + $0x128] sm:$0xff]  ;;  %v445_v58 = vld [vmem:[%s1444_s2 + $0x1a0] sm:$0xff]  ;;  %v396_v59 = vld [vmem:[%s1444_s2 + $0x18] sm:$0xff] }
  0x35   : > { %838 = vmatpush3.msra.mxu1 %v435_v36  ;;  %806 = vmatprep.subr.mxu0 %v417_v37  ;;  %v429_v60 = vld [vmem:[%s1444_s2 + $0x120] sm:$0xff]  ;;  %v411_v61 = vld [vmem:[%s1444_s2 + $0x90] sm:$0xff]  ;;  %v444_v62 = vld [vmem:[%s1444_s2 + $0x198] sm:$0xff] }
  0x36   : > { %839 = vmatprep.subr.mxu1 %v450_v38  ;;  %807 = vmatpush3.msra.mxu0 %v401_v39  ;;  %v395_v63 = vld [vmem:[%s1444_s2 + $0x10] sm:$0xff]  ;;  %v428_v0 = vld [vmem:[%s1444_s2 + $0x118] sm:$0xff]  ;;  %v410_v1 = vld [vmem:[%s1444_s2 + $0x88] sm:$0xff] }
  0x37   : > { %840 = vmatpush3.msra.mxu1 %v434_v40  ;;  %808 = vmatprep.subr.mxu0 %v416_v41  ;;  %v443_v2 = vld [vmem:[%s1444_s2 + $0x190] sm:$0xff]  ;;  %v394_v3 = vld [vmem:[%s1444_s2 + $0x8] sm:$0xff]  ;;  %v409_v5 = vld [vmem:[%s1444_s2 + $0x80] sm:$0xff] }
  0x38   : > { %841 = vmatprep.subr.mxu1 %v449_v42  ;;  %809 = vmatpush3.msra.mxu0 %v400_v43  ;;  %v427_v4 = vld [vmem:[%s1444_s2 + $0x110] sm:$0xff]  ;;  %v442_v6 = vld [vmem:[%s1444_s2 + $0x188] sm:$0xff]  ;;  %v393_v7 = vld [vmem:[%s1444_s2] sm:$0xff] }
  0x39   : > { %842 = vmatpush3.msra.mxu1 %v433_v44  ;;  %810 = vmatprep.subr.mxu0 %v415_v45  ;;  %v426_v8 = vld [vmem:[%s1444_s2 + $0x108] sm:$0xff]  ;;  %v441_v9 = vld [vmem:[%s1444_s2 + $0x180] sm:$0xff]  ;;  %v614_v34 = vld [vmem:[%s1446_s4 + $0x78] sm:$0xff] }
  0x3a   : > { %843 = vmatprep.subr.mxu1 %v448_v46  ;;  %811 = vmatpush3.msra.mxu0 %v399_v47  ;;  %v425_v10 = vld [vmem:[%s1444_s2 + $0x100] sm:$0xff]  ;;  %v348_v16 = vld [vmem:[%s310_s29 + $0x8] sm:$0xff]  ;;  %v613_v37 = vld [vmem:[%s1446_s4 + $0x70] sm:$0xff] }
  0x3b   : > { %844 = vmatpush3.msra.mxu1 %v432_v48  ;;  %812 = vmatprep.subr.mxu0 %v414_v49  ;;  %v347_v12 = vld [vmem:[%s310_s29] sm:$0xff]  ;;  %v612_v38 = vld [vmem:[%s1446_s4 + $0x68] sm:$0xff]  ;;  %v610_v40 = vld [vmem:[%s1446_s4 + $0x58] sm:$0xff]  ;;  %s1405_s29 = scalar_lea.hbm %s1448_s6, %s789_s18 }
  0x3c   : > { %845 = vmatprep.subr.mxu1 %v447_v50  ;;  %813 = vmatpush3.msra.mxu0 %v398_v51  ;;  %v611_v39 = vld [vmem:[%s1446_s4 + $0x60] sm:$0xff]  ;;  %v609_v41 = vld [vmem:[%s1446_s4 + $0x50] sm:$0xff]  ;;  %v608_v42 = vld [vmem:[%s1446_s4 + $0x48] sm:$0xff] }
  0x3d   : > { %846 = vmatpush3.msra.mxu1 %v431_v52  ;;  %814 = vmatprep.subr.mxu0 %v413_v53  ;;  %v607_v43 = vld [vmem:[%s1446_s4 + $0x40] sm:$0xff]  ;;  %v606_v44 = vld [vmem:[%s1446_s4 + $0x38] sm:$0xff]  ;;  %v605_v45 = vld [vmem:[%s1446_s4 + $0x30] sm:$0xff] }
  0x3e   : > { %847 = vmatprep.subr.mxu1 %v446_v54  ;;  %815 = vmatpush3.msra.mxu0 %v397_v55  ;;  %v604_v46 = vld [vmem:[%s1446_s4 + $0x28] sm:$0xff]  ;;  %v603_v47 = vld [vmem:[%s1446_s4 + $0x20] sm:$0xff]  ;;  %v602_v48 = vld [vmem:[%s1446_s4 + $0x18] sm:$0xff] }
  0x3f   : > { %848 = vmatpush3.msra.mxu1 %v430_v56  ;;  %816 = vmatprep.subr.mxu0 %v412_v57  ;;  %v601_v49 = vld [vmem:[%s1446_s4 + $0x10] sm:$0xff]  ;;  %v600_v50 = vld [vmem:[%s1446_s4 + $0x8] sm:$0xff]  ;;  %v599_v51 = vld [vmem:[%s1446_s4] sm:$0xff] }
  0x40   : > { %849 = vmatprep.subr.mxu1 %v445_v58  ;;  %817 = vmatpush3.msra.mxu0 %v396_v59  ;;  %v457_v53 = vld [vmem:[%s1445_s3] sm:$0x1] }
  0x41   : > { %850 = vmatpush3.msra.mxu1 %v429_v60  ;;  %818 = vmatprep.subr.mxu0 %v411_v61 }
  0x42   : > { %851 = vmatprep.subr.mxu1 %v444_v62  ;;  %819 = vmatpush3.msra.mxu0 %v395_v63  ;;  %v615_v62 = vld [vmem:[%s1447_s5] sm:$0x1] }
  0x43   : > { %852 = vmatpush3.msra.mxu1 %v428_v0  ;;  %820 = vmatprep.subr.mxu0 %v410_v1 }
  0x44   : > { %853 = vmatprep.subr.mxu1 %v443_v2  ;;  %821 = vmatpush3.msra.mxu0 %v394_v3 }
  0x45   : > { %854 = vmatpush3.msra.mxu1 %v427_v4  ;;  %822 = vmatprep.subr.mxu0 %v409_v5 }
  0x46   : > { %855 = vmatprep.subr.mxu1 %v442_v6  ;;  %823 = vmatpush3.msra.mxu0 %v393_v7 }
  0x47   : > { %856 = vmatpush3.msra.mxu1 %v426_v8  ;;  %879 = vmatprep.subr.mxu0 %v1021_v11 }
  0x48   : > { %857 = vmatprep.subr.mxu1 %v441_v9 }
  0x49   : > { %858 = vmatpush3.msra.mxu1 %v425_v10 }
  0xa3   : > { %v354_v13 = vpop.permute.xlu0 %353 }
  0xa4   : > { %v361_v14 = vmul.f32 %v354_v13, %v347_v12 }
  0xa7   : > { %v359_v15 = vpop.permute.xlu0 %358 }
  0xa8   : > { %v370_v17 = vpop.permute.xlu1 %369  ;;  %v362_v19 = vmul.f32 %v359_v15, %v348_v16 }
  0xa9   : > { %v377_v18 = vadd.f32 %v370_v17, %v361_v14 }
  0xab   : > { %v379_v20 = vrot.slane %v377_v18, 4 }
  0xac   : > { %v375_v21 = vpop.permute.xlu1 %374 }
  0xad   : > { %v380_v22 = vadd.f32 %v379_v20, %v377_v18  ;;  %v378_v23 = vadd.f32 %v375_v21, %v362_v19 }
  0xaf   : > { %v381_v24 = vrot.slane %v380_v22, 2  ;;  %v385_v25 = vrot.slane %v378_v23, 4 }
  0xb1   : > { %v382_v26 = vadd.f32 %v381_v24, %v380_v22  ;;  %v386_v27 = vadd.f32 %v385_v25, %v378_v23 }
  0xb3   : > { %v387_v28 = vrot.slane %v386_v27, 2  ;;  %v383_v30 = vrot.slane %v382_v26, 1 }
  0xb5   : > { %v388_v29 = vadd.f32 %v387_v28, %v386_v27  ;;  %v384_v33 = vadd.f32 %v383_v30, %v382_v26 }
  0xb7   : > { %v389_v31 = vrot.slane %v388_v29, 1 }
  0xb9   : > { %v390_v32 = vadd.f32 %v389_v31, %v388_v29 }
  0xbb   : > { %522 = vmatprep.mubr.f32.mxu0 %v390_v32  ;;  %v392_v35 = vsub.f32 %v384_v33, %v390_v32  ;;  %v391_v36 = vmul.f32 %v390_v32, %v384_v33 }
  0xbc   : > { %523 = vmatmul.mubr.f32.vlgmr.msra.gmra.mxu0 %v384_v33 }
  0xbd   : > { %592 = vmatprep.mubr.f32.mxu1 %v392_v35  ;;  %880 = vmatpush3.msra.mxu0 %v614_v34 }
  0xbe   : > { %593 = vmatmul.mubr.f32.vlgmr.msra.gmra.mxu1 %v391_v36  ;;  %881 = vmatprep.subr.mxu0 %v1021_v11 }
  0xbf   : > { %882 = vmatpush3.msra.mxu0 %v613_v37  ;;  %911 = vmatprep.mubr.msk.f32.mxu0 %vm1022_vm0, %v1021_v11 }
  0xc0   : > { %883 = vmatprep.subr.mxu0 %v1021_v11 }
  0xc1   : > { %884 = vmatpush3.msra.mxu0 %v612_v38 }
  0xc2   : > { %885 = vmatprep.subr.mxu0 %v1021_v11 }
  0xc3   : > { %886 = vmatpush3.msra.mxu0 %v611_v39 }
  0xc4   : > { %887 = vmatprep.subr.mxu0 %v1021_v11 }
  0xc5   : > { %888 = vmatpush3.msra.mxu0 %v610_v40 }
  0xc6   : > { %889 = vmatprep.subr.mxu0 %v1021_v11 }
  0xc7   : > { %890 = vmatpush3.msra.mxu0 %v609_v41 }
  0xc8   : > { %891 = vmatprep.subr.mxu0 %v1021_v11 }
  0xc9   : > { %892 = vmatpush3.msra.mxu0 %v608_v42 }
  0xca   : > { %893 = vmatprep.subr.mxu0 %v1021_v11 }
  0xcb   : > { %894 = vmatpush3.msra.mxu0 %v607_v43 }
  0xcc   : > { %895 = vmatprep.subr.mxu0 %v1021_v11 }
  0xcd   : > { %896 = vmatpush3.msra.mxu0 %v606_v44 }
  0xce   : > { %897 = vmatprep.subr.mxu0 %v1021_v11 }
  0xcf   : > { %898 = vmatpush3.msra.mxu0 %v605_v45 }
  0xd0   : > { %899 = vmatprep.subr.mxu0 %v1021_v11 }
  0xd1   : > { %900 = vmatpush3.msra.mxu0 %v604_v46 }
  0xd2   : > { %901 = vmatprep.subr.mxu0 %v1021_v11 }
  0xd3   : > { %902 = vmatpush3.msra.mxu0 %v603_v47 }
  0xd4   : > { %903 = vmatprep.subr.mxu0 %v1021_v11 }
  0xd5   : > { %904 = vmatpush3.msra.mxu0 %v602_v48 }
  0xd6   : > { %905 = vmatprep.subr.mxu0 %v1021_v11 }
  0xd7   : > { %906 = vmatpush3.msra.mxu0 %v601_v49 }
  0xd8   : > { %907 = vmatprep.subr.mxu0 %v1021_v11 }
  0xd9   : > { %908 = vmatpush3.msra.mxu0 %v600_v50 }
  0xda   : > { %909 = vmatprep.subr.mxu0 %v1021_v11 }
  0xdb   : > { %910 = vmatpush3.msra.mxu0 %v599_v51 }
 0x17c   : > { %v824_v52 = vpop.f32.mrf.mxu0 }
 0x17e   : > { %v825_v54 = vpop.f32.mrf.mxu0  ;;  %v859_v55 = vpop.f32.mrf.mxu1 }
 0x17f   : > { %v826_v56 = vadd.f32 %v825_v54, %v824_v52 }
 0x180   : > { %v860_v57 = vpop.f32.mrf.mxu1 }
 0x181   : > { %v525_v58 = vadd.f32 %v826_v56, %v457_v53  ;;  %v861_v59 = vadd.f32 %v860_v57, %v859_v55 }
 0x183   : > { %v595_v60 = vadd.f32 %v861_v59, %v525_v58 }
 0x185   : > { %v598_v61 = vmax.f32 %v595_v60, 0.0 }
 0x187   : > { %912 = vmatmul.mubr.f32.vlgmr.msra.gmra.mxu0 %v598_v61 }
 0x247   : > { %v682_v63 = vpop.f32.mrf.mxu0 }
 0x248   : > { %v683_v0 = vadd.f32 %v682_v63, %v615_v62 }
 0x249   : > { %v913_v1 = vpop.f32.mrf.mxu0 }
 0x24a   : > { %686 = vst [vmem:[%s346_s19] sm:$0x1] %v683_v0 }
 0x24b   : > { %971 = shalt.err (!%p968_p5)
}
 0x24c   : > { %s972_s13 = scalar_lea.hbm %s1405_s29, 16  ;;  %s976_s16 = scalar_lea.hbm %s1448_s6, 32 }
 0x24d   : > { %p973_p7 = scmp.ne.s32.totalorder %s1405_s29, %s972_s13  ;;  %p977_p12 = scmp.lt.s32.totalorder %s1405_s29, %s1448_s6 }
 0x24e   : > { %p978_p13 = scmp.lt.s32.totalorder %s976_s16, %s972_s13 }
 0x24f   : > { %p974_p10 = pnand %p973_p7, %p1101_p6 }
 0x250   : > { %p979_p0 = por %p978_p13, %p977_p12 }
 0x251   : > { %p975_p11 = pneg %p974_p10 }
 0x253   : > { %p980_p1 = pnand %p979_p0, %p975_p11 }
 0x255   : > { %983 = shalt.err (!%p980_p1)
}
 0x256   : > { %914 = dma.vmem_to_hbm [thread:$0]  (%p1101_p6), %s701_s20, 16, %s1405_s29, %s688_s14  }
 0x257 PF: > { %s712_s19 = sand.u32 1, %s1006_s21   ;;  %p917_p2 = pnand %p781_p9, %p1105_p8 }
 0x258   : > { %s713_s26 = scalar_lea.sflag [#allocation5], %s712_s19 }
 0x259   : > { %p918_p3 = pneg %p917_p2 }
 0x25b   : > { %1001 = dma.done.wait (%p918_p3), %s713_s26, 16  }
 0x25c   : > { %1003 = vsyncadd (%p918_p3), %s713_s26, 4294967280  ;;  %p16_p4 = scmp.ge.s32.totalorder %s1082_s27, 4   ;;  %s1452_s21 = smov %s1010_s22 }
 0x25d   : > { %s1453_s22 = smov %s1014_s23  ;;  %s1454_s23 = smov %s1095_s30 }
 0x25e   : > { %s1455_s24 = smov %s1082_s27  ;;  %18 = sbr.rel (!%p16_p4) target bundleno = 3 (0x3), region = 168 }
 0x263   :  { %717 = vsyncpa [#allocation5], 1 }
 0x264   :  { %719 = vsyncpa [#allocation5 + $0x1], 1 }

// kernel: re2_forward.3
= control target key start
LH: loop header
LB: loop body
LE: loop exit
PB: predicated region body
PF: predicated region fallthrough
CT: control target
= control target key end

     0   :  { %16 = vsyncpa [#allocation6], 0  ;;  %s2914_s17 = smov 0   ;;  %s2916_s18 = smov 0   ;;  %s3381_s0 = inlined_call_operand.vmem [shape: f32[2,2,8,128], index: 0, kind: input, shape index: {}]   ;;  %s3382_s1 = inlined_call_operand.vmem [shape: f32[2,2,8,1], index: 1, kind: input, shape index: {}]   ;;  %s3383_s2 = inlined_call_operand.vmem [shape: f32[2,2,1,8], index: 2, kind: input, shape index: {}]   ;;  %s3384_s3 = inlined_call_operand.vmem [shape: bf16[2,384,128], index: 3, kind: input, shape index: {}]   ;;  %s3385_s4 = inlined_call_operand.vmem [shape: f32[2,1,128], index: 4, kind: input, shape index: {}]   ;;  %s3386_s5 = inlined_call_operand.vmem [shape: bf16[2,128,128], index: 5, kind: input, shape index: {}]   ;;  %s3387_s6 = inlined_call_operand.vmem [shape: f32[2,1,128], index: 6, kind: input, shape index: {}]   ;;  %s3388_s7 = inlined_call_operand.hbm [shape: bf16[512,128], index: 7, kind: input, shape index: {}]   ;;  %s3389_s8 = inlined_call_operand.vmem [shape: f32[1,128], index: 8, kind: input, shape index: {}]   ;;  %s3390_s9 = inlined_call_operand.vmem [shape: bf16[128,128], index: 9, kind: input, shape index: {}]   ;;  %s3391_s10 = inlined_call_operand.vmem [shape: f32[1,128], index: 10, kind: input, shape index: {}]   ;;  %s3392_s11 = inlined_call_operand.vmem [shape: f32[2,2,8,128], index: 11, kind: output, shape index: {}]  }
   0x1   :  { %s2918_s19 = smov 0  }
   0x2 LB: > { %s2930_s20 = sadd.s32 4294967295, %s2846_s19   ;;  %s2933_s21 = sadd.s32 1, %s2846_s19   ;;  %s2846_s19 = sphi %s2918_s19, %s3401_s19   ;;  %s2842_s18 = sphi %s2916_s18, %s3404_s18   ;;  %s2838_s17 = sphi %s2914_s17, %s3403_s17  }
   0x3   : > { %3395 = sst [smem:[#allocation9_spill]] %s2933_s21  ;;  %s26_s22 = ssub.s32 %s2846_s19, %s2933_s21 }
   0x4   : > { %s29_s23 = sadd.s32 1, %s2842_s18  ;;  %p27_p0 = scmp.eq.s32.totalorder %s26_s22, 0 }
   0x5   : > { %p36_p1 = scmp.ne.s32.totalorder %s2842_s18, %s2838_s17  ;;  %p37_p2 = scmp.eq.s32.totalorder %s2846_s19, 0 }
   0x6   : > { %p286_p3 = scmp.eq.s32.totalorder %s2930_s20, 1  ;;  %p2242_p6 = scmp.ge.s32.totalorder %s2846_s19, 1 }
   0x7   : > { %s2943_s24 = scalar_select %p27_p0, %s2842_s18, %s29_s23  }
   0x8   : > { %p2945_p4 = por %p37_p2, %p36_p1  ;;  %p2949_p5 = por %p286_p3, %p36_p1 }
   0x9   : > { %3396 = sst [smem:[#allocation10_spill]] %s2943_s24  ;;  %p299_p7 = scmp.lt.s32.totalorder %s2846_s19, 3 }
   0xa   : > { %s3398_s26 = scalar_select %p2949_p5, 1, 0 }
   0xb   : > { %p2649_p8 = scmp.eq.s32.totalorder %s2930_s20, 0  ;;  %p2956_p9 = pnand %p2242_p6, %p299_p7 }
   0xc   : > { %s2848_s28 = smov [#allocation5]  }
   0xd   : > { %s323_s29 = sshll.u32 %s2848_s28, 4  ;;  %p2645_p10 = pneg %p2956_p9  ;;  %s324_s29 = int_to_ptr.vmem [resolvable:$true] %s323_s29 }
   0xe   : > { %s2805_s30 = scalar_lea.vmem %s324_s29, 4096  ;;  %p2813_p2 = scmp.lt.s32.totalorder %s324_s29, %s324_s29 }
   0xf   : > { %p2646_p11 = pnand %p2649_p8, %p2645_p10  ;;  %p2806_p13 = scmp.ne.s32.totalorder %s324_s29, %s2805_s30 }
  0x10   : > { %p2814_p3 = scmp.lt.s32.totalorder %s2805_s30, %s2805_s30 }
  0x11   : > { %p2796_p12 = pneg %p2646_p11 }
  0x12   : > { %p2815_p5 = por %p2814_p3, %p2813_p2 }
  0x13   : > { %p2808_p0 = pnand %p2806_p13, %p2796_p12 }
  0x15   : > { %p2809_p1 = pneg %p2808_p0 }
  0x17   : > { %p2816_p6 = pnand %p2815_p5, %p2809_p1 }
  0x19   : > { %2819 = shalt.err (!%p2816_p6)
}
  0x1a   : > { %s2849_s12 = smov 64   ;;  %s2850_s13 = smov 4  }
  0x1b   : > { %2648 = dma.hbm_to_vmem [thread:$0]  (!%p2646_p11), %s3388_s7, 4096, %s324_s29, [#allocation6], %s2849_s12, %s2849_s12, %s2850_s13  }
  0x1c   : > { %p2244_p7 = scmp.ge.s32.totalorder %s2846_s19, 2 }
  0x1e   : > { %342 = sbr.rel (%p2244_p7) target bundleno = 50 (0x32), region = 48 }
  0x23   : > { %345 = sbr.rel (!%p2945_p4) target bundleno = 40 (0x28), region = 52  ;;  %s347_s16 = sand.u32 (%p2945_p4), 1, %s2842_s18  }
  0x24   : > { %s2246_s22 = sshll.u32 (%p2945_p4), %s2846_s19, 3  ;;  %s2245_s23 = sshll.u32 (%p2945_p4), %s347_s16, 4 }
  0x25   : > { %s351_s24 = scalar_lea.vmem (%p2945_p4), %s3381_s0, %s2246_s22  ;;  %s349_s21 = scalar_lea.vmem (%p2945_p4), [#allocation2], %s2245_s23 }
  0x26   : > { %v382_v0 = vld [vmem:[%s351_s24] sm:$0xff] (%p2945_p4)  ;;  %v384_v1 = vld [vmem:[%s351_s24 + $0x10] sm:$0xff] (%p2945_p4) }
  0x27   : > { %383 = vst [vmem:[%s349_s21] sm:$0xff] (%p2945_p4), %v382_v0  ;;  %385 = vst [vmem:[%s349_s21 + $0x8] sm:$0xff] (%p2945_p4), %v384_v1 }
  0x28 PF: > { %391 = sbr.rel (!%p2945_p4) target bundleno = 45 (0x2d), region = 90  ;;  %s393_s29 = sand.u32 (%p2945_p4), 1, %s2842_s18  }
  0x29   : > { %s2248_s12 = sshll.u32 (%p2945_p4), %s2846_s19, 3  ;;  %s2247_s13 = sshll.u32 (%p2945_p4), %s393_s29, 4 }
  0x2a   : > { %s397_s16 = scalar_lea.vmem (%p2945_p4), %s3382_s1, %s2248_s12  ;;  %s395_s22 = scalar_lea.vmem (%p2945_p4), [#allocation3], %s2247_s13 }
  0x2b   : > { %v428_v2 = vld [vmem:[%s397_s16] sm:$0xff] (%p2945_p4)  ;;  %v430_v3 = vld [vmem:[%s397_s16 + $0x10] sm:$0xff] (%p2945_p4) }
  0x2c   : > { %429 = vst [vmem:[%s395_s22] sm:$0xff] (%p2945_p4), %v428_v2  ;;  %431 = vst [vmem:[%s395_s22 + $0x8] sm:$0xff] (%p2945_p4), %v430_v3 }
  0x2d PF: > { %437 = sbr.rel (!%p2945_p4) target bundleno = 50 (0x32), region = 128  ;;  %s439_s21 = sand.u32 (%p2945_p4), 1, %s2842_s18  }
  0x2e   : > { %s442_s28 = scalar_lea.vmem (%p2945_p4), %s3383_s2, %s2846_s19  ;;  %s2249_s30 = sshll.u32 (%p2945_p4), %s439_s21, 1 }
  0x2f   : > { %v459_v4 = vld [vmem:[%s442_s28] sm:$0x1] (%p2945_p4)  ;;  %v461_v5 = vld [vmem:[%s442_s28 + $0x2] sm:$0x1] (%p2945_p4)  ;;  %s441_s29 = scalar_lea.vmem (%p2945_p4), [#allocation4], %s2249_s30 }
  0x30   : > { %460 = vst [vmem:[%s441_s29] sm:$0x1] (%p2945_p4), %v459_v4  ;;  %462 = vst [vmem:[%s441_s29 + $0x1] sm:$0x1] (%p2945_p4), %v461_v5 }
  0x32 PF: > { %485 = sbr.rel (%p2956_p9) target bundleno = 1968 (0x7b0), region = 162  ;;  %s488_s25 = sand.u32 (!%p2956_p9), 1, %s2838_s17  }
  0x33   : > { %s2992_s12 = sshll.u32 (!%p2956_p9), %s488_s25, 4  ;;  %s2994_s13 = sshll.u32 (!%p2956_p9), %s488_s25, 1 }
  0x34   : > { %s490_s19 = scalar_lea.vmem (!%p2956_p9), [#allocation2], %s2992_s12  ;;  %s497_s14 = scalar_lea.vmem (!%p2956_p9), [#allocation3], %s2992_s12 }
  0x35   : > { %s504_s15 = scalar_lea.vmem (!%p2956_p9), [#allocation4], %s2994_s13 }
  0x37   : > { %2833 = dma.done.wait (%p2649_p8), [#allocation6], 4096  }
  0x38   : > { %2835 = vsyncadd (%p2649_p8), [#allocation6], 4294963200  ;;  %v2851_v6 = vmov 0   ;;  %v2852_v7 = vmov 0.0   ;;  %v555_v8 = vld [vmem:[%s497_s14] sm:$0xff]  ;;  %v556_v9 = vld [vmem:[%s497_s14 + $0x8] sm:$0xff]  ;;  %v655_v35 = vlaneseq }
  0x39   : > { %2681 = vset.pattern.permute.xlu0 %v2851_v6  ;;  %2517 = vmatprep.subr.bf16.mxu1 %v2852_v7  ;;  %v2682_v10 = vld [vmem:[%s3384_s3 + $0x78] sm:$0xff]   ;;  %v2685_v13 = vld [vmem:[%s3384_s3 + $0x70] sm:$0xff]   ;;  %v2688_v16 = vld [vmem:[%s3384_s3 + $0x68] sm:$0xff]   ;;  %vm2853_vm0 = vmmov 0   ;;  %vm1528_vm3 = vcmask 1043456   ;;  %vm1501_vm4 = vcmask 64512  }
  0x3a   : > { %665 = vperm.xlu0 %2681, %v555_v8   ;;  %v2683_v11 = vld [vmem:[%s3384_s3 + $0x38] sm:$0xff]   ;;  %2376 = vmatprep.subr.bf16.mxu0 %v2682_v10  ;;  %v2686_v14 = vld [vmem:[%s3384_s3 + $0x30] sm:$0xff]   ;;  %v2689_v17 = vld [vmem:[%s3384_s3 + $0x28] sm:$0xff]   ;;  %v656_v37 = vshrl.u32 %v655_v35, 7  ;;  %s551_s17 = scalar_lea.vmem [#allocation7], %s2992_s12  ;;  %p3400_p4 = scmp.ne.s32.totalorder %s3398_s26, 0 }
  0x3b   : > { %v2684_v12 = vld [vmem:[%s3384_s3 + $0xb8] sm:$0xff]   ;;  %2377 = vmatpush3.bf16.msra.mxu0 %v2683_v11  ;;  %v2687_v15 = vld [vmem:[%s3384_s3 + $0xb0] sm:$0xff]   ;;  %2533 = vmatprep.mubr.msk.bf16.mxu1 %vm2853_vm0, %v2852_v7  ;;  %v2690_v18 = vld [vmem:[%s3384_s3 + $0xa8] sm:$0xff]   ;;  %s2373_s27 = sshll.u32 (%p3400_p4), %s2930_s20, 3 }
  0x3c   : > { %2518 = vmatpush3.bf16.msra.mxu1 %v2684_v12  ;;  %2378 = vmatprep.subr.bf16.mxu0 %v2685_v13  ;;  %v2691_v19 = vld [vmem:[%s3384_s3 + $0x60] sm:$0xff]   ;;  %v2694_v22 = vld [vmem:[%s3384_s3 + $0x58] sm:$0xff]   ;;  %v2697_v25 = vld [vmem:[%s3384_s3 + $0x50] sm:$0xff]   ;;  %vm657_vm1 = vcmp.ne.s32.totalorder %v656_v37, 0  ;;  %vm660_vm2 = vcmp.ne.s32.totalorder %v656_v37, 7  ;;  %s2099_s22 = scalar_lea.vmem (%p3400_p4), %s3392_s11, %s2373_s27 }
  0x3d   : > { %2519 = vmatprep.subr.bf16.mxu1 %v2852_v7  ;;  %v2692_v20 = vld [vmem:[%s3384_s3 + $0x20] sm:$0xff]   ;;  %v2695_v23 = vld [vmem:[%s3384_s3 + $0x18] sm:$0xff]   ;;  %v2698_v26 = vld [vmem:[%s3384_s3 + $0x10] sm:$0xff]   ;;  %v3106_v45 = vsel %vm657_vm1, 1.0, %v2852_v7  ;;  %v3109_v46 = vsel %vm660_vm2, 1.0, %v2852_v7 }
  0x3e   : > { %670 = vperm.xlu0 %2681, %v556_v9   ;;  %v2693_v21 = vld [vmem:[%s3384_s3 + $0xa0] sm:$0xff]   ;;  %v2696_v24 = vld [vmem:[%s3384_s3 + $0x98] sm:$0xff]   ;;  %v2699_v27 = vld [vmem:[%s3384_s3 + $0x90] sm:$0xff]  }
  0x3f   : > { %2379 = vmatpush3.bf16.msra.mxu0 %v2686_v14  ;;  %v2700_v28 = vld [vmem:[%s3384_s3 + $0x48] sm:$0xff]   ;;  %v2703_v31 = vld [vmem:[%s3384_s3 + $0x40] sm:$0xff]   ;;  %v2706_v34 = vld [vmem:[%s3384_s3 + $0x138] sm:$0xff]  }
  0x40   : > { %2520 = vmatpush3.bf16.msra.mxu1 %v2687_v15  ;;  %2380 = vmatprep.subr.bf16.mxu0 %v2688_v16  ;;  %v2701_v29 = vld [vmem:[%s3384_s3 + $0x8] sm:$0xff]   ;;  %v2704_v32 = vld [vmem:[%s3384_s3] sm:$0xff]   ;;  %v2707_v54 = vld [vmem:[%s3384_s3 + $0xf8] sm:$0xff]  }
  0x41   : > { %2521 = vmatprep.subr.bf16.mxu1 %v2852_v7  ;;  %v2702_v30 = vld [vmem:[%s3384_s3 + $0x88] sm:$0xff]   ;;  %v2705_v33 = vld [vmem:[%s3384_s3 + $0x80] sm:$0xff]   ;;  %v2708_v55 = vld [vmem:[%s3384_s3 + $0x178] sm:$0xff]  }
  0x42   : > { %v3091_v36 = vld [vmem:[%s490_s19] sm:$0xff]  ;;  %v3099_v40 = vld [vmem:[%s490_s19 + $0x8] sm:$0xff] }
  0x43   : > { %2381 = vmatpush3.bf16.msra.mxu0 %v2689_v17  ;;  %v2709_v58 = vld [vmem:[%s3384_s3 + $0x130] sm:$0xff]   ;;  %v2712_v61 = vld [vmem:[%s3384_s3 + $0x128] sm:$0xff]   ;;  %v2715_v0 = vld [vmem:[%s3384_s3 + $0x120] sm:$0xff]  }
  0x44   : > { %2522 = vmatpush3.bf16.msra.mxu1 %v2690_v18  ;;  %2382 = vmatprep.subr.bf16.mxu0 %v2691_v19  ;;  %v2710_v59 = vld [vmem:[%s3384_s3 + $0xf0] sm:$0xff]   ;;  %v2713_v62 = vld [vmem:[%s3384_s3 + $0xe8] sm:$0xff]   ;;  %v2716_v1 = vld [vmem:[%s3384_s3 + $0xe0] sm:$0xff]  }
  0x45   : > { %2523 = vmatprep.subr.bf16.mxu1 %v2852_v7  ;;  %v2711_v60 = vld [vmem:[%s3384_s3 + $0x170] sm:$0xff]   ;;  %v2714_v63 = vld [vmem:[%s3384_s3 + $0x168] sm:$0xff]   ;;  %v2717_v2 = vld [vmem:[%s3384_s3 + $0x160] sm:$0xff]  }
  0x46   : > { %v2718_v3 = vld [vmem:[%s3384_s3 + $0x118] sm:$0xff]   ;;  %v2721_v6 = vld [vmem:[%s3384_s3 + $0x110] sm:$0xff]   ;;  %v2724_v10 = vld [vmem:[%s3384_s3 + $0x108] sm:$0xff]  }
  0x47   : > { %2383 = vmatpush3.bf16.msra.mxu0 %v2692_v20  ;;  %v2719_v4 = vld [vmem:[%s3384_s3 + $0xd8] sm:$0xff]   ;;  %v2722_v8 = vld [vmem:[%s3384_s3 + $0xd0] sm:$0xff]   ;;  %v2725_v11 = vld [vmem:[%s3384_s3 + $0xc8] sm:$0xff]  }
  0x48   : > { %2524 = vmatpush3.bf16.msra.mxu1 %v2693_v21  ;;  %2384 = vmatprep.subr.bf16.mxu0 %v2694_v22  ;;  %v2720_v5 = vld [vmem:[%s3384_s3 + $0x158] sm:$0xff]   ;;  %v2723_v9 = vld [vmem:[%s3384_s3 + $0x150] sm:$0xff]   ;;  %v2726_v12 = vld [vmem:[%s3384_s3 + $0x148] sm:$0xff]  }
  0x49   : > { %2525 = vmatprep.subr.bf16.mxu1 %v2852_v7  ;;  %v2727_v13 = vld [vmem:[%s3384_s3 + $0x100] sm:$0xff]  }
  0x4a   : > { %v2728_v14 = vld [vmem:[%s3384_s3 + $0xc0] sm:$0xff]  }
  0x4b   : > { %2385 = vmatpush3.bf16.msra.mxu0 %v2695_v23  ;;  %v2729_v15 = vld [vmem:[%s3384_s3 + $0x140] sm:$0xff]  }
  0x4c   : > { %2526 = vmatpush3.bf16.msra.mxu1 %v2696_v24  ;;  %2386 = vmatprep.subr.bf16.mxu0 %v2697_v25  ;;  %v2258_v18 = vld [vmem:[%s3385_s4] ss:$0 sm:$0xff] }
  0x4d   : > { %2527 = vmatprep.subr.bf16.mxu1 %v2852_v7 }
  0x4f   : > { %2387 = vmatpush3.bf16.msra.mxu0 %v2698_v26 }
  0x50   : > { %2528 = vmatpush3.bf16.msra.mxu1 %v2699_v27  ;;  %2388 = vmatprep.subr.bf16.mxu0 %v2700_v28 }
  0x51   : > { %2529 = vmatprep.subr.bf16.mxu1 %v2852_v7 }
  0x53   : > { %2389 = vmatpush3.bf16.msra.mxu0 %v2701_v29 }
  0x54   : > { %2530 = vmatpush3.bf16.msra.mxu1 %v2702_v30  ;;  %2390 = vmatprep.subr.bf16.mxu0 %v2703_v31 }
  0x55   : > { %2531 = vmatprep.subr.bf16.mxu1 %v2852_v7 }
  0x57   : > { %2391 = vmatpush3.bf16.msra.mxu0 %v2704_v32 }
  0x58   : > { %2532 = vmatpush3.bf16.msra.mxu1 %v2705_v33  ;;  %2407 = vmatprep.subr.bf16.mxu0 %v2706_v34 }
  0x59   : > { %2537 = vmatprep.subr.bf16.mxu1 %v2852_v7 }
  0xb5   : > { %v3093_v38 = vpop.permute.xlu0 %665 }
  0xb6   : > { %v673_v39 = vmul.f32 %v3093_v38, %v3091_v36 }
  0xb8   : > { %v675_v43 = vrot.slane %v673_v39, 7  ;;  %v679_v44 = vrot.slane %v673_v39, 1 }
  0xb9   : > { %v3101_v41 = vpop.permute.xlu0 %670 }
  0xba   : > { %v674_v42 = vmul.f32 %v3101_v41, %v3099_v40  ;;  %v677_v50 = vmul.f32 %v3106_v45, %v675_v43  ;;  %v681_v52 = vmul.f32 %v3109_v46, %v679_v44 }
  0xbc   : > { %v684_v47 = vpack.c.bf16 %v674_v42, %v673_v39  ;;  %v676_v48 = vrot.slane %v674_v42, 7  ;;  %v680_v49 = vrot.slane %v674_v42, 1 }
  0xbe   : > { %868 = vmatprep.mubr.bf16.mxu0 %v684_v47  ;;  %v678_v51 = vmul.f32 %v3106_v45, %v676_v48  ;;  %v682_v53 = vmul.f32 %v3109_v46, %v680_v49 }
  0xc0   : > { %v683_v56 = vpack.c.bf16 %v678_v51, %v677_v50  ;;  %v685_v57 = vpack.c.bf16 %v682_v53, %v681_v52  ;;  %v2730_v50 = vld [vmem:[%s3386_s5 + $0x38] sm:$0xff]  }
  0xc1   : > { %v2732_v51 = vld [vmem:[%s3386_s5 + $0x78] sm:$0xff]  }
  0xc2   : > { %869 = vmatmul.mubr.bf16.vlgmr.msra.gmra.mxu0 %v683_v56  ;;  %2534 = vmatmul.mubr.bf16.vlgmr.msra.gmra.mxu1 %v685_v57  ;;  %v2735_v56 = vld [vmem:[%s3386_s5 + $0x20] sm:$0xff]   ;;  %v2737_v57 = vld [vmem:[%s3386_s5 + $0x18] sm:$0xff]  }
  0xc3   : > { %2408 = vmatpush3.bf16.msra.mxu0 %v2707_v54  ;;  %2538 = vmatpush3.bf16.msra.mxu1 %v2708_v55  ;;  %v2733_v54 = vld [vmem:[%s3386_s5 + $0x28] sm:$0xff]  }
  0xc4   : > { %2409 = vmatprep.subr.bf16.mxu0 %v2709_v58  ;;  %2539 = vmatprep.subr.bf16.mxu1 %v2852_v7  ;;  %v2736_v55 = vld [vmem:[%s3386_s5 + $0x68] sm:$0xff]   ;;  %v2738_v58 = vld [vmem:[%s3386_s5 + $0x60] sm:$0xff]  }
  0xc5   : > { %2553 = vmatprep.mubr.msk.bf16.mxu1 %vm2853_vm0, %v2852_v7 }
  0xc7   : > { %2410 = vmatpush3.bf16.msra.mxu0 %v2710_v59  ;;  %2540 = vmatpush3.bf16.msra.mxu1 %v2711_v60  ;;  %v2739_v59 = vld [vmem:[%s3386_s5 + $0x10] sm:$0xff]   ;;  %v2740_v60 = vld [vmem:[%s3386_s5 + $0x58] sm:$0xff]  }
  0xc8   : > { %2411 = vmatprep.subr.bf16.mxu0 %v2712_v61  ;;  %2541 = vmatprep.subr.bf16.mxu1 %v2852_v7  ;;  %v2741_v61 = vld [vmem:[%s3386_s5 + $0x8] sm:$0xff]  }
  0xcb   : > { %2412 = vmatpush3.bf16.msra.mxu0 %v2713_v62  ;;  %2542 = vmatpush3.bf16.msra.mxu1 %v2714_v63  ;;  %v2742_v62 = vld [vmem:[%s3386_s5 + $0x50] sm:$0xff]   ;;  %v2743_v63 = vld [vmem:[%s3386_s5] sm:$0xff]  }
  0xcc   : > { %2543 = vmatprep.subr.bf16.mxu1 %v2852_v7  ;;  %2413 = vmatprep.subr.bf16.mxu0 %v2715_v0  ;;  %v2744_v0 = vld [vmem:[%s3386_s5 + $0x48] sm:$0xff]  }
  0xcf   : > { %2414 = vmatpush3.bf16.msra.mxu0 %v2716_v1  ;;  %2544 = vmatpush3.bf16.msra.mxu1 %v2717_v2  ;;  %v2745_v1 = vld [vmem:[%s3386_s5 + $0x40] sm:$0xff]  }
  0xd0   : > { %2545 = vmatprep.subr.bf16.mxu1 %v2852_v7  ;;  %2415 = vmatprep.subr.bf16.mxu0 %v2718_v3 }
  0xd3   : > { %2416 = vmatpush3.bf16.msra.mxu0 %v2719_v4  ;;  %2546 = vmatpush3.bf16.msra.mxu1 %v2720_v5  ;;  %v2283_v4 = vld [vmem:[%s3385_s4 + $0x1] ss:$0 sm:$0xff] }
  0xd4   : > { %2547 = vmatprep.subr.bf16.mxu1 %v2852_v7  ;;  %2417 = vmatprep.subr.bf16.mxu0 %v2721_v6 }
  0xd7   : > { %2418 = vmatpush3.bf16.msra.mxu0 %v2722_v8  ;;  %2548 = vmatpush3.bf16.msra.mxu1 %v2723_v9 }
  0xd8   : > { %2549 = vmatprep.subr.bf16.mxu1 %v2852_v7  ;;  %2419 = vmatprep.subr.bf16.mxu0 %v2724_v10 }
  0xdb   : > { %2420 = vmatpush3.bf16.msra.mxu0 %v2725_v11  ;;  %2550 = vmatpush3.bf16.msra.mxu1 %v2726_v12 }
  0xdc   : > { %2421 = vmatprep.subr.bf16.mxu0 %v2727_v13  ;;  %2551 = vmatprep.subr.bf16.mxu1 %v2852_v7 }
  0xdf   : > { %2422 = vmatpush3.bf16.msra.mxu0 %v2728_v14  ;;  %2552 = vmatpush3.bf16.msra.mxu1 %v2729_v15 }
  0xe0   : > { %2557 = vmatprep.subr.bf16.mxu0 %v2852_v7  ;;  %2577 = vmatprep.subr.bf16.mxu1 %v2852_v7 }
 0x182   : > { %v2392_v16 = vpop.f32.mrf.mxu0  ;;  %v911_v17 = vpop.f32.mrf.mxu1 }
 0x184   : > { %v2393_v19 = vpop.f32.mrf.mxu0  ;;  %v2535_v20 = vpop.f32.mrf.mxu1 }
 0x185   : > { %v2394_v21 = vadd.f32 %v2393_v19, %v2392_v16 }
 0x186   : > { %v2395_v22 = vpop.f32.mrf.mxu0  ;;  %v914_v23 = vpop.f32.mrf.mxu1 }
 0x187   : > { %v871_v24 = vadd.f32 %v2394_v21, %v2258_v18 }
 0x188   : > { %v2396_v25 = vpop.f32.mrf.mxu0  ;;  %v2536_v26 = vpop.f32.mrf.mxu1 }
 0x189   : > { %v912_v27 = vadd.f32 %v911_v17, %v871_v24  ;;  %v2397_v28 = vadd.f32 %v2396_v25, %v2395_v22  ;;  %v2317_v26 = vld [vmem:[%s3387_s6 + $0x1] ss:$0 sm:$0xff] }
 0x18b   : > { %v918_v29 = vmax.f32 %v912_v27, 0.0  ;;  %v874_v30 = vadd.f32 %v2397_v28, %v2258_v18  ;;  %v2308_v28 = vld [vmem:[%s3387_s6] ss:$0 sm:$0xff] }
 0x18d   : > { %v920_v31 = vmul.f32 %v918_v29, %v3093_v38  ;;  %v915_v32 = vadd.f32 %v914_v23, %v874_v30 }
 0x18f   : > { %v919_v33 = vmax.f32 %v915_v32, 0.0  ;;  %v922_v35 = vrot.slane %v920_v31, 7  ;;  %v926_v37 = vrot.slane %v920_v31, 1 }
 0x191   : > { %v921_v34 = vmul.f32 %v919_v33, %v3101_v41  ;;  %v924_v44 = vmul.f32 %v3106_v45, %v922_v35  ;;  %v928_v48 = vmul.f32 %v3109_v46, %v926_v37 }
 0x193   : > { %v931_v39 = vpack.c.bf16 %v921_v34, %v920_v31  ;;  %v923_v42 = vrot.slane %v921_v34, 7  ;;  %v927_v43 = vrot.slane %v921_v34, 1 }
 0x195   : > { %1115 = vmatprep.mubr.bf16.mxu0 %v931_v39  ;;  %v925_v47 = vmul.f32 %v3106_v45, %v923_v42  ;;  %v929_v49 = vmul.f32 %v3109_v46, %v927_v43  ;;  %v2731_v45 = vld [vmem:[%s3386_s5 + $0x30] sm:$0xff]  }
 0x196   : > { %v2734_v46 = vld [vmem:[%s3386_s5 + $0x70] sm:$0xff]  }
 0x197   : > { %v930_v52 = vpack.c.bf16 %v925_v47, %v924_v44  ;;  %v932_v53 = vpack.c.bf16 %v929_v49, %v928_v48  ;;  %v2327_v44 = vld [vmem:[%s504_s15] ss:$0 sm:$0xff]  ;;  %v2326_v47 = vld [vmem:[%s504_s15 + $0x1] ss:$0 sm:$0xff] }
 0x198   : > { %v1412_v49 = vmul.f32 %v2327_v44, %v3101_v41  ;;  %v2767_v44 = vld [vmem:[#allocation5 + $0x10] sm:$0xff]  }
 0x199   : > { %1116 = vmatmul.mubr.bf16.vlgmr.msra.gmra.mxu0 %v930_v52  ;;  %2554 = vmatmul.mubr.bf16.vlgmr.msra.gmra.mxu1 %v932_v53 }
 0x19a   : > { %2558 = vmatpush3.bf16.msra.mxu0 %v2730_v50  ;;  %2578 = vmatpush3.bf16.msra.mxu1 %v2732_v51  ;;  %v1405_v51 = vmul.f32 %v2326_v47, %v3093_v38  ;;  %v1498_v53 = vsub.f32 1.0, %v1412_v49  ;;  %v2768_v47 = vld [vmem:[#allocation5 + $0xd0] sm:$0xff]  }
 0x19b   : > { %2559 = vmatprep.subr.bf16.mxu0 %v2852_v7  ;;  %2579 = vmatprep.subr.bf16.mxu1 %v2852_v7 }
 0x19c   : > { %2573 = vmatprep.mubr.msk.bf16.mxu0 %vm2853_vm0, %v2852_v7  ;;  %2593 = vmatprep.mubr.msk.bf16.mxu1 %vm2853_vm0, %v2852_v7 }
 0x19e   : > { %2560 = vmatpush3.bf16.msra.mxu0 %v2731_v45  ;;  %2580 = vmatpush3.bf16.msra.mxu1 %v2734_v46  ;;  %v1494_v46 = vsub.f32 1.0, %v1405_v51 }
 0x19f   : > { %2561 = vmatprep.subr.bf16.mxu0 %v2852_v7  ;;  %2581 = vmatprep.subr.bf16.mxu1 %v2852_v7 }
 0x1a2   : > { %2562 = vmatpush3.bf16.msra.mxu0 %v2733_v54  ;;  %2582 = vmatpush3.bf16.msra.mxu1 %v2736_v55 }
 0x1a3   : > { %2563 = vmatprep.subr.bf16.mxu0 %v2852_v7  ;;  %2583 = vmatprep.subr.bf16.mxu1 %v2852_v7 }
 0x1a6   : > { %2564 = vmatpush3.bf16.msra.mxu0 %v2735_v56  ;;  %2584 = vmatpush3.bf16.msra.mxu1 %v2738_v58 }
 0x1a7   : > { %2565 = vmatprep.subr.bf16.mxu0 %v2852_v7  ;;  %2585 = vmatprep.subr.bf16.mxu1 %v2852_v7 }
 0x1aa   : > { %2566 = vmatpush3.bf16.msra.mxu0 %v2737_v57  ;;  %2586 = vmatpush3.bf16.msra.mxu1 %v2740_v60  ;;  %v1499_v57 = vmul.f32 -1e+09, %v1498_v53  ;;  %v1495_v60 = vmul.f32 -1e+09, %v1494_v46  ;;  %v2774_v53 = vld [vmem:[#allocation5 + $0x40] sm:$0xff]  }
 0x1ab   : > { %2567 = vmatprep.subr.bf16.mxu0 %v2852_v7  ;;  %2587 = vmatprep.subr.bf16.mxu1 %v2852_v7  ;;  %v2776_v46 = vld [vmem:[#allocation5 + $0xc0] sm:$0xff]  }
 0x1ae   : > { %2568 = vmatpush3.bf16.msra.mxu0 %v2739_v59  ;;  %2588 = vmatpush3.bf16.msra.mxu1 %v2742_v62 }
 0x1af   : > { %2569 = vmatprep.subr.bf16.mxu0 %v2852_v7  ;;  %2589 = vmatprep.subr.bf16.mxu1 %v2852_v7 }
 0x1b2   : > { %2570 = vmatpush3.bf16.msra.mxu0 %v2741_v61  ;;  %2590 = vmatpush3.bf16.msra.mxu1 %v2744_v0 }
 0x1b3   : > { %2571 = vmatprep.subr.bf16.mxu0 %v2852_v7  ;;  %2591 = vmatprep.subr.bf16.mxu1 %v2852_v7 }
 0x1b6   : > { %2572 = vmatpush3.bf16.msra.mxu0 %v2743_v63  ;;  %2592 = vmatpush3.bf16.msra.mxu1 %v2745_v1 }
 0x1b7   : > { %2597 = vmatprep.subr.bf16.mxu1 %v2852_v7 }
 0x259   : > { %v2423_v2 = vpop.f32.mrf.mxu0  ;;  %v1158_v3 = vpop.f32.mrf.mxu1 }
 0x25b   : > { %v2424_v5 = vpop.f32.mrf.mxu0  ;;  %v2555_v6 = vpop.f32.mrf.mxu1 }
 0x25c   : > { %v2425_v8 = vadd.f32 %v2424_v5, %v2423_v2 }
 0x25d   : > { %v2426_v9 = vpop.f32.mrf.mxu0  ;;  %v1161_v10 = vpop.f32.mrf.mxu1 }
 0x25e   : > { %v1118_v11 = vadd.f32 %v2425_v8, %v2283_v4 }
 0x25f   : > { %v2427_v12 = vpop.f32.mrf.mxu0  ;;  %v2556_v13 = vpop.f32.mrf.mxu1 }
 0x260   : > { %v1159_v14 = vadd.f32 %v1158_v3, %v1118_v11  ;;  %v2428_v15 = vadd.f32 %v2427_v12, %v2426_v9  ;;  %v2746_v11 = vld [vmem:[#allocation5 + $0x78] sm:$0xff]   ;;  %v2750_v13 = vld [vmem:[#allocation5 + $0x70] sm:$0xff]  }
 0x261   : > { %v2747_v12 = vld [vmem:[#allocation5 + $0x38] sm:$0xff]   ;;  %2464 = vmatprep.subr.bf16.mxu0 %v2746_v11 }
 0x262   : > { %v1165_v16 = vmax.f32 %v1159_v14, 0.0  ;;  %v1121_v17 = vadd.f32 %v2428_v15, %v2283_v4  ;;  %v2751_v14 = vld [vmem:[#allocation5 + $0x30] sm:$0xff]   ;;  %v2754_v15 = vld [vmem:[#allocation5 + $0x68] sm:$0xff]   ;;  %v2785_v11 = vld [vmem:[%s3390_s9] sm:$0xff]  }
 0x264   : > { %v3275_v18 = vadd.f32 %v1165_v16, %v3091_v36  ;;  %v1162_v19 = vadd.f32 %v1161_v10, %v1121_v17  ;;  %v2755_v16 = vld [vmem:[#allocation5 + $0x28] sm:$0xff]   ;;  %v2758_v17 = vld [vmem:[#allocation5 + $0x60] sm:$0xff]  }
 0x266   : > { %v1166_v20 = vmax.f32 %v1162_v19, 0.0  ;;  %v1203_v21 = vpack.c.bf16 %v3275_v18, %v3275_v18  ;;  %v2759_v19 = vld [vmem:[#allocation5 + $0x20] sm:$0xff]  }
 0x268   : > { %v3280_v22 = vadd.f32 %v1166_v20, %v3099_v40  ;;  %2574 = vmatmul.mubr.bf16.vlgmr.msra.gmra.mxu0 %v1203_v21  ;;  %v1530_v43 = vsel %vm1528_vm3, %v1203_v21, 0  ;;  %v2762_v20 = vld [vmem:[#allocation5 + $0x58] sm:$0xff]  }
 0x269   : > { %2465 = vmatpush3.bf16.msra.mxu0 %v2747_v12  ;;  %v2763_v21 = vld [vmem:[#allocation5 + $0x18] sm:$0xff]  }
 0x26a   : > { %v1204_v23 = vpack.c.bf16 %v3280_v22, %v3280_v22  ;;  %2466 = vmatprep.subr.bf16.mxu0 %v2750_v13  ;;  %v2330_v13 = vld [vmem:[%s3389_s8] ss:$0 sm:$0xff] }
 0x26c   : > { %2594 = vmatmul.mubr.bf16.vlgmr.msra.gmra.mxu1 %v1204_v23  ;;  %v3285_v24 = vsel %vm1528_vm3, %v1204_v23, 0 }
 0x26d   : > { %2599 = vmatprep.mubr.msk.bf16.mxu1 %vm2853_vm0, %v2852_v7  ;;  %2467 = vmatpush3.bf16.msra.mxu0 %v2751_v14 }
 0x26e   : > { %2468 = vmatprep.subr.bf16.mxu0 %v2754_v15 }
 0x271   : > { %2469 = vmatpush3.bf16.msra.mxu0 %v2755_v16 }
 0x272   : > { %2470 = vmatprep.subr.bf16.mxu0 %v2758_v17 }
 0x275   : > { %2471 = vmatpush3.bf16.msra.mxu0 %v2759_v19 }
 0x276   : > { %2472 = vmatprep.subr.bf16.mxu0 %v2762_v20 }
 0x279   : > { %2473 = vmatpush3.bf16.msra.mxu0 %v2763_v21 }
 0x328   : > { %v1293_v36 = vpop.f32.mrf.mxu0 }
 0x329   : > { %v1294_v33 = vadd.f32 %v2308_v28, %v1293_v36 }
 0x32a   : > { %v2575_v25 = vpop.f32.mrf.mxu0 }
 0x32b   : > { %v1299_v39 = vmax.f32 %v1294_v33, 0.0  ;;  %v2753_v33 = vld [vmem:[#allocation5 + $0xb0] sm:$0xff]  }
 0x32c   : > { %v1296_v40 = vpop.f32.mrf.mxu0  ;;  %v1388_v27 = vpop.f32.mrf.mxu1 }
 0x32d   : > { %v1389_v29 = vadd.f32 %v2317_v26, %v1388_v27  ;;  %v1395_v42 = vpack.c.bf16 %v1299_v39, %v1299_v39  ;;  %v2748_v27 = vld [vmem:[#allocation5 + $0xf8] sm:$0xff]  }
 0x32e   : > { %v2576_v30 = vpop.f32.mrf.mxu0  ;;  %v2595_v31 = vpop.f32.mrf.mxu1  ;;  %v2764_v39 = vld [vmem:[#allocation5 + $0xd8] sm:$0xff]  }
 0x32f   : > { %v1394_v32 = vmax.f32 %v1389_v29, 0.0  ;;  %v2749_v30 = vld [vmem:[#allocation5 + $0xb8] sm:$0xff]  }
 0x330   : > { %v1391_v34 = vpop.f32.mrf.mxu1 }
 0x331   : > { %v1396_v35 = vpack.c.bf16 %v1394_v32, %v1394_v32  ;;  %v2752_v32 = vld [vmem:[#allocation5 + $0xf0] sm:$0xff]   ;;  %v2756_v34 = vld [vmem:[#allocation5 + $0xe8] sm:$0xff]  }
 0x332   : > { %v2596_v37 = vpop.f32.mrf.mxu1 }
 0x333   : > { %2598 = vmatpush3.bf16.xpose.msra.mxu1 %v1396_v35  ;;  %v2760_v37 = vld [vmem:[#allocation5 + $0xe0] sm:$0xff]  }
 0x334   : > { %2603 = vmatprep.subr.bf16.mxu1 %v2852_v7 }
 0x33a   : > { %2600 = vmatmul.mubr.bf16.vlgmr.msra.gmra.mxu1 %v1395_v42 }
 0x33b   : > { %2604 = vmatpush3.bf16.xpose.msra.mxu1 %v1395_v42  ;;  %2605 = vmatprep.mubr.msk.bf16.mxu1 %vm2853_vm0, %v2852_v7  ;;  %v2765_v42 = vld [vmem:[#allocation5 + $0x98] sm:$0xff]  }
 0x33c   : > { %2609 = vmatprep.subr.bf16.mxu1 %v2852_v7 }
 0x342   : > { %2606 = vmatmul.mubr.bf16.vlgmr.msra.gmra.mxu1 %v1396_v35  ;;  %v2757_v35 = vld [vmem:[#allocation5 + $0xa8] sm:$0xff]  }
 0x343   : > { %2610 = vmatpush3.bf16.msra.mxu1 %v1530_v43  ;;  %2611 = vmatprep.mubr.msk.bf16.mxu1 %vm2853_vm0, %v2852_v7  ;;  %v2766_v43 = vld [vmem:[#allocation5 + $0x50] sm:$0xff]  }
 0x344   : > { %2615 = vmatprep.subr.bf16.mxu1 %v2852_v7  ;;  %2474 = vmatprep.subr.bf16.mxu0 %v2766_v43 }
 0x345   : > { %2475 = vmatpush3.bf16.msra.mxu0 %v2767_v44 }
 0x3fa   : > { %v1447_v48 = vpop.f32.mrf.mxu1 }
 0x3fb   : > { %v1493_v55 = vmul.f32 %v1447_v48, %v1405_v51  ;;  %v2769_v48 = vld [vmem:[#allocation5 + $0x90] sm:$0xff]   ;;  %v2772_v51 = vld [vmem:[#allocation5 + $0xc8] sm:$0xff]  }
 0x3fc   : > { %v2601_v50 = vpop.f32.mrf.mxu1 }
 0x3fd   : > { %v1496_v63 = vadd.f32 %v1495_v60, %v1493_v55  ;;  %v2771_v50 = vld [vmem:[#allocation5 + $0x8] sm:$0xff]  }
 0x3fe   : > { %v1450_v52 = vpop.f32.mrf.mxu1 }
 0x3ff   : > { %v1502_v38 = vsel %vm1501_vm4, %v1496_v63, -inf  ;;  %v2773_v52 = vld [vmem:[#allocation5 + $0x88] sm:$0xff]  }
 0x400   : > { %v2602_v45 = vpop.f32.mrf.mxu1 }
 0x401   : > { %v2775_v45 = vld [vmem:[#allocation5] sm:$0xff]  }
 0x402   : > { %v1487_v54 = vpop.f32.mrf.mxu1 }
 0x403   : > { %v1497_v56 = vmul.f32 %v1487_v54, %v1412_v49  ;;  %v2770_v49 = vld [vmem:[#allocation5 + $0x48] sm:$0xff]   ;;  %v2777_v54 = vld [vmem:[#allocation5 + $0x80] sm:$0xff]  }
 0x404   : > { %v2607_v58 = vpop.f32.mrf.mxu1  ;;  %2476 = vmatprep.subr.bf16.mxu0 %v2770_v49 }
 0x405   : > { %v1500_v59 = vadd.f32 %v1499_v57, %v1497_v56  ;;  %2477 = vmatpush3.bf16.msra.mxu0 %v2771_v50 }
 0x406   : > { %v1490_v61 = vpop.f32.mrf.mxu1  ;;  %2478 = vmatprep.subr.bf16.mxu0 %v2774_v53 }
 0x407   : > { %v1513_v62 = vsel %vm1501_vm4, %v1500_v59, -inf }
 0x408   : > { %1514 = vmax.xlane.f32.xlu1 %v1513_v62  ;;  %v2608_v41 = vpop.f32.mrf.mxu1 }
 0x409   : > { %2479 = vmatpush3.bf16.msra.mxu0 %v2775_v45 }
 0x40a   : > { %2621 = vmatprep.subr.bf16.mxu0 %v2852_v7 }
 0x40c   : > { %1503 = vmax.xlane.f32.xlu1 %v1502_v38  ;;  %v2778_v38 = vld [vmem:[%s3390_s9 + $0x38] sm:$0xff]  }
 0x491   : > { %v1515_v0 = vpop.xlane.xlu1 %1514 }
 0x492   : > { %v1516_v1 = vsub.f32 %v1500_v59, %v1515_v0 }
 0x494   : > { %v1517_v2 = vmul.f32 1.442695, %v1516_v1  ;;  %v1623_v1 = vpack.c.bf16 %v3280_v22, %v3275_v18 }
 0x495   : > { %v1504_v3 = vpop.xlane.xlu1 %1503 }
 0x496   : > { %2786 = vpow2.f32 %v1517_v2  ;;  %v1505_v4 = vsub.f32 %v1496_v63, %v1504_v3 }
 0x498   : > { %v1506_v5 = vmul.f32 1.442695, %v1505_v4 }
 0x49a   : > { %2788 = vpow2.f32 %v1506_v5  ;;  %v2779_v5 = vld [vmem:[%s3390_s9 + $0x30] sm:$0xff]  }
 0x4a3   : > { %v2787_v6 = vpop.eup %2786 }
 0x4a4   : > { %v1519_v8 = vsel %vm1501_vm4, %v2787_v6, 0.0 }
 0x4a5   : > { %1520 = vadd.xlane.f32.xlu0 %v1519_v8  ;;  %v2782_v8 = vld [vmem:[%s3390_s9 + $0x18] sm:$0xff]  }
 0x4a7   : > { %v2789_v9 = vpop.eup %2788 }
 0x4a8   : > { %v1508_v10 = vsel %vm1501_vm4, %v2789_v9, 0.0 }
 0x4a9   : > { %1509 = vadd.xlane.f32.xlu1 %v1508_v10  ;;  %v2784_v10 = vld [vmem:[%s3390_s9 + $0x8] sm:$0xff]  }
 0x52e   : > { %v1521_v23 = vpop.xlane.xlu0 %1520 }
 0x52f   : > { %2790 = vrcp.f32 %v1521_v23 }
 0x532   : > { %v1510_v36 = vpop.xlane.xlu1 %1509 }
 0x533   : > { %2792 = vrcp.f32 %v1510_v36 }
 0x53c   : > { %v2791_v25 = vpop.eup %2790 }
 0x53d   : > { %v1523_v26 = vmul.f32 %v2791_v25, %v2787_v6 }
 0x53f   : > { %v1524_v40 = vpack.c.bf16 %v1523_v26, %v1523_v26 }
 0x540   : > { %v2793_v28 = vpop.eup %2792 }
 0x541   : > { %2612 = vmatmul.mubr.msk.bf16.vlgmr.msra.gmra.mxu1 %vm1501_vm4, %v1524_v40  ;;  %v1512_v29 = vmul.f32 %v2793_v28, %v2789_v9  ;;  %v2783_v9 = vld [vmem:[%s3390_s9 + $0x10] sm:$0xff]  }
 0x542   : > { %2616 = vmatpush3.bf16.msra.mxu1 %v3285_v24  ;;  %2617 = vmatprep.mubr.msk.bf16.mxu1 %vm2853_vm0, %v2852_v7  ;;  %v2761_v24 = vld [vmem:[#allocation5 + $0xa0] sm:$0xff]  }
 0x543   : > { %2486 = vmatprep.subr.bf16.mxu1 %v2748_v27  ;;  %v1572_v31 = vpack.c.bf16 %v1512_v29, %v1512_v29 }
 0x549   : > { %2618 = vmatmul.mubr.msk.bf16.vlgmr.msra.gmra.mxu1 %vm1501_vm4, %v1572_v31 }
 0x54a   : > { %2487 = vmatpush3.bf16.msra.mxu1 %v2749_v30 }
 0x54b   : > { %2488 = vmatprep.subr.bf16.mxu1 %v2752_v32  ;;  %v2363_v32 = vld [vmem:[%s3391_s10] ss:$0 sm:$0xff] }
 0x54e   : > { %2489 = vmatpush3.bf16.msra.mxu1 %v2753_v33 }
 0x54f   : > { %2490 = vmatprep.subr.bf16.mxu1 %v2756_v34 }
 0x552   : > { %2491 = vmatpush3.bf16.msra.mxu1 %v2757_v35 }
 0x553   : > { %2492 = vmatprep.subr.bf16.mxu1 %v2760_v37 }
 0x556   : > { %2493 = vmatpush3.bf16.msra.mxu1 %v2761_v24 }
 0x557   : > { %2494 = vmatprep.subr.bf16.mxu1 %v2764_v39 }
 0x55a   : > { %2495 = vmatpush3.bf16.msra.mxu1 %v2765_v42 }
 0x55b   : > { %2496 = vmatprep.subr.bf16.mxu1 %v2768_v47 }
 0x55e   : > { %2497 = vmatpush3.bf16.msra.mxu1 %v2769_v48 }
 0x55f   : > { %2498 = vmatprep.subr.bf16.mxu1 %v2772_v51 }
 0x562   : > { %2499 = vmatpush3.bf16.msra.mxu1 %v2773_v52 }
 0x563   : > { %2500 = vmatprep.subr.bf16.mxu1 %v2776_v46 }
 0x566   : > { %2501 = vmatpush3.bf16.msra.mxu1 %v2777_v54 }
 0x601   : > { %v1566_v55 = vpop.f32.mrf.mxu1 }
 0x602   : > { %v1619_v59 = vsub.f32 %v3275_v18, %v1566_v55  ;;  %v1621_v61 = vmul.f32 %v1566_v55, %v3275_v18  ;;  %v2780_v18 = vld [vmem:[%s3390_s9 + $0x28] sm:$0xff]  }
 0x603   : > { %v2613_v56 = vpop.f32.mrf.mxu1 }
 0x605   : > { %v1569_v57 = vpop.f32.mrf.mxu1 }
 0x607   : > { %v2614_v58 = vpop.f32.mrf.mxu1 }
 0x609   : > { %v1613_v60 = vpop.f32.mrf.mxu1 }
 0x60a   : > { %v1620_v62 = vsub.f32 %v3280_v22, %v1613_v60  ;;  %v1622_v63 = vmul.f32 %v1613_v60, %v3280_v22  ;;  %v1624_v41 = vpack.c.bf16 %v1613_v60, %v1566_v55  ;;  %v2781_v22 = vld [vmem:[%s3390_s9 + $0x20] sm:$0xff]  }
 0x60b   : > { %v2619_v0 = vpop.f32.mrf.mxu1 }
 0x60c   : > { %v1625_v2 = vpack.c.bf16 %v1620_v62, %v1619_v59  ;;  %1922 = vmatprep.mubr.bf16.mxu0 %v1624_v41  ;;  %v1626_v3 = vpack.c.bf16 %v1622_v63, %v1621_v61 }
 0x60d   : > { %v1616_v4 = vpop.f32.mrf.mxu1  ;;  %1923 = vmatmul.mubr.bf16.vlgmr.msra.gmra.mxu0 %v1623_v1 }
 0x60e   : > { %1963 = vmatprep.mubr.bf16.mxu1 %v1626_v3  ;;  %2622 = vmatpush3.bf16.msra.mxu0 %v2778_v38 }
 0x60f   : > { %v2620_v6 = vpop.f32.mrf.mxu1  ;;  %1964 = vmatmul.mubr.bf16.vlgmr.msra.gmra.mxu1 %v1625_v2  ;;  %2623 = vmatprep.subr.bf16.mxu0 %v2852_v7 }
 0x610   : > { %2637 = vmatprep.mubr.msk.bf16.mxu0 %vm2853_vm0, %v2852_v7 }
 0x612   : > { %2624 = vmatpush3.bf16.msra.mxu0 %v2779_v5 }
 0x613   : > { %2625 = vmatprep.subr.bf16.mxu0 %v2852_v7 }
 0x616   : > { %2626 = vmatpush3.bf16.msra.mxu0 %v2780_v18 }
 0x617   : > { %2627 = vmatprep.subr.bf16.mxu0 %v2852_v7 }
 0x61a   : > { %2628 = vmatpush3.bf16.msra.mxu0 %v2781_v22 }
 0x61b   : > { %2629 = vmatprep.subr.bf16.mxu0 %v2852_v7 }
 0x61e   : > { %2630 = vmatpush3.bf16.msra.mxu0 %v2782_v8 }
 0x61f   : > { %2631 = vmatprep.subr.bf16.mxu0 %v2852_v7 }
 0x622   : > { %2632 = vmatpush3.bf16.msra.mxu0 %v2783_v9 }
 0x623   : > { %2633 = vmatprep.subr.bf16.mxu0 %v2852_v7 }
 0x626   : > { %2634 = vmatpush3.bf16.msra.mxu0 %v2784_v10 }
 0x627   : > { %2635 = vmatprep.subr.bf16.mxu0 %v2852_v7 }
 0x62a   : > { %2636 = vmatpush3.bf16.msra.mxu0 %v2785_v11 }
 0x6cd   : > { %v2480_v12 = vpop.f32.mrf.mxu0 }
 0x6cf   : > { %v2481_v14 = vpop.f32.mrf.mxu0  ;;  %v2502_v15 = vpop.f32.mrf.mxu1 }
 0x6d0   : > { %v2482_v16 = vadd.f32 %v2481_v14, %v2480_v12 }
 0x6d1   : > { %v2483_v17 = vpop.f32.mrf.mxu0  ;;  %v2503_v19 = vpop.f32.mrf.mxu1 }
 0x6d2   : > { %v1925_v20 = vadd.f32 %v2482_v16, %v2330_v13  ;;  %v2504_v21 = vadd.f32 %v2503_v19, %v2502_v15 }
 0x6d3   : > { %v2484_v23 = vpop.f32.mrf.mxu0  ;;  %v2505_v36 = vpop.f32.mrf.mxu1 }
 0x6d4   : > { %v2485_v7 = vadd.f32 %v2484_v23, %v2483_v17  ;;  %v1966_v26 = vadd.f32 %v2504_v21, %v1925_v20 }
 0x6d5   : > { %v2506_v25 = vpop.f32.mrf.mxu1 }
 0x6d6   : > { %v1928_v40 = vadd.f32 %v2485_v7, %v2330_v13  ;;  %v2507_v27 = vadd.f32 %v2506_v25, %v2505_v36  ;;  %v1972_v29 = vmax.f32 %v1966_v26, 0.0 }
 0x6d8   : > { %v1969_v28 = vadd.f32 %v2507_v27, %v1928_v40 }
 0x6da   : > { %v1973_v30 = vmax.f32 %v1969_v28, 0.0 }
 0x6dc   : > { %v1974_v31 = vpack.c.bf16 %v1973_v30, %v1972_v29 }
 0x6de   : > { %2638 = vmatmul.mubr.bf16.vlgmr.msra.gmra.mxu0 %v1974_v31 }
 0x79e   : > { %v2080_v33 = vpop.f32.mrf.mxu0 }
 0x79f   : > { %v2081_v34 = vadd.f32 %v2363_v32, %v2080_v33 }
 0x7a0   : > { %v2639_v35 = vpop.f32.mrf.mxu0 }
 0x7a1   : > { %v2087_v37 = vmax.f32 %v2081_v34, 0.0 }
 0x7a2   : > { %v2083_v24 = vpop.f32.mrf.mxu0 }
 0x7a3   : > { %2089 = vst [vmem:[%s551_s17] sm:$0xff] %v2087_v37  ;;  %v2084_v39 = vadd.f32 %v2363_v32, %v2083_v24  ;;  %2097 = sbr.rel (!%p3400_p4) target bundleno = 1968 (0x7b0), region = 182 }
 0x7a4   : > { %v2640_v42 = vpop.f32.mrf.mxu0 }
 0x7a5   : > { %v2088_v43 = vmax.f32 %v2084_v39, 0.0 }
 0x7a7   : > { %2090 = vst [vmem:[%s551_s17 + $0x8] sm:$0xff] %v2088_v43 }
 0x7aa   : > { %v2130_v44 = vld [vmem:[%s551_s17] sm:$0xff] }
 0x7ab   : > { %2131 = vst [vmem:[%s2099_s22] sm:$0xff] %v2130_v44 }
 0x7ae   : > { %v2132_v47 = vld [vmem:[%s551_s17 + $0x8] sm:$0xff] }
 0x7af   : > { %2133 = vst [vmem:[%s2099_s22 + $0x10] sm:$0xff] %v2132_v47 }
 0x7b0 PF: > { %s3401_s19 = sld [smem:[#allocation9_spill]]  ;;  %s3403_s17 = smov %s2842_s18 }
 0x7b1   : > { %s3402_s12 = sld [smem:[#allocation10_spill]] }
 0x7b6   : > { %p19_p5 = scmp.ge.s32.totalorder %s3401_s19, 4  }
 0x7b7   : > { %s3404_s18 = smov %s3402_s12 }
 0x7b8   :  { %21 = sbr.rel (!%p19_p5) target bundleno = 2 (0x2), region = 268 }
 0x7bd   :  { %2149 = vsyncpa [#allocation6], 1 }
 0x7be   :  { %2151 = vsyncpa [#allocation6 + $0x1], 1 }

// kernel: re2_forward.4
= control target key start
LH: loop header
LB: loop body
LE: loop exit
PB: predicated region body
PF: predicated region fallthrough
CT: control target
= control target key end

     0   :  { %s2839_s17 = smov 0   ;;  %s2841_s18 = smov 0   ;;  %s3377_s0 = inlined_call_operand.vmem [shape: f32[2,2,8,128], index: 0, kind: input, shape index: {}]   ;;  %s3378_s1 = inlined_call_operand.vmem [shape: f32[2,2,8,1], index: 1, kind: input, shape index: {}]   ;;  %s3379_s2 = inlined_call_operand.vmem [shape: f32[2,2,1,8], index: 2, kind: input, shape index: {}]   ;;  %s3380_s3 = inlined_call_operand.vmem [shape: bf16[2,384,128], index: 3, kind: input, shape index: {}]   ;;  %s3381_s4 = inlined_call_operand.vmem [shape: f32[2,1,128], index: 4, kind: input, shape index: {}]   ;;  %s3382_s5 = inlined_call_operand.vmem [shape: bf16[2,128,128], index: 5, kind: input, shape index: {}]   ;;  %s3383_s6 = inlined_call_operand.vmem [shape: f32[2,1,128], index: 6, kind: input, shape index: {}]   ;;  %s3384_s7 = inlined_call_operand.vmem [shape: bf16[512,128], index: 7, kind: input, shape index: {}]   ;;  %s3385_s8 = inlined_call_operand.vmem [shape: f32[1,128], index: 8, kind: input, shape index: {}]   ;;  %s3386_s9 = inlined_call_operand.vmem [shape: bf16[128,128], index: 9, kind: input, shape index: {}]   ;;  %s3387_s10 = inlined_call_operand.vmem [shape: f32[1,128], index: 10, kind: input, shape index: {}]   ;;  %s3388_s11 = inlined_call_operand.vmem [shape: f32[2,2,8,128], index: 11, kind: output, shape index: {}]  }
   0x1   :  { %s2843_s19 = smov 0  }
   0x2 LB: > { %s3389_s20 = sadd.s32 4294967295, %s2774_s19   ;;  %s2856_s21 = sadd.s32 1, %s2774_s19   ;;  %s2774_s19 = sphi %s2843_s19, %s3395_s19   ;;  %s2770_s18 = sphi %s2841_s18, %s3394_s18   ;;  %s2766_s17 = sphi %s2839_s17, %s3393_s17  }
   0x3   : > { %s25_s22 = ssub.s32 %s2774_s19, %s2856_s21  ;;  %s28_s23 = sadd.s32 1, %s2770_s18 }
   0x4   : > { %p26_p0 = scmp.eq.s32.totalorder %s25_s22, 0  ;;  %p35_p1 = scmp.ne.s32.totalorder %s2770_s18, %s2766_s17 }
   0x5   : > { %p36_p2 = scmp.eq.s32.totalorder %s2774_s19, 0  ;;  %p285_p3 = scmp.eq.s32.totalorder %s3389_s20, 1 }
   0x6   : > { %s2867_s24 = scalar_select %p26_p0, %s2770_s18, %s28_s23  }
   0x7   : > { %p2869_p4 = por %p36_p2, %p35_p1  ;;  %p2873_p5 = por %p285_p3, %p35_p1 }
   0x8   : > { %p2216_p6 = scmp.ge.s32.totalorder %s2774_s19, 2 }
   0xa   : > { %331 = sbr.rel (%p2216_p6) target bundleno = 30 (0x1e), region = 48 }
   0xf   : > { %334 = sbr.rel (!%p2869_p4) target bundleno = 20 (0x14), region = 52  ;;  %s336_s27 = sand.u32 (%p2869_p4), 1, %s2770_s18  }
  0x10   : > { %s2218_s28 = sshll.u32 (%p2869_p4), %s2774_s19, 3  ;;  %s2217_s29 = sshll.u32 (%p2869_p4), %s336_s27, 4 }
  0x11   : > { %s340_s13 = scalar_lea.vmem (%p2869_p4), %s3377_s0, %s2218_s28  ;;  %s338_s14 = scalar_lea.vmem (%p2869_p4), [#allocation2], %s2217_s29 }
  0x12   : > { %v371_v0 = vld [vmem:[%s340_s13] sm:$0xff] (%p2869_p4)  ;;  %v373_v1 = vld [vmem:[%s340_s13 + $0x10] sm:$0xff] (%p2869_p4) }
  0x13   : > { %372 = vst [vmem:[%s338_s14] sm:$0xff] (%p2869_p4), %v371_v0  ;;  %374 = vst [vmem:[%s338_s14 + $0x8] sm:$0xff] (%p2869_p4), %v373_v1 }
  0x14 PF: > { %380 = sbr.rel (!%p2869_p4) target bundleno = 25 (0x19), region = 90  ;;  %s382_s15 = sand.u32 (%p2869_p4), 1, %s2770_s18  }
  0x15   : > { %s2220_s16 = sshll.u32 (%p2869_p4), %s2774_s19, 3  ;;  %s2219_s22 = sshll.u32 (%p2869_p4), %s382_s15, 4 }
  0x16   : > { %s386_s20 = scalar_lea.vmem (%p2869_p4), %s3378_s1, %s2220_s16  ;;  %s384_s28 = scalar_lea.vmem (%p2869_p4), [#allocation3], %s2219_s22 }
  0x17   : > { %v417_v2 = vld [vmem:[%s386_s20] sm:$0xff] (%p2869_p4)  ;;  %v419_v3 = vld [vmem:[%s386_s20 + $0x10] sm:$0xff] (%p2869_p4) }
  0x18   : > { %418 = vst [vmem:[%s384_s28] sm:$0xff] (%p2869_p4), %v417_v2  ;;  %420 = vst [vmem:[%s384_s28 + $0x8] sm:$0xff] (%p2869_p4), %v419_v3 }
  0x19 PF: > { %426 = sbr.rel (!%p2869_p4) target bundleno = 30 (0x1e), region = 128  ;;  %s428_s29 = sand.u32 (%p2869_p4), 1, %s2770_s18  }
  0x1a   : > { %s431_s13 = scalar_lea.vmem (%p2869_p4), %s3379_s2, %s2774_s19  ;;  %s2221_s14 = sshll.u32 (%p2869_p4), %s428_s29, 1 }
  0x1b   : > { %v448_v4 = vld [vmem:[%s431_s13] sm:$0x1] (%p2869_p4)  ;;  %v450_v5 = vld [vmem:[%s431_s13 + $0x2] sm:$0x1] (%p2869_p4)  ;;  %s430_s15 = scalar_lea.vmem (%p2869_p4), [#allocation4], %s2221_s14 }
  0x1c   : > { %449 = vst [vmem:[%s430_s15] sm:$0x1] (%p2869_p4), %v448_v4  ;;  %451 = vst [vmem:[%s430_s15 + $0x1] sm:$0x1] (%p2869_p4), %v450_v5 }
  0x1e PF: > { %p2222_p7 = scmp.ge.s32.totalorder %s2774_s19, 1  ;;  %p470_p8 = scmp.lt.s32.totalorder %s2774_s19, 3 }
  0x20   : > { %p471_p9 = pnand %p2222_p7, %p470_p8 }
  0x21   : > { %s477_s20 = sand.u32 (!%p471_p9), 1, %s2766_s17  }
  0x22   : > { %474 = sbr.rel (%p471_p9) target bundleno = 1951 (0x79f), region = 162  ;;  %s2904_s25 = sshll.u32 (!%p471_p9), %s477_s20, 4 }
  0x23   : > { %s486_s30 = scalar_lea.vmem (!%p471_p9), [#allocation3], %s2904_s25  ;;  %s479_s12 = scalar_lea.vmem (!%p471_p9), [#allocation2], %s2904_s25 }
  0x24   : > { %s536_s22 = scalar_lea.vmem (!%p471_p9), [#allocation5], %s2904_s25 }
  0x27   : > { %v2776_v6 = vmov 0   ;;  %v2640_v7 = vld [vmem:[%s3380_s3 + $0x78] sm:$0xff]   ;;  %v2777_v9 = vmov 0.0   ;;  %v540_v11 = vld [vmem:[%s486_s30] sm:$0xff]  ;;  %v2646_v16 = vld [vmem:[%s3380_s3 + $0x68] sm:$0xff]   ;;  %vm2778_vm0 = vmmov 0   ;;  %v640_v35 = vlaneseq }
  0x28   : > { %2639 = vset.pattern.permute.xlu0 %v2776_v6  ;;  %v2641_v8 = vld [vmem:[%s3380_s3 + $0x38] sm:$0xff]   ;;  %2488 = vmatprep.subr.bf16.mxu1 %v2777_v9  ;;  %v2643_v13 = vld [vmem:[%s3380_s3 + $0x70] sm:$0xff]   ;;  %v2647_v17 = vld [vmem:[%s3380_s3 + $0x28] sm:$0xff]   ;;  %vm1513_vm3 = vcmask 1043456   ;;  %vm1486_vm4 = vcmask 64512   ;;  %s3392_s23 = sadd.s32 (%p2873_p5), 4294967295, %s2774_s19  }
  0x29   : > { %v2642_v10 = vld [vmem:[%s3380_s3 + $0xb8] sm:$0xff]   ;;  %2347 = vmatprep.subr.bf16.mxu0 %v2640_v7  ;;  %650 = vperm.xlu0 %2639, %v540_v11   ;;  %v2644_v14 = vld [vmem:[%s3380_s3 + $0x30] sm:$0xff]   ;;  %v2648_v18 = vld [vmem:[%s3380_s3 + $0xa8] sm:$0xff]   ;;  %v641_v37 = vshrl.u32 %v640_v35, 7  ;;  %s2344_s27 = sshll.u32 (%p2873_p5), %s3392_s23, 3 }
  0x2a   : > { %v541_v12 = vld [vmem:[%s486_s30 + $0x8] sm:$0xff]  ;;  %2348 = vmatpush3.bf16.msra.mxu0 %v2641_v8  ;;  %2489 = vmatpush3.bf16.msra.mxu1 %v2642_v10  ;;  %v2645_v15 = vld [vmem:[%s3380_s3 + $0xb0] sm:$0xff]   ;;  %v2649_v19 = vld [vmem:[%s3380_s3 + $0x60] sm:$0xff]   ;;  %s2225_s30 = sshll.u32 %s477_s20, 1 }
  0x2b   : > { %2349 = vmatprep.subr.bf16.mxu0 %v2643_v13  ;;  %2490 = vmatprep.subr.bf16.mxu1 %v2777_v9  ;;  %v2650_v20 = vld [vmem:[%s3380_s3 + $0x20] sm:$0xff]   ;;  %v2652_v22 = vld [vmem:[%s3380_s3 + $0x58] sm:$0xff]   ;;  %v2655_v25 = vld [vmem:[%s3380_s3 + $0x50] sm:$0xff]   ;;  %vm642_vm1 = vcmp.ne.s32.totalorder %v641_v37, 0  ;;  %vm645_vm2 = vcmp.ne.s32.totalorder %v641_v37, 7 }
  0x2c   : > { %2504 = vmatprep.mubr.msk.bf16.mxu1 %vm2778_vm0, %v2777_v9  ;;  %v2651_v21 = vld [vmem:[%s3380_s3 + $0xa0] sm:$0xff]   ;;  %v2653_v23 = vld [vmem:[%s3380_s3 + $0x18] sm:$0xff]   ;;  %v2656_v26 = vld [vmem:[%s3380_s3 + $0x10] sm:$0xff]   ;;  %v3007_v45 = vsel %vm642_vm1, 1.0, %v2777_v9  ;;  %v3010_v46 = vsel %vm645_vm2, 1.0, %v2777_v9 }
  0x2d   : > { %655 = vperm.xlu0 %2639, %v541_v12   ;;  %v2654_v24 = vld [vmem:[%s3380_s3 + $0x98] sm:$0xff]   ;;  %v2657_v27 = vld [vmem:[%s3380_s3 + $0x90] sm:$0xff]   ;;  %v2658_v28 = vld [vmem:[%s3380_s3 + $0x48] sm:$0xff]  }
  0x2e   : > { %2350 = vmatpush3.bf16.msra.mxu0 %v2644_v14  ;;  %2491 = vmatpush3.bf16.msra.mxu1 %v2645_v15  ;;  %v2659_v29 = vld [vmem:[%s3380_s3 + $0x8] sm:$0xff]   ;;  %v2661_v31 = vld [vmem:[%s3380_s3 + $0x40] sm:$0xff]   ;;  %v2664_v34 = vld [vmem:[%s3380_s3 + $0x138] sm:$0xff]  }
  0x2f   : > { %2351 = vmatprep.subr.bf16.mxu0 %v2646_v16  ;;  %2492 = vmatprep.subr.bf16.mxu1 %v2777_v9  ;;  %v2660_v30 = vld [vmem:[%s3380_s3 + $0x88] sm:$0xff]   ;;  %v2662_v32 = vld [vmem:[%s3380_s3] sm:$0xff]   ;;  %v2665_v54 = vld [vmem:[%s3380_s3 + $0xf8] sm:$0xff]  }
  0x30   : > { %v2663_v33 = vld [vmem:[%s3380_s3 + $0x80] sm:$0xff]   ;;  %v3000_v40 = vld [vmem:[%s479_s12 + $0x8] sm:$0xff]  ;;  %v2667_v58 = vld [vmem:[%s3380_s3 + $0x130] sm:$0xff]  }
  0x31   : > { %v2994_v36 = vld [vmem:[%s479_s12] sm:$0xff]  ;;  %v2666_v55 = vld [vmem:[%s3380_s3 + $0x178] sm:$0xff]   ;;  %v2670_v61 = vld [vmem:[%s3380_s3 + $0x128] sm:$0xff]   ;;  %s493_s12 = scalar_lea.vmem [#allocation4], %s2225_s30  ;;  %s2084_s30 = scalar_lea.vmem (%p2873_p5), %s3388_s11, %s2344_s27 }
  0x32   : > { %2352 = vmatpush3.bf16.msra.mxu0 %v2647_v17  ;;  %2493 = vmatpush3.bf16.msra.mxu1 %v2648_v18  ;;  %v2668_v59 = vld [vmem:[%s3380_s3 + $0xf0] sm:$0xff]   ;;  %v2671_v62 = vld [vmem:[%s3380_s3 + $0xe8] sm:$0xff]   ;;  %v2673_v0 = vld [vmem:[%s3380_s3 + $0x120] sm:$0xff]  }
  0x33   : > { %2353 = vmatprep.subr.bf16.mxu0 %v2649_v19  ;;  %2494 = vmatprep.subr.bf16.mxu1 %v2777_v9  ;;  %v2669_v60 = vld [vmem:[%s3380_s3 + $0x170] sm:$0xff]   ;;  %v2672_v63 = vld [vmem:[%s3380_s3 + $0x168] sm:$0xff]   ;;  %v2674_v1 = vld [vmem:[%s3380_s3 + $0xe0] sm:$0xff]  }
  0x34   : > { %v2675_v2 = vld [vmem:[%s3380_s3 + $0x160] sm:$0xff]   ;;  %v2676_v3 = vld [vmem:[%s3380_s3 + $0x118] sm:$0xff]   ;;  %v2679_v6 = vld [vmem:[%s3380_s3 + $0x110] sm:$0xff]  }
  0x35   : > { %v2677_v4 = vld [vmem:[%s3380_s3 + $0xd8] sm:$0xff]   ;;  %v2680_v7 = vld [vmem:[%s3380_s3 + $0xd0] sm:$0xff]   ;;  %v2682_v10 = vld [vmem:[%s3380_s3 + $0x108] sm:$0xff]  }
  0x36   : > { %2354 = vmatpush3.bf16.msra.mxu0 %v2650_v20  ;;  %2495 = vmatpush3.bf16.msra.mxu1 %v2651_v21  ;;  %v2678_v5 = vld [vmem:[%s3380_s3 + $0x158] sm:$0xff]   ;;  %v2681_v8 = vld [vmem:[%s3380_s3 + $0x150] sm:$0xff]   ;;  %v2683_v11 = vld [vmem:[%s3380_s3 + $0xc8] sm:$0xff]  }
  0x37   : > { %2355 = vmatprep.subr.bf16.mxu0 %v2652_v22  ;;  %2496 = vmatprep.subr.bf16.mxu1 %v2777_v9  ;;  %v2684_v12 = vld [vmem:[%s3380_s3 + $0x148] sm:$0xff]   ;;  %v2685_v13 = vld [vmem:[%s3380_s3 + $0x100] sm:$0xff]  }
  0x38   : > { %v2686_v14 = vld [vmem:[%s3380_s3 + $0xc0] sm:$0xff]  }
  0x39   : > { %v2687_v15 = vld [vmem:[%s3380_s3 + $0x140] sm:$0xff]  }
  0x3a   : > { %2356 = vmatpush3.bf16.msra.mxu0 %v2653_v23  ;;  %2497 = vmatpush3.bf16.msra.mxu1 %v2654_v24  ;;  %v2229_v18 = vld [vmem:[%s3381_s4] ss:$0 sm:$0xff] }
  0x3b   : > { %2357 = vmatprep.subr.bf16.mxu0 %v2655_v25  ;;  %2498 = vmatprep.subr.bf16.mxu1 %v2777_v9 }
  0x3e   : > { %2358 = vmatpush3.bf16.msra.mxu0 %v2656_v26  ;;  %2499 = vmatpush3.bf16.msra.mxu1 %v2657_v27 }
  0x3f   : > { %2359 = vmatprep.subr.bf16.mxu0 %v2658_v28  ;;  %2500 = vmatprep.subr.bf16.mxu1 %v2777_v9 }
  0x42   : > { %2360 = vmatpush3.bf16.msra.mxu0 %v2659_v29  ;;  %2501 = vmatpush3.bf16.msra.mxu1 %v2660_v30 }
  0x43   : > { %2361 = vmatprep.subr.bf16.mxu0 %v2661_v31  ;;  %2502 = vmatprep.subr.bf16.mxu1 %v2777_v9 }
  0x46   : > { %2362 = vmatpush3.bf16.msra.mxu0 %v2662_v32  ;;  %2503 = vmatpush3.bf16.msra.mxu1 %v2663_v33 }
  0x47   : > { %2378 = vmatprep.subr.bf16.mxu0 %v2664_v34  ;;  %2508 = vmatprep.subr.bf16.mxu1 %v2777_v9 }
  0xa4   : > { %v2996_v38 = vpop.permute.xlu0 %650 }
  0xa5   : > { %v658_v39 = vmul.f32 %v2996_v38, %v2994_v36 }
  0xa7   : > { %v660_v43 = vrot.slane %v658_v39, 7  ;;  %v664_v44 = vrot.slane %v658_v39, 1 }
  0xa8   : > { %v3002_v41 = vpop.permute.xlu0 %655 }
  0xa9   : > { %v659_v42 = vmul.f32 %v3002_v41, %v3000_v40  ;;  %v662_v50 = vmul.f32 %v3007_v45, %v660_v43  ;;  %v666_v52 = vmul.f32 %v3010_v46, %v664_v44 }
  0xab   : > { %v669_v47 = vpack.c.bf16 %v659_v42, %v658_v39  ;;  %v661_v48 = vrot.slane %v659_v42, 7  ;;  %v665_v49 = vrot.slane %v659_v42, 1 }
  0xad   : > { %853 = vmatprep.mubr.bf16.mxu0 %v669_v47  ;;  %v663_v51 = vmul.f32 %v3007_v45, %v661_v48  ;;  %v667_v53 = vmul.f32 %v3010_v46, %v665_v49 }
  0xaf   : > { %v668_v56 = vpack.c.bf16 %v663_v51, %v662_v50  ;;  %v670_v57 = vpack.c.bf16 %v667_v53, %v666_v52  ;;  %v2688_v50 = vld [vmem:[%s3382_s5 + $0x38] sm:$0xff]  }
  0xb0   : > { %v2690_v51 = vld [vmem:[%s3382_s5 + $0x78] sm:$0xff]  }
  0xb1   : > { %854 = vmatmul.mubr.bf16.vlgmr.msra.gmra.mxu0 %v668_v56  ;;  %2505 = vmatmul.mubr.bf16.vlgmr.msra.gmra.mxu1 %v670_v57  ;;  %v2693_v56 = vld [vmem:[%s3382_s5 + $0x20] sm:$0xff]   ;;  %v2695_v57 = vld [vmem:[%s3382_s5 + $0x18] sm:$0xff]  }
  0xb2   : > { %2379 = vmatpush3.bf16.msra.mxu0 %v2665_v54  ;;  %2509 = vmatpush3.bf16.msra.mxu1 %v2666_v55  ;;  %v2691_v54 = vld [vmem:[%s3382_s5 + $0x28] sm:$0xff]  }
  0xb3   : > { %2380 = vmatprep.subr.bf16.mxu0 %v2667_v58  ;;  %2510 = vmatprep.subr.bf16.mxu1 %v2777_v9  ;;  %v2694_v55 = vld [vmem:[%s3382_s5 + $0x68] sm:$0xff]   ;;  %v2696_v58 = vld [vmem:[%s3382_s5 + $0x60] sm:$0xff]  }
  0xb4   : > { %2524 = vmatprep.mubr.msk.bf16.mxu1 %vm2778_vm0, %v2777_v9 }
  0xb6   : > { %2381 = vmatpush3.bf16.msra.mxu0 %v2668_v59  ;;  %2511 = vmatpush3.bf16.msra.mxu1 %v2669_v60  ;;  %v2697_v59 = vld [vmem:[%s3382_s5 + $0x10] sm:$0xff]   ;;  %v2698_v60 = vld [vmem:[%s3382_s5 + $0x58] sm:$0xff]  }
  0xb7   : > { %2382 = vmatprep.subr.bf16.mxu0 %v2670_v61  ;;  %2512 = vmatprep.subr.bf16.mxu1 %v2777_v9  ;;  %v2699_v61 = vld [vmem:[%s3382_s5 + $0x8] sm:$0xff]  }
  0xba   : > { %2383 = vmatpush3.bf16.msra.mxu0 %v2671_v62  ;;  %2513 = vmatpush3.bf16.msra.mxu1 %v2672_v63  ;;  %v2700_v62 = vld [vmem:[%s3382_s5 + $0x50] sm:$0xff]   ;;  %v2701_v63 = vld [vmem:[%s3382_s5] sm:$0xff]  }
  0xbb   : > { %2514 = vmatprep.subr.bf16.mxu1 %v2777_v9  ;;  %2384 = vmatprep.subr.bf16.mxu0 %v2673_v0  ;;  %v2702_v0 = vld [vmem:[%s3382_s5 + $0x48] sm:$0xff]  }
  0xbe   : > { %2385 = vmatpush3.bf16.msra.mxu0 %v2674_v1  ;;  %2515 = vmatpush3.bf16.msra.mxu1 %v2675_v2  ;;  %v2703_v1 = vld [vmem:[%s3382_s5 + $0x40] sm:$0xff]  }
  0xbf   : > { %2516 = vmatprep.subr.bf16.mxu1 %v2777_v9  ;;  %2386 = vmatprep.subr.bf16.mxu0 %v2676_v3 }
  0xc2   : > { %2387 = vmatpush3.bf16.msra.mxu0 %v2677_v4  ;;  %2517 = vmatpush3.bf16.msra.mxu1 %v2678_v5  ;;  %v2254_v4 = vld [vmem:[%s3381_s4 + $0x1] ss:$0 sm:$0xff] }
  0xc3   : > { %2518 = vmatprep.subr.bf16.mxu1 %v2777_v9  ;;  %2388 = vmatprep.subr.bf16.mxu0 %v2679_v6 }
  0xc6   : > { %2389 = vmatpush3.bf16.msra.mxu0 %v2680_v7  ;;  %2519 = vmatpush3.bf16.msra.mxu1 %v2681_v8 }
  0xc7   : > { %2520 = vmatprep.subr.bf16.mxu1 %v2777_v9  ;;  %2390 = vmatprep.subr.bf16.mxu0 %v2682_v10 }
  0xca   : > { %2391 = vmatpush3.bf16.msra.mxu0 %v2683_v11  ;;  %2521 = vmatpush3.bf16.msra.mxu1 %v2684_v12 }
  0xcb   : > { %2392 = vmatprep.subr.bf16.mxu0 %v2685_v13  ;;  %2522 = vmatprep.subr.bf16.mxu1 %v2777_v9 }
  0xce   : > { %2393 = vmatpush3.bf16.msra.mxu0 %v2686_v14  ;;  %2523 = vmatpush3.bf16.msra.mxu1 %v2687_v15 }
  0xcf   : > { %2528 = vmatprep.subr.bf16.mxu0 %v2777_v9  ;;  %2548 = vmatprep.subr.bf16.mxu1 %v2777_v9 }
 0x171   : > { %v2363_v16 = vpop.f32.mrf.mxu0  ;;  %v896_v17 = vpop.f32.mrf.mxu1 }
 0x173   : > { %v2364_v19 = vpop.f32.mrf.mxu0  ;;  %v2506_v20 = vpop.f32.mrf.mxu1 }
 0x174   : > { %v2365_v21 = vadd.f32 %v2364_v19, %v2363_v16 }
 0x175   : > { %v2366_v22 = vpop.f32.mrf.mxu0  ;;  %v899_v23 = vpop.f32.mrf.mxu1 }
 0x176   : > { %v856_v24 = vadd.f32 %v2365_v21, %v2229_v18 }
 0x177   : > { %v2367_v25 = vpop.f32.mrf.mxu0  ;;  %v2507_v26 = vpop.f32.mrf.mxu1 }
 0x178   : > { %v897_v27 = vadd.f32 %v896_v17, %v856_v24  ;;  %v2368_v28 = vadd.f32 %v2367_v25, %v2366_v22  ;;  %v2288_v26 = vld [vmem:[%s3383_s6 + $0x1] ss:$0 sm:$0xff] }
 0x17a   : > { %v903_v29 = vmax.f32 %v897_v27, 0.0  ;;  %v859_v30 = vadd.f32 %v2368_v28, %v2229_v18  ;;  %v2279_v28 = vld [vmem:[%s3383_s6] ss:$0 sm:$0xff] }
 0x17c   : > { %v905_v31 = vmul.f32 %v903_v29, %v2996_v38  ;;  %v900_v32 = vadd.f32 %v899_v23, %v859_v30 }
 0x17e   : > { %v904_v33 = vmax.f32 %v900_v32, 0.0  ;;  %v907_v35 = vrot.slane %v905_v31, 7  ;;  %v911_v37 = vrot.slane %v905_v31, 1 }
 0x180   : > { %v906_v34 = vmul.f32 %v904_v33, %v3002_v41  ;;  %v909_v44 = vmul.f32 %v3007_v45, %v907_v35  ;;  %v913_v48 = vmul.f32 %v3010_v46, %v911_v37 }
 0x182   : > { %v916_v39 = vpack.c.bf16 %v906_v34, %v905_v31  ;;  %v908_v42 = vrot.slane %v906_v34, 7  ;;  %v912_v43 = vrot.slane %v906_v34, 1 }
 0x184   : > { %1100 = vmatprep.mubr.bf16.mxu0 %v916_v39  ;;  %v910_v47 = vmul.f32 %v3007_v45, %v908_v42  ;;  %v914_v49 = vmul.f32 %v3010_v46, %v912_v43  ;;  %v2689_v45 = vld [vmem:[%s3382_s5 + $0x30] sm:$0xff]  }
 0x185   : > { %v2692_v46 = vld [vmem:[%s3382_s5 + $0x70] sm:$0xff]  }
 0x186   : > { %v915_v52 = vpack.c.bf16 %v910_v47, %v909_v44  ;;  %v917_v53 = vpack.c.bf16 %v914_v49, %v913_v48  ;;  %v2298_v44 = vld [vmem:[%s493_s12] ss:$0 sm:$0xff]  ;;  %v2297_v47 = vld [vmem:[%s493_s12 + $0x1] ss:$0 sm:$0xff] }
 0x187   : > { %v1397_v49 = vmul.f32 %v2298_v44, %v3002_v41  ;;  %v2725_v44 = vld [vmem:[%s3384_s7 + $0x10] sm:$0xff]  }
 0x188   : > { %1101 = vmatmul.mubr.bf16.vlgmr.msra.gmra.mxu0 %v915_v52  ;;  %2525 = vmatmul.mubr.bf16.vlgmr.msra.gmra.mxu1 %v917_v53 }
 0x189   : > { %2529 = vmatpush3.bf16.msra.mxu0 %v2688_v50  ;;  %2549 = vmatpush3.bf16.msra.mxu1 %v2690_v51  ;;  %v1390_v51 = vmul.f32 %v2297_v47, %v2996_v38  ;;  %v1483_v53 = vsub.f32 1.0, %v1397_v49  ;;  %v2726_v47 = vld [vmem:[%s3384_s7 + $0xd0] sm:$0xff]  }
 0x18a   : > { %2530 = vmatprep.subr.bf16.mxu0 %v2777_v9  ;;  %2550 = vmatprep.subr.bf16.mxu1 %v2777_v9 }
 0x18b   : > { %2544 = vmatprep.mubr.msk.bf16.mxu0 %vm2778_vm0, %v2777_v9  ;;  %2564 = vmatprep.mubr.msk.bf16.mxu1 %vm2778_vm0, %v2777_v9 }
 0x18d   : > { %2531 = vmatpush3.bf16.msra.mxu0 %v2689_v45  ;;  %2551 = vmatpush3.bf16.msra.mxu1 %v2692_v46  ;;  %v1479_v46 = vsub.f32 1.0, %v1390_v51 }
 0x18e   : > { %2532 = vmatprep.subr.bf16.mxu0 %v2777_v9  ;;  %2552 = vmatprep.subr.bf16.mxu1 %v2777_v9 }
 0x191   : > { %2533 = vmatpush3.bf16.msra.mxu0 %v2691_v54  ;;  %2553 = vmatpush3.bf16.msra.mxu1 %v2694_v55 }
 0x192   : > { %2534 = vmatprep.subr.bf16.mxu0 %v2777_v9  ;;  %2554 = vmatprep.subr.bf16.mxu1 %v2777_v9 }
 0x195   : > { %2535 = vmatpush3.bf16.msra.mxu0 %v2693_v56  ;;  %2555 = vmatpush3.bf16.msra.mxu1 %v2696_v58 }
 0x196   : > { %2536 = vmatprep.subr.bf16.mxu0 %v2777_v9  ;;  %2556 = vmatprep.subr.bf16.mxu1 %v2777_v9 }
 0x199   : > { %2537 = vmatpush3.bf16.msra.mxu0 %v2695_v57  ;;  %2557 = vmatpush3.bf16.msra.mxu1 %v2698_v60  ;;  %v1484_v57 = vmul.f32 -1e+09, %v1483_v53  ;;  %v1480_v60 = vmul.f32 -1e+09, %v1479_v46  ;;  %v2732_v53 = vld [vmem:[%s3384_s7 + $0x40] sm:$0xff]  }
 0x19a   : > { %2538 = vmatprep.subr.bf16.mxu0 %v2777_v9  ;;  %2558 = vmatprep.subr.bf16.mxu1 %v2777_v9  ;;  %v2734_v46 = vld [vmem:[%s3384_s7 + $0xc0] sm:$0xff]  }
 0x19d   : > { %2539 = vmatpush3.bf16.msra.mxu0 %v2697_v59  ;;  %2559 = vmatpush3.bf16.msra.mxu1 %v2700_v62 }
 0x19e   : > { %2540 = vmatprep.subr.bf16.mxu0 %v2777_v9  ;;  %2560 = vmatprep.subr.bf16.mxu1 %v2777_v9 }
 0x1a1   : > { %2541 = vmatpush3.bf16.msra.mxu0 %v2699_v61  ;;  %2561 = vmatpush3.bf16.msra.mxu1 %v2702_v0 }
 0x1a2   : > { %2542 = vmatprep.subr.bf16.mxu0 %v2777_v9  ;;  %2562 = vmatprep.subr.bf16.mxu1 %v2777_v9 }
 0x1a5   : > { %2543 = vmatpush3.bf16.msra.mxu0 %v2701_v63  ;;  %2563 = vmatpush3.bf16.msra.mxu1 %v2703_v1 }
 0x1a6   : > { %2568 = vmatprep.subr.bf16.mxu1 %v2777_v9 }
 0x248   : > { %v2394_v2 = vpop.f32.mrf.mxu0  ;;  %v1143_v3 = vpop.f32.mrf.mxu1 }
 0x24a   : > { %v2395_v5 = vpop.f32.mrf.mxu0  ;;  %v2526_v6 = vpop.f32.mrf.mxu1 }
 0x24b   : > { %v2396_v7 = vadd.f32 %v2395_v5, %v2394_v2 }
 0x24c   : > { %v2397_v8 = vpop.f32.mrf.mxu0  ;;  %v1146_v10 = vpop.f32.mrf.mxu1 }
 0x24d   : > { %v1103_v11 = vadd.f32 %v2396_v7, %v2254_v4 }
 0x24e   : > { %v2398_v12 = vpop.f32.mrf.mxu0  ;;  %v2527_v13 = vpop.f32.mrf.mxu1 }
 0x24f   : > { %v1144_v14 = vadd.f32 %v1143_v3, %v1103_v11  ;;  %v2399_v15 = vadd.f32 %v2398_v12, %v2397_v8  ;;  %v2704_v11 = vld [vmem:[%s3384_s7 + $0x78] sm:$0xff]   ;;  %v2708_v13 = vld [vmem:[%s3384_s7 + $0x70] sm:$0xff]  }
 0x250   : > { %v2705_v12 = vld [vmem:[%s3384_s7 + $0x38] sm:$0xff]   ;;  %2435 = vmatprep.subr.bf16.mxu0 %v2704_v11  ;;  %v2743_v11 = vld [vmem:[%s3386_s9] sm:$0xff]  }
 0x251   : > { %v1150_v16 = vmax.f32 %v1144_v14, 0.0  ;;  %v1106_v17 = vadd.f32 %v2399_v15, %v2254_v4  ;;  %v2709_v14 = vld [vmem:[%s3384_s7 + $0x30] sm:$0xff]   ;;  %v2712_v15 = vld [vmem:[%s3384_s7 + $0x68] sm:$0xff]  }
 0x253   : > { %v3176_v18 = vadd.f32 %v1150_v16, %v2994_v36  ;;  %v1147_v19 = vadd.f32 %v1146_v10, %v1106_v17  ;;  %v2713_v16 = vld [vmem:[%s3384_s7 + $0x28] sm:$0xff]   ;;  %v2716_v17 = vld [vmem:[%s3384_s7 + $0x60] sm:$0xff]  }
 0x255   : > { %v1151_v20 = vmax.f32 %v1147_v19, 0.0  ;;  %v1188_v21 = vpack.c.bf16 %v3176_v18, %v3176_v18  ;;  %v2717_v19 = vld [vmem:[%s3384_s7 + $0x20] sm:$0xff]  }
 0x257   : > { %v3181_v22 = vadd.f32 %v1151_v20, %v3000_v40  ;;  %2545 = vmatmul.mubr.bf16.vlgmr.msra.gmra.mxu0 %v1188_v21  ;;  %v1515_v43 = vsel %vm1513_vm3, %v1188_v21, 0  ;;  %v2720_v20 = vld [vmem:[%s3384_s7 + $0x58] sm:$0xff]  }
 0x258   : > { %2436 = vmatpush3.bf16.msra.mxu0 %v2705_v12  ;;  %v2721_v21 = vld [vmem:[%s3384_s7 + $0x18] sm:$0xff]  }
 0x259   : > { %v1189_v23 = vpack.c.bf16 %v3181_v22, %v3181_v22  ;;  %2437 = vmatprep.subr.bf16.mxu0 %v2708_v13  ;;  %v2301_v13 = vld [vmem:[%s3385_s8] ss:$0 sm:$0xff] }
 0x25b   : > { %2565 = vmatmul.mubr.bf16.vlgmr.msra.gmra.mxu1 %v1189_v23  ;;  %v3186_v24 = vsel %vm1513_vm3, %v1189_v23, 0 }
 0x25c   : > { %2570 = vmatprep.mubr.msk.bf16.mxu1 %vm2778_vm0, %v2777_v9  ;;  %2438 = vmatpush3.bf16.msra.mxu0 %v2709_v14 }
 0x25d   : > { %2439 = vmatprep.subr.bf16.mxu0 %v2712_v15 }
 0x260   : > { %2440 = vmatpush3.bf16.msra.mxu0 %v2713_v16 }
 0x261   : > { %2441 = vmatprep.subr.bf16.mxu0 %v2716_v17 }
 0x264   : > { %2442 = vmatpush3.bf16.msra.mxu0 %v2717_v19 }
 0x265   : > { %2443 = vmatprep.subr.bf16.mxu0 %v2720_v20 }
 0x268   : > { %2444 = vmatpush3.bf16.msra.mxu0 %v2721_v21 }
 0x317   : > { %v1278_v36 = vpop.f32.mrf.mxu0 }
 0x318   : > { %v1279_v33 = vadd.f32 %v2279_v28, %v1278_v36 }
 0x319   : > { %v2546_v25 = vpop.f32.mrf.mxu0 }
 0x31a   : > { %v1284_v39 = vmax.f32 %v1279_v33, 0.0  ;;  %v2714_v33 = vld [vmem:[%s3384_s7 + $0xe8] sm:$0xff]  }
 0x31b   : > { %v1281_v40 = vpop.f32.mrf.mxu0  ;;  %v1373_v27 = vpop.f32.mrf.mxu1 }
 0x31c   : > { %v1374_v29 = vadd.f32 %v2288_v26, %v1373_v27  ;;  %v1380_v42 = vpack.c.bf16 %v1284_v39, %v1284_v39  ;;  %v2706_v27 = vld [vmem:[%s3384_s7 + $0xf8] sm:$0xff]  }
 0x31d   : > { %v2547_v30 = vpop.f32.mrf.mxu0  ;;  %v2566_v31 = vpop.f32.mrf.mxu1  ;;  %v2722_v39 = vld [vmem:[%s3384_s7 + $0xd8] sm:$0xff]  }
 0x31e   : > { %v1379_v32 = vmax.f32 %v1374_v29, 0.0  ;;  %v2707_v30 = vld [vmem:[%s3384_s7 + $0xb8] sm:$0xff]  }
 0x31f   : > { %v1376_v34 = vpop.f32.mrf.mxu1 }
 0x320   : > { %v1381_v35 = vpack.c.bf16 %v1379_v32, %v1379_v32  ;;  %v2710_v32 = vld [vmem:[%s3384_s7 + $0xf0] sm:$0xff]   ;;  %v2715_v34 = vld [vmem:[%s3384_s7 + $0xa8] sm:$0xff]  }
 0x321   : > { %v2567_v37 = vpop.f32.mrf.mxu1 }
 0x322   : > { %2569 = vmatpush3.bf16.xpose.msra.mxu1 %v1381_v35  ;;  %v2719_v37 = vld [vmem:[%s3384_s7 + $0xa0] sm:$0xff]  }
 0x323   : > { %2574 = vmatprep.subr.bf16.mxu1 %v2777_v9 }
 0x329   : > { %2571 = vmatmul.mubr.bf16.vlgmr.msra.gmra.mxu1 %v1380_v42 }
 0x32a   : > { %2575 = vmatpush3.bf16.xpose.msra.mxu1 %v1380_v42  ;;  %2576 = vmatprep.mubr.msk.bf16.mxu1 %vm2778_vm0, %v2777_v9  ;;  %v2723_v42 = vld [vmem:[%s3384_s7 + $0x98] sm:$0xff]  }
 0x32b   : > { %2580 = vmatprep.subr.bf16.mxu1 %v2777_v9 }
 0x331   : > { %2577 = vmatmul.mubr.bf16.vlgmr.msra.gmra.mxu1 %v1381_v35  ;;  %v2718_v35 = vld [vmem:[%s3384_s7 + $0xe0] sm:$0xff]  }
 0x332   : > { %2581 = vmatpush3.bf16.msra.mxu1 %v1515_v43  ;;  %2582 = vmatprep.mubr.msk.bf16.mxu1 %vm2778_vm0, %v2777_v9  ;;  %v2724_v43 = vld [vmem:[%s3384_s7 + $0x50] sm:$0xff]  }
 0x333   : > { %2586 = vmatprep.subr.bf16.mxu1 %v2777_v9  ;;  %2445 = vmatprep.subr.bf16.mxu0 %v2724_v43 }
 0x334   : > { %2446 = vmatpush3.bf16.msra.mxu0 %v2725_v44 }
 0x3e9   : > { %v1432_v48 = vpop.f32.mrf.mxu1 }
 0x3ea   : > { %v1478_v55 = vmul.f32 %v1432_v48, %v1390_v51  ;;  %v2727_v48 = vld [vmem:[%s3384_s7 + $0x90] sm:$0xff]   ;;  %v2730_v51 = vld [vmem:[%s3384_s7 + $0xc8] sm:$0xff]  }
 0x3eb   : > { %v2572_v50 = vpop.f32.mrf.mxu1 }
 0x3ec   : > { %v1481_v63 = vadd.f32 %v1480_v60, %v1478_v55  ;;  %v2729_v50 = vld [vmem:[%s3384_s7 + $0x8] sm:$0xff]  }
 0x3ed   : > { %v1435_v52 = vpop.f32.mrf.mxu1 }
 0x3ee   : > { %v1487_v38 = vsel %vm1486_vm4, %v1481_v63, -inf  ;;  %v2731_v52 = vld [vmem:[%s3384_s7 + $0x88] sm:$0xff]  }
 0x3ef   : > { %v2573_v45 = vpop.f32.mrf.mxu1 }
 0x3f0   : > { %v2733_v45 = vld [vmem:[%s3384_s7] sm:$0xff]  }
 0x3f1   : > { %v1472_v54 = vpop.f32.mrf.mxu1 }
 0x3f2   : > { %v1482_v56 = vmul.f32 %v1472_v54, %v1397_v49  ;;  %v2728_v49 = vld [vmem:[%s3384_s7 + $0x48] sm:$0xff]   ;;  %v2735_v54 = vld [vmem:[%s3384_s7 + $0x80] sm:$0xff]  }
 0x3f3   : > { %v2578_v58 = vpop.f32.mrf.mxu1  ;;  %2447 = vmatprep.subr.bf16.mxu0 %v2728_v49 }
 0x3f4   : > { %v1485_v59 = vadd.f32 %v1484_v57, %v1482_v56  ;;  %2448 = vmatpush3.bf16.msra.mxu0 %v2729_v50 }
 0x3f5   : > { %v1475_v61 = vpop.f32.mrf.mxu1  ;;  %2449 = vmatprep.subr.bf16.mxu0 %v2732_v53 }
 0x3f6   : > { %v1498_v62 = vsel %vm1486_vm4, %v1485_v59, -inf }
 0x3f7   : > { %1499 = vmax.xlane.f32.xlu1 %v1498_v62  ;;  %v2579_v41 = vpop.f32.mrf.mxu1 }
 0x3f8   : > { %2450 = vmatpush3.bf16.msra.mxu0 %v2733_v45 }
 0x3f9   : > { %2592 = vmatprep.subr.bf16.mxu0 %v2777_v9 }
 0x3fb   : > { %1488 = vmax.xlane.f32.xlu1 %v1487_v38  ;;  %v2736_v38 = vld [vmem:[%s3386_s9 + $0x38] sm:$0xff]  }
 0x480   : > { %v1500_v0 = vpop.xlane.xlu1 %1499 }
 0x481   : > { %v1501_v1 = vsub.f32 %v1485_v59, %v1500_v0 }
 0x483   : > { %v1502_v2 = vmul.f32 1.442695, %v1501_v1  ;;  %v1608_v1 = vpack.c.bf16 %v3181_v22, %v3176_v18 }
 0x484   : > { %v1489_v3 = vpop.xlane.xlu1 %1488 }
 0x485   : > { %2744 = vpow2.f32 %v1502_v2  ;;  %v1490_v4 = vsub.f32 %v1481_v63, %v1489_v3 }
 0x487   : > { %v1491_v5 = vmul.f32 1.442695, %v1490_v4 }
 0x489   : > { %2746 = vpow2.f32 %v1491_v5  ;;  %v2737_v5 = vld [vmem:[%s3386_s9 + $0x30] sm:$0xff]  }
 0x492   : > { %v2745_v6 = vpop.eup %2744 }
 0x493   : > { %v1504_v7 = vsel %vm1486_vm4, %v2745_v6, 0.0 }
 0x494   : > { %1505 = vadd.xlane.f32.xlu0 %v1504_v7  ;;  %v2740_v7 = vld [vmem:[%s3386_s9 + $0x18] sm:$0xff]  }
 0x496   : > { %v2747_v8 = vpop.eup %2746 }
 0x497   : > { %v1493_v10 = vsel %vm1486_vm4, %v2747_v8, 0.0 }
 0x498   : > { %1494 = vadd.xlane.f32.xlu1 %v1493_v10  ;;  %v2742_v10 = vld [vmem:[%s3386_s9 + $0x8] sm:$0xff]  }
 0x51d   : > { %v1506_v23 = vpop.xlane.xlu0 %1505 }
 0x51e   : > { %2748 = vrcp.f32 %v1506_v23 }
 0x521   : > { %v1495_v36 = vpop.xlane.xlu1 %1494 }
 0x522   : > { %2750 = vrcp.f32 %v1495_v36 }
 0x52b   : > { %v2749_v25 = vpop.eup %2748 }
 0x52c   : > { %v1508_v26 = vmul.f32 %v2749_v25, %v2745_v6 }
 0x52e   : > { %v1509_v40 = vpack.c.bf16 %v1508_v26, %v1508_v26 }
 0x52f   : > { %v2751_v28 = vpop.eup %2750 }
 0x530   : > { %2583 = vmatmul.mubr.msk.bf16.vlgmr.msra.gmra.mxu1 %vm1486_vm4, %v1509_v40  ;;  %v1497_v29 = vmul.f32 %v2751_v28, %v2747_v8  ;;  %v2741_v8 = vld [vmem:[%s3386_s9 + $0x10] sm:$0xff]  }
 0x531   : > { %2587 = vmatpush3.bf16.msra.mxu1 %v3186_v24  ;;  %2588 = vmatprep.mubr.msk.bf16.mxu1 %vm2778_vm0, %v2777_v9  ;;  %v2711_v24 = vld [vmem:[%s3384_s7 + $0xb0] sm:$0xff]  }
 0x532   : > { %2457 = vmatprep.subr.bf16.mxu1 %v2706_v27  ;;  %v1557_v31 = vpack.c.bf16 %v1497_v29, %v1497_v29 }
 0x538   : > { %2589 = vmatmul.mubr.msk.bf16.vlgmr.msra.gmra.mxu1 %vm1486_vm4, %v1557_v31 }
 0x539   : > { %2458 = vmatpush3.bf16.msra.mxu1 %v2707_v30 }
 0x53a   : > { %2459 = vmatprep.subr.bf16.mxu1 %v2710_v32  ;;  %v2334_v32 = vld [vmem:[%s3387_s10] ss:$0 sm:$0xff] }
 0x53d   : > { %2460 = vmatpush3.bf16.msra.mxu1 %v2711_v24 }
 0x53e   : > { %2461 = vmatprep.subr.bf16.mxu1 %v2714_v33 }
 0x541   : > { %2462 = vmatpush3.bf16.msra.mxu1 %v2715_v34 }
 0x542   : > { %2463 = vmatprep.subr.bf16.mxu1 %v2718_v35 }
 0x545   : > { %2464 = vmatpush3.bf16.msra.mxu1 %v2719_v37 }
 0x546   : > { %2465 = vmatprep.subr.bf16.mxu1 %v2722_v39 }
 0x549   : > { %2466 = vmatpush3.bf16.msra.mxu1 %v2723_v42 }
 0x54a   : > { %2467 = vmatprep.subr.bf16.mxu1 %v2726_v47 }
 0x54d   : > { %2468 = vmatpush3.bf16.msra.mxu1 %v2727_v48 }
 0x54e   : > { %2469 = vmatprep.subr.bf16.mxu1 %v2730_v51 }
 0x551   : > { %2470 = vmatpush3.bf16.msra.mxu1 %v2731_v52 }
 0x552   : > { %2471 = vmatprep.subr.bf16.mxu1 %v2734_v46 }
 0x555   : > { %2472 = vmatpush3.bf16.msra.mxu1 %v2735_v54 }
 0x5f0   : > { %v1551_v55 = vpop.f32.mrf.mxu1 }
 0x5f1   : > { %v1604_v59 = vsub.f32 %v3176_v18, %v1551_v55  ;;  %v1606_v61 = vmul.f32 %v1551_v55, %v3176_v18  ;;  %v2738_v18 = vld [vmem:[%s3386_s9 + $0x28] sm:$0xff]  }
 0x5f2   : > { %v2584_v56 = vpop.f32.mrf.mxu1 }
 0x5f4   : > { %v1554_v57 = vpop.f32.mrf.mxu1 }
 0x5f6   : > { %v2585_v58 = vpop.f32.mrf.mxu1 }
 0x5f8   : > { %v1598_v60 = vpop.f32.mrf.mxu1 }
 0x5f9   : > { %v1605_v62 = vsub.f32 %v3181_v22, %v1598_v60  ;;  %v1607_v63 = vmul.f32 %v1598_v60, %v3181_v22  ;;  %v1609_v41 = vpack.c.bf16 %v1598_v60, %v1551_v55  ;;  %v2739_v22 = vld [vmem:[%s3386_s9 + $0x20] sm:$0xff]  }
 0x5fa   : > { %v2590_v0 = vpop.f32.mrf.mxu1 }
 0x5fb   : > { %v1610_v2 = vpack.c.bf16 %v1605_v62, %v1604_v59  ;;  %1907 = vmatprep.mubr.bf16.mxu0 %v1609_v41  ;;  %v1611_v3 = vpack.c.bf16 %v1607_v63, %v1606_v61 }
 0x5fc   : > { %v1601_v4 = vpop.f32.mrf.mxu1  ;;  %1908 = vmatmul.mubr.bf16.vlgmr.msra.gmra.mxu0 %v1608_v1 }
 0x5fd   : > { %1948 = vmatprep.mubr.bf16.mxu1 %v1611_v3  ;;  %2593 = vmatpush3.bf16.msra.mxu0 %v2736_v38 }
 0x5fe   : > { %v2591_v6 = vpop.f32.mrf.mxu1  ;;  %1949 = vmatmul.mubr.bf16.vlgmr.msra.gmra.mxu1 %v1610_v2  ;;  %2594 = vmatprep.subr.bf16.mxu0 %v2777_v9 }
 0x5ff   : > { %2608 = vmatprep.mubr.msk.bf16.mxu0 %vm2778_vm0, %v2777_v9 }
 0x601   : > { %2595 = vmatpush3.bf16.msra.mxu0 %v2737_v5 }
 0x602   : > { %2596 = vmatprep.subr.bf16.mxu0 %v2777_v9 }
 0x605   : > { %2597 = vmatpush3.bf16.msra.mxu0 %v2738_v18 }
 0x606   : > { %2598 = vmatprep.subr.bf16.mxu0 %v2777_v9 }
 0x609   : > { %2599 = vmatpush3.bf16.msra.mxu0 %v2739_v22 }
 0x60a   : > { %2600 = vmatprep.subr.bf16.mxu0 %v2777_v9 }
 0x60d   : > { %2601 = vmatpush3.bf16.msra.mxu0 %v2740_v7 }
 0x60e   : > { %2602 = vmatprep.subr.bf16.mxu0 %v2777_v9 }
 0x611   : > { %2603 = vmatpush3.bf16.msra.mxu0 %v2741_v8 }
 0x612   : > { %2604 = vmatprep.subr.bf16.mxu0 %v2777_v9 }
 0x615   : > { %2605 = vmatpush3.bf16.msra.mxu0 %v2742_v10 }
 0x616   : > { %2606 = vmatprep.subr.bf16.mxu0 %v2777_v9 }
 0x619   : > { %2607 = vmatpush3.bf16.msra.mxu0 %v2743_v11 }
 0x6bc   : > { %v2451_v12 = vpop.f32.mrf.mxu0 }
 0x6be   : > { %v2452_v14 = vpop.f32.mrf.mxu0  ;;  %v2473_v15 = vpop.f32.mrf.mxu1 }
 0x6bf   : > { %v2453_v16 = vadd.f32 %v2452_v14, %v2451_v12 }
 0x6c0   : > { %v2454_v17 = vpop.f32.mrf.mxu0  ;;  %v2474_v19 = vpop.f32.mrf.mxu1 }
 0x6c1   : > { %v1910_v20 = vadd.f32 %v2453_v16, %v2301_v13  ;;  %v2475_v21 = vadd.f32 %v2474_v19, %v2473_v15 }
 0x6c2   : > { %v2455_v23 = vpop.f32.mrf.mxu0  ;;  %v2476_v36 = vpop.f32.mrf.mxu1 }
 0x6c3   : > { %v2456_v9 = vadd.f32 %v2455_v23, %v2454_v17  ;;  %v1951_v26 = vadd.f32 %v2475_v21, %v1910_v20 }
 0x6c4   : > { %v2477_v25 = vpop.f32.mrf.mxu1 }
 0x6c5   : > { %v1913_v40 = vadd.f32 %v2456_v9, %v2301_v13  ;;  %v2478_v27 = vadd.f32 %v2477_v25, %v2476_v36  ;;  %v1957_v29 = vmax.f32 %v1951_v26, 0.0 }
 0x6c7   : > { %v1954_v28 = vadd.f32 %v2478_v27, %v1913_v40 }
 0x6c9   : > { %v1958_v30 = vmax.f32 %v1954_v28, 0.0 }
 0x6cb   : > { %v1959_v31 = vpack.c.bf16 %v1958_v30, %v1957_v29 }
 0x6cd   : > { %2609 = vmatmul.mubr.bf16.vlgmr.msra.gmra.mxu0 %v1959_v31 }
 0x78d   : > { %v2065_v24 = vpop.f32.mrf.mxu0 }
 0x78e   : > { %v2066_v33 = vadd.f32 %v2334_v32, %v2065_v24 }
 0x78f   : > { %v2610_v34 = vpop.f32.mrf.mxu0 }
 0x790   : > { %v2072_v35 = vmax.f32 %v2066_v33, 0.0 }
 0x791   : > { %v2068_v37 = vpop.f32.mrf.mxu0 }
 0x792   : > { %2074 = vst [vmem:[%s536_s22] sm:$0xff] %v2072_v35  ;;  %v2069_v39 = vadd.f32 %v2334_v32, %v2068_v37  ;;  %2082 = sbr.rel (!%p2873_p5) target bundleno = 1951 (0x79f), region = 178 }
 0x793   : > { %v2611_v42 = vpop.f32.mrf.mxu0 }
 0x794   : > { %v2073_v43 = vmax.f32 %v2069_v39, 0.0 }
 0x796   : > { %2075 = vst [vmem:[%s536_s22 + $0x8] sm:$0xff] %v2073_v43 }
 0x799   : > { %v2115_v44 = vld [vmem:[%s536_s22] sm:$0xff] }
 0x79a   : > { %2116 = vst [vmem:[%s2084_s30] sm:$0xff] %v2115_v44 }
 0x79d   : > { %v2117_v47 = vld [vmem:[%s536_s22 + $0x8] sm:$0xff] }
 0x79e   : > { %2118 = vst [vmem:[%s2084_s30 + $0x10] sm:$0xff] %v2117_v47 }
 0x79f PF: > { %p18_p10 = scmp.ge.s32.totalorder %s2856_s21, 4   ;;  %s3393_s17 = smov %s2770_s18 }
 0x7a0   : > { %s3394_s18 = smov %s2867_s24  ;;  %s3395_s19 = smov %s2856_s21 }
 0x7a1   :  { %20 = sbr.rel (!%p18_p10) target bundleno = 2 (0x2), region = 263 }

</bundles_post_ra>
